<compile_context>
chip_gen: v7x
topology: tpu7x:2x2x1
jax: 0.10.0
libtpu: 0.0.40
codegen_flags: <defaults>
</compile_context>

<pallas_src>
import functools

import jax
import jax.numpy as jnp
from jax.experimental import pallas as pl
from jax.experimental.pallas import tpu as pltpu


_BLOCK_CH = (128, 128, 64, 32)      # reversed block_out_channels of the VAEDecoder
_OUT_CH = 8
_HEAD_CH = 32
_UPX = 24


def _round_up(x, m):
    return ((x + m - 1) // m) * m


# ----------------------- kernel 1: fused coarse decoder (+ folded head W1) -----------------------

def _decoder_kernel(*refs, n_layers, n_images, p0):
    # refs = (noise, wt0, b0, ..., wt{L-1}, b{L-1}, w1, out)
    # layout: channels on sublanes, coarse pixels on lanes -> Y = W @ X + b
    noise_ref = refs[0]
    w1_ref = refs[1 + 2 * n_layers]          # (32, 8) bf16
    o_ref = refs[-1]                         # (32, n*P0) f32
    for i in range(n_images):                # static unroll: all weights VMEM-resident
        x = noise_ref[i].astype(jnp.bfloat16)                    # (noise_ch, P0)
        for l in range(n_layers):
            wt = refs[1 + 2 * l][i]                              # (cout, cin) bf16
            b = refs[2 + 2 * l][i]                               # (cout, 1)   f32
            y = jnp.dot(wt, x, preferred_element_type=jnp.float32) + b
            if l < n_layers - 1:                                 # SiLU on all but conv_out
                y = y * jax.nn.sigmoid(y)                        # f32 math (v5e: no bf16 VPU/EUP)
            x = y.astype(jnp.bfloat16)
        # fold head Linear(8, 32): coarse32 = W1 @ coarse8
        y32 = jnp.dot(w1_ref[...], x, preferred_element_type=jnp.float32)   # (32, P0)
        o_ref[:, i * p0:(i + 1) * p0] = y32


def decode_coarse32(noise, dec_wts, dec_bs, w1):
    # noise: (n, noise_ch, h0, w0) -> W1-projected coarse features (32, n*h0*w0), lane-major.
    n, nc, h0, w0 = noise.shape
    p0 = h0 * w0
    n_layers = len(dec_wts)
    args = [noise.reshape(n, nc, p0)]
    for wt, b in zip(dec_wts, dec_bs):
        args += [wt.astype(jnp.bfloat16), b]                     # bf16 MXU inputs, f32 bias
    args.append(w1.astype(jnp.bfloat16))

    return pl.pallas_call(
        functools.partial(_decoder_kernel, n_layers=n_layers, n_images=n, p0=p0),
        out_shape=jax.ShapeDtypeStruct((_HEAD_CH, n * p0), jnp.float32),
    )(*args)


# ------------------ kernel 2: fused sampled-interp + head tail + masked MSE ------------------

def _head_mse_kernel(c32_ref, wsel_ref, d_ref, b1_ref, w2_ref, b2_ref,
                     o_ref, acc_ref, *, n_valid, tile, tiles_per_block):
    i = pl.program_id(0)                     # sample super-block ("parallel" -> v7x cores)
    j = pl.program_id(1)                     # tile within super-block ("arbitrary" accumulation)

    @pl.when(j == 0)
    def _():
        acc_ref[...] = jnp.zeros_like(acc_ref)

    # single (32, K) x (K, tile) bf16 MXU matmul (interp + head Linear(8,32) folded), f32 acc
    h = jnp.dot(c32_ref[...], wsel_ref[...], preferred_element_type=jnp.float32)
    h = h + b1_ref[...]                                          # (32, tile)
    h = h * jax.nn.sigmoid(h)                                    # SiLU
    pred = jnp.sum(w2_ref[...] * h, axis=0, keepdims=True) + b2_ref[...]   # (1, tile)

    col = (i * tiles_per_block + j) * tile + jax.lax.broadcasted_iota(jnp.int32, (1, tile), 1)
    err = jnp.where(col < n_valid, d_ref[...] - pred, 0.0)
    acc_ref[...] += jnp.sum(err * err, keepdims=True)            # (1, 1)

    @pl.when(j == pl.num_programs(1) - 1)
    def _():
        o_ref[...] = jnp.broadcast_to(acc_ref[...], o_ref.shape)  # lane-dense (1,128) partial


def _pick_tile(k, s, itemsize=2, budget=8 << 20):
    # largest lane-dense tile (multiple of 128, <= 2048) whose double-buffered (K, tile)
    # wsel block stays under `budget` bytes -> fits v5e/v6e/v7x scoped VMEM with headroom.
    tile = 2048
    while tile > 128 and 2 * k * tile * itemsize > budget:
        tile //= 2
    per_block = _round_up(max((s + 1) // 2, 1), 128)             # per super-block need
    return max(128, min(tile, per_block))


def sampled_head_mse(coarse32, wsel, depth, head, *, loss_weight):
    # coarse32: (32, K) f32, wsel: (K, S) f32, depth: (S,) f32
    k, s = wsel.shape
    tile = _pick_tile(k, s)
    n_blocks = 2                                                  # leading "parallel" axis
    tiles_per_block = -(-s // (n_blocks * tile))
    s_pad = n_blocks * tiles_per_block * tile

    wsel_p = jnp.pad(wsel, ((0, 0), (0, s_pad - s))).astype(jnp.bfloat16)
    depth_p = jnp.pad(depth.reshape(1, s), ((0, 0), (0, s_pad - s)))
    c32_bf16 = coarse32.astype(jnp.bfloat16)

    cost = pl.CostEstimate(
        flops=2 * _HEAD_CH * k * s_pad + 70 * s_pad,
        transcendentals=_HEAD_CH * s_pad,
        bytes_accessed=k * s_pad * 2 + _HEAD_CH * k * 2 + s_pad * 6 + n_blocks * 128 * 4,
    )

    partials = pl.pallas_call(
        functools.partial(_head_mse_kernel, n_valid=s, tile=tile,
                          tiles_per_block=tiles_per_block),
        out_shape=jax.ShapeDtypeStruct((1, n_blocks * 128), jnp.float32),
        grid=(n_blocks, tiles_per_block),
        in_specs=[
            pl.BlockSpec((_HEAD_CH, k), lambda i, j: (0, 0)),     # resident coarse32 (bf16)
            pl.BlockSpec((k, tile), lambda i, j: (0, i * tiles_per_block + j)),   # wsel stream
            pl.BlockSpec((1, tile), lambda i, j: (0, i * tiles_per_block + j)),   # target depth
            pl.BlockSpec((_HEAD_CH, 1), lambda i, j: (0, 0)),     # head b1
            pl.BlockSpec((_HEAD_CH, 1), lambda i, j: (0, 0)),     # head W2 (column)
            pl.BlockSpec((1, 1), lambda i, j: (0, 0)),            # head b2
        ],
        out_specs=pl.BlockSpec((1, 128), lambda i, j: (0, i)),
        scratch_shapes=[pltpu.VMEM((1, 1), jnp.float32)],
        compiler_params=pltpu.CompilerParams(
            dimension_semantics=("parallel", "arbitrary"),
            vmem_limit_bytes=32 * 1024 * 1024),
        cost_estimate=cost,
    )(c32_bf16, wsel_p, depth_p, head["b1"], head["w2"], head["b2"])

    total = jnp.sum(partials.reshape(n_blocks, 128)[:, 0])
    return loss_weight * total / s


# --------------------- plain-JAX glue (small matrices / index arithmetic) ---------------------

def _interp_matrix(n_out, n_in):
    # align_corners=True bilinear interpolation matrix (nn.UpsamplingBilinear2d).
    if n_in == 1:
        return jnp.ones((n_out, 1), jnp.float32)
    scale = (n_in - 1) / max(n_out - 1, 1)
    src = jnp.arange(n_out, dtype=jnp.float32) * scale
    i0 = jnp.clip(jnp.floor(src).astype(jnp.int32), 0, n_in - 2)
    frac = src - i0.astype(jnp.float32)
    return (jax.nn.one_hot(i0, n_in, dtype=jnp.float32) * (1.0 - frac)[:, None]
            + jax.nn.one_hot(i0 + 1, n_in, dtype=jnp.float32) * frac[:, None])


def _composed_interp_matrix(n_out, n_coarse, up=8):
    # bilinear(align_corners=True) resize of the nearest-up8x map, folded onto the coarse axis.
    n_fine = up * n_coarse
    a = _interp_matrix(n_out, n_fine)                                       # (n_out, n_fine)
    rep = (jnp.arange(n_fine)[:, None] // up ==
           jnp.arange(n_coarse)[None, :]).astype(jnp.float32)               # (n_fine, n_coarse)
    return a @ rep                                                          # (n_out, n_coarse)


def _sample_interp_weights(sample_inds, n_images, h0, w0, target_h, target_w):
    # (n*P0, S): column s holds the interpolation weights that map the stacked coarse
    # features (·, n*P0) to the sampled fine pixel sample_inds[s].
    ah = _composed_interp_matrix(target_h, h0)            # (H, h0)
    aw = _composed_interp_matrix(target_w, w0)            # (W, w0)
    hw = target_h * target_w
    ni = sample_inds // hw
    p = sample_inds % hw
    r = p // target_w
    c = p % target_w
    wpix = (ah[r][:, :, None] * aw[c][:, None, :]).reshape(-1, h0 * w0)       # (S, P0)
    sel = (jnp.arange(n_images)[None, :] == ni[:, None]).astype(jnp.float32)  # (S, n)
    wsel = (sel[:, :, None] * wpix[:, None, :]).reshape(-1, n_images * h0 * w0)
    return wsel.T                                                             # (n*P0, S)


# ----------------------------- model params / forward -----------------------------

def init_params(key, noise_ch, n_images, target_h, target_w):
    h0, w0 = target_h // _UPX, target_w // _UPX
    chans = (noise_ch, _BLOCK_CH[0]) + _BLOCK_CH + (_OUT_CH,)   # conv_in, 4 stages, conv_out
    n_layers = len(chans) - 1

    k_noise, k_dec, k_head = jax.random.split(key, 3)
    noise = jax.random.normal(k_noise, (n_images, noise_ch, h0, w0), jnp.float32)

    dec_wts, dec_bs = [], []
    dkeys = jax.random.split(k_dec, 2 * n_layers)
    for l in range(n_layers):
        cin, cout = chans[l], chans[l + 1]
        s = 1.0 / (cin ** 0.5)
        dec_wts.append(jax.random.uniform(dkeys[2 * l], (n_images, cout, cin),
                                          jnp.float32, -s, s))
        dec_bs.append(jax.random.uniform(dkeys[2 * l + 1], (n_images, cout, 1),
                                         jnp.float32, -s, s))

    hk = jax.random.split(k_head, 4)
    s1, s2 = 1.0 / (_OUT_CH ** 0.5), 1.0 / (_HEAD_CH ** 0.5)
    head = dict(
        w1=jax.random.uniform(hk[0], (_HEAD_CH, _OUT_CH), jnp.float32, -s1, s1),  # Linear(8,32).weight
        b1=jax.random.uniform(hk[1], (_HEAD_CH, 1), jnp.float32, -s1, s1),
        w2=jax.random.uniform(hk[2], (_HEAD_CH, 1), jnp.float32, -s2, s2),        # Linear(32,1).weight^T
        b2=jax.random.uniform(hk[3], (1, 1), jnp.float32, -s2, s2),
    )
    return dict(noise=noise, dec_wts=dec_wts, dec_bs=dec_bs, head=head)


def depth_regularizer_forward(params, sample_inds, depth, *, target_h, target_w,
                              loss_weight=1.0):
    if sample_inds is None or sample_inds.shape[0] == 0:   # empty-sample guard (no div-by-zero)
        return jnp.zeros((), jnp.float32)

    noise = params["noise"]
    n, _, h0, w0 = noise.shape

    # 1) fused per-image decoders at coarse resolution, head W1 folded in (one pallas_call)
    coarse32 = decode_coarse32(noise, params["dec_wts"], params["dec_bs"],
                               params["head"]["w1"])                         # (32, n*P0)

    # 2) compose nearest-8x + bilinear(align_corners=True) + the sample_inds gather into
    #    per-sample interpolation weights (the dense (n, 8, H, W) map is never materialized)
    wsel = _sample_interp_weights(sample_inds, n, h0, w0, target_h, target_w)

    # 3) fused interpolation + head tail (b1, SiLU, Linear(32,1)) + masked MSE
    return sampled_head_mse(coarse32, wsel, depth, params["head"], loss_weight=loss_weight)


# ----------------------------- demo -----------------------------

if __name__ == "__main__":
    noise_ch, n_images = 4, 2
    target_h = target_w = 48          # divisible by upx=24 -> 2x2 coarse noise
    n_samples = 256
    loss_weight = 1.0

    key = jax.random.PRNGKey(0)
    k_par, k_idx, k_dep = jax.random.split(key, 3)

    params = init_params(k_par, noise_ch, n_images, target_h, target_w)
    sample_inds = jax.random.randint(k_idx, (n_samples,), 0,
                                     n_images * target_h * target_w)
    depth = jax.random.normal(k_dep, (n_samples,), jnp.float32)

    fwd = jax.jit(functools.partial(depth_regularizer_forward,
                                    target_h=target_h, target_w=target_w,
                                    loss_weight=loss_weight))
    loss = fwd(params, sample_inds, depth)
    jax.block_until_ready(loss)
    print("KERNEL_OK")
</pallas_src>

<mosaic_0001>
module attributes {stable_mosaic.version = 11 : i64} {
  func.func @_decoder_kernel(%arg0: memref<2x4x4xf32, #tpu.memory_space<vmem>>, %arg1: memref<2x128x4xbf16, #tpu.memory_space<vmem>>, %arg2: memref<2x128x1xf32, #tpu.memory_space<vmem>>, %arg3: memref<2x128x128xbf16, #tpu.memory_space<vmem>>, %arg4: memref<2x128x1xf32, #tpu.memory_space<vmem>>, %arg5: memref<2x128x128xbf16, #tpu.memory_space<vmem>>, %arg6: memref<2x128x1xf32, #tpu.memory_space<vmem>>, %arg7: memref<2x64x128xbf16, #tpu.memory_space<vmem>>, %arg8: memref<2x64x1xf32, #tpu.memory_space<vmem>>, %arg9: memref<2x32x64xbf16, #tpu.memory_space<vmem>>, %arg10: memref<2x32x1xf32, #tpu.memory_space<vmem>>, %arg11: memref<2x8x32xbf16, #tpu.memory_space<vmem>>, %arg12: memref<2x8x1xf32, #tpu.memory_space<vmem>>, %arg13: memref<32x8xbf16, #tpu.memory_space<vmem>>, %arg14: memref<32x8xf32, #tpu.memory_space<vmem>>) attributes {dimension_semantics = [], scalar_prefetch = 0 : i64, scratch_operands = 0 : i64, tpu.core_type = #tpu.core_type<tc>} {
    %c0 = arith.constant 0 : index
    %c0_0 = arith.constant 0 : index
    %c0_1 = arith.constant 0 : index
    %0 = vector.load %arg0[%c0, %c0_0, %c0_1] : memref<2x4x4xf32, #tpu.memory_space<vmem>>, vector<1x4x4xf32>
    %1 = vector.shape_cast %0 : vector<1x4x4xf32> to vector<4x4xf32>
    %2 = arith.truncf %1 : vector<4x4xf32> to vector<4x4xbf16>
    %c0_2 = arith.constant 0 : index
    %c0_3 = arith.constant 0 : index
    %c0_4 = arith.constant 0 : index
    %3 = vector.load %arg1[%c0_2, %c0_3, %c0_4] : memref<2x128x4xbf16, #tpu.memory_space<vmem>>, vector<1x128x4xbf16>
    %4 = vector.shape_cast %3 : vector<1x128x4xbf16> to vector<128x4xbf16>
    %c0_5 = arith.constant 0 : index
    %c0_6 = arith.constant 0 : index
    %c0_7 = arith.constant 0 : index
    %5 = vector.load %arg2[%c0_5, %c0_6, %c0_7] : memref<2x128x1xf32, #tpu.memory_space<vmem>>, vector<1x128x1xf32>
    %6 = vector.shape_cast %5 : vector<1x128x1xf32> to vector<128x1xf32>
    %cst = arith.constant dense<0.000000e+00> : vector<128x4xf32>
    %7 = tpu.matmul %4, %2, %cst {dimension_numbers = #tpu.dot_dimension_numbers<[1], [0], [0], [1], [0, 0, 1, 1], [], []>} : vector<128x4xbf16>, vector<4x4xbf16>, vector<128x4xf32> -> vector<128x4xf32>
    %8 = vector.broadcast %6 : vector<128x1xf32> to vector<128x4xf32>
    %9 = arith.addf %7, %8 : vector<128x4xf32>
    %10 = arith.negf %9 : vector<128x4xf32>
    %11 = math.exp %10 : vector<128x4xf32>
    %cst_8 = arith.constant 1.000000e+00 : f32
    %12 = vector.broadcast %cst_8 : f32 to vector<128x4xf32>
    %13 = arith.addf %12, %11 : vector<128x4xf32>
    %14 = arith.divf %12, %13 : vector<128x4xf32>
    %15 = arith.mulf %9, %14 : vector<128x4xf32>
    %16 = arith.truncf %15 : vector<128x4xf32> to vector<128x4xbf16>
    %c0_9 = arith.constant 0 : index
    %c0_10 = arith.constant 0 : index
    %c0_11 = arith.constant 0 : index
    %17 = vector.load %arg3[%c0_9, %c0_10, %c0_11] : memref<2x128x128xbf16, #tpu.memory_space<vmem>>, vector<1x128x128xbf16>
    %18 = vector.shape_cast %17 : vector<1x128x128xbf16> to vector<128x128xbf16>
    %c0_12 = arith.constant 0 : index
    %c0_13 = arith.constant 0 : index
    %c0_14 = arith.constant 0 : index
    %19 = vector.load %arg4[%c0_12, %c0_13, %c0_14] : memref<2x128x1xf32, #tpu.memory_space<vmem>>, vector<1x128x1xf32>
    %20 = vector.shape_cast %19 : vector<1x128x1xf32> to vector<128x1xf32>
    %cst_15 = arith.constant dense<0.000000e+00> : vector<128x4xf32>
    %21 = tpu.matmul %18, %16, %cst_15 {dimension_numbers = #tpu.dot_dimension_numbers<[1], [0], [0], [1], [0, 0, 1, 1], [], []>} : vector<128x128xbf16>, vector<128x4xbf16>, vector<128x4xf32> -> vector<128x4xf32>
    %22 = vector.broadcast %20 : vector<128x1xf32> to vector<128x4xf32>
    %23 = arith.addf %21, %22 : vector<128x4xf32>
    %24 = arith.negf %23 : vector<128x4xf32>
    %25 = math.exp %24 : vector<128x4xf32>
    %cst_16 = arith.constant 1.000000e+00 : f32
    %26 = vector.broadcast %cst_16 : f32 to vector<128x4xf32>
    %27 = arith.addf %26, %25 : vector<128x4xf32>
    %28 = arith.divf %26, %27 : vector<128x4xf32>
    %29 = arith.mulf %23, %28 : vector<128x4xf32>
    %30 = arith.truncf %29 : vector<128x4xf32> to vector<128x4xbf16>
    %c0_17 = arith.constant 0 : index
    %c0_18 = arith.constant 0 : index
    %c0_19 = arith.constant 0 : index
    %31 = vector.load %arg5[%c0_17, %c0_18, %c0_19] : memref<2x128x128xbf16, #tpu.memory_space<vmem>>, vector<1x128x128xbf16>
    %32 = vector.shape_cast %31 : vector<1x128x128xbf16> to vector<128x128xbf16>
    %c0_20 = arith.constant 0 : index
    %c0_21 = arith.constant 0 : index
    %c0_22 = arith.constant 0 : index
    %33 = vector.load %arg6[%c0_20, %c0_21, %c0_22] : memref<2x128x1xf32, #tpu.memory_space<vmem>>, vector<1x128x1xf32>
    %34 = vector.shape_cast %33 : vector<1x128x1xf32> to vector<128x1xf32>
    %cst_23 = arith.constant dense<0.000000e+00> : vector<128x4xf32>
    %35 = tpu.matmul %32, %30, %cst_23 {dimension_numbers = #tpu.dot_dimension_numbers<[1], [0], [0], [1], [0, 0, 1, 1], [], []>} : vector<128x128xbf16>, vector<128x4xbf16>, vector<128x4xf32> -> vector<128x4xf32>
    %36 = vector.broadcast %34 : vector<128x1xf32> to vector<128x4xf32>
    %37 = arith.addf %35, %36 : vector<128x4xf32>
    %38 = arith.negf %37 : vector<128x4xf32>
    %39 = math.exp %38 : vector<128x4xf32>
    %cst_24 = arith.constant 1.000000e+00 : f32
    %40 = vector.broadcast %cst_24 : f32 to vector<128x4xf32>
    %41 = arith.addf %40, %39 : vector<128x4xf32>
    %42 = arith.divf %40, %41 : vector<128x4xf32>
    %43 = arith.mulf %37, %42 : vector<128x4xf32>
    %44 = arith.truncf %43 : vector<128x4xf32> to vector<128x4xbf16>
    %c0_25 = arith.constant 0 : index
    %c0_26 = arith.constant 0 : index
    %c0_27 = arith.constant 0 : index
    %45 = vector.load %arg7[%c0_25, %c0_26, %c0_27] : memref<2x64x128xbf16, #tpu.memory_space<vmem>>, vector<1x64x128xbf16>
    %46 = vector.shape_cast %45 : vector<1x64x128xbf16> to vector<64x128xbf16>
    %c0_28 = arith.constant 0 : index
    %c0_29 = arith.constant 0 : index
    %c0_30 = arith.constant 0 : index
    %47 = vector.load %arg8[%c0_28, %c0_29, %c0_30] : memref<2x64x1xf32, #tpu.memory_space<vmem>>, vector<1x64x1xf32>
    %48 = vector.shape_cast %47 : vector<1x64x1xf32> to vector<64x1xf32>
    %cst_31 = arith.constant dense<0.000000e+00> : vector<64x4xf32>
    %49 = tpu.matmul %46, %44, %cst_31 {dimension_numbers = #tpu.dot_dimension_numbers<[1], [0], [0], [1], [0, 0, 1, 1], [], []>} : vector<64x128xbf16>, vector<128x4xbf16>, vector<64x4xf32> -> vector<64x4xf32>
    %50 = vector.broadcast %48 : vector<64x1xf32> to vector<64x4xf32>
    %51 = arith.addf %49, %50 : vector<64x4xf32>
    %52 = arith.negf %51 : vector<64x4xf32>
    %53 = math.exp %52 : vector<64x4xf32>
    %cst_32 = arith.constant 1.000000e+00 : f32
    %54 = vector.broadcast %cst_32 : f32 to vector<64x4xf32>
    %55 = arith.addf %54, %53 : vector<64x4xf32>
    %56 = arith.divf %54, %55 : vector<64x4xf32>
    %57 = arith.mulf %51, %56 : vector<64x4xf32>
    %58 = arith.truncf %57 : vector<64x4xf32> to vector<64x4xbf16>
    %c0_33 = arith.constant 0 : index
    %c0_34 = arith.constant 0 : index
    %c0_35 = arith.constant 0 : index
    %59 = vector.load %arg9[%c0_33, %c0_34, %c0_35] : memref<2x32x64xbf16, #tpu.memory_space<vmem>>, vector<1x32x64xbf16>
    %60 = vector.shape_cast %59 : vector<1x32x64xbf16> to vector<32x64xbf16>
    %c0_36 = arith.constant 0 : index
    %c0_37 = arith.constant 0 : index
    %c0_38 = arith.constant 0 : index
    %61 = vector.load %arg10[%c0_36, %c0_37, %c0_38] : memref<2x32x1xf32, #tpu.memory_space<vmem>>, vector<1x32x1xf32>
    %62 = vector.shape_cast %61 : vector<1x32x1xf32> to vector<32x1xf32>
    %cst_39 = arith.constant dense<0.000000e+00> : vector<32x4xf32>
    %63 = tpu.matmul %60, %58, %cst_39 {dimension_numbers = #tpu.dot_dimension_numbers<[1], [0], [0], [1], [0, 0, 1, 1], [], []>} : vector<32x64xbf16>, vector<64x4xbf16>, vector<32x4xf32> -> vector<32x4xf32>
    %64 = vector.broadcast %62 : vector<32x1xf32> to vector<32x4xf32>
    %65 = arith.addf %63, %64 : vector<32x4xf32>
    %66 = arith.negf %65 : vector<32x4xf32>
    %67 = math.exp %66 : vector<32x4xf32>
    %cst_40 = arith.constant 1.000000e+00 : f32
    %68 = vector.broadcast %cst_40 : f32 to vector<32x4xf32>
    %69 = arith.addf %68, %67 : vector<32x4xf32>
    %70 = arith.divf %68, %69 : vector<32x4xf32>
    %71 = arith.mulf %65, %70 : vector<32x4xf32>
    %72 = arith.truncf %71 : vector<32x4xf32> to vector<32x4xbf16>
    %c0_41 = arith.constant 0 : index
    %c0_42 = arith.constant 0 : index
    %c0_43 = arith.constant 0 : index
    %73 = vector.load %arg11[%c0_41, %c0_42, %c0_43] : memref<2x8x32xbf16, #tpu.memory_space<vmem>>, vector<1x8x32xbf16>
    %74 = vector.shape_cast %73 : vector<1x8x32xbf16> to vector<8x32xbf16>
    %c0_44 = arith.constant 0 : index
    %c0_45 = arith.constant 0 : index
    %c0_46 = arith.constant 0 : index
    %75 = vector.load %arg12[%c0_44, %c0_45, %c0_46] : memref<2x8x1xf32, #tpu.memory_space<vmem>>, vector<1x8x1xf32>
    %76 = vector.shape_cast %75 : vector<1x8x1xf32> to vector<8x1xf32>
    %cst_47 = arith.constant dense<0.000000e+00> : vector<8x4xf32>
    %77 = tpu.matmul %74, %72, %cst_47 {dimension_numbers = #tpu.dot_dimension_numbers<[1], [0], [0], [1], [0, 0, 1, 1], [], []>} : vector<8x32xbf16>, vector<32x4xbf16>, vector<8x4xf32> -> vector<8x4xf32>
    %78 = vector.broadcast %76 : vector<8x1xf32> to vector<8x4xf32>
    %79 = arith.addf %77, %78 : vector<8x4xf32>
    %80 = arith.truncf %79 : vector<8x4xf32> to vector<8x4xbf16>
    %c0_48 = arith.constant 0 : index
    %c0_49 = arith.constant 0 : index
    %81 = vector.load %arg13[%c0_48, %c0_49] : memref<32x8xbf16, #tpu.memory_space<vmem>>, vector<32x8xbf16>
    %cst_50 = arith.constant dense<0.000000e+00> : vector<32x4xf32>
    %82 = tpu.matmul %81, %80, %cst_50 {dimension_numbers = #tpu.dot_dimension_numbers<[1], [0], [0], [1], [0, 0, 1, 1], [], []>} : vector<32x8xbf16>, vector<8x4xbf16>, vector<32x4xf32> -> vector<32x4xf32>
    %c0_51 = arith.constant 0 : index
    %c0_52 = arith.constant 0 : index
    %83 = vector.load %arg14[%c0_51, %c0_52] : memref<32x8xf32, #tpu.memory_space<vmem>>, vector<32x4xf32>
    tpu.vector_store %arg14[%c0_51, %c0_52], %82 {strides = array<i32>} : memref<32x8xf32, #tpu.memory_space<vmem>>, vector<32x4xf32>,
    %c1 = arith.constant 1 : index
    %c0_53 = arith.constant 0 : index
    %c0_54 = arith.constant 0 : index
    %84 = vector.load %arg0[%c1, %c0_53, %c0_54] : memref<2x4x4xf32, #tpu.memory_space<vmem>>, vector<1x4x4xf32>
    %85 = vector.shape_cast %84 : vector<1x4x4xf32> to vector<4x4xf32>
    %86 = arith.truncf %85 : vector<4x4xf32> to vector<4x4xbf16>
    %c1_55 = arith.constant 1 : index
    %c0_56 = arith.constant 0 : index
    %c0_57 = arith.constant 0 : index
    %87 = vector.load %arg1[%c1_55, %c0_56, %c0_57] : memref<2x128x4xbf16, #tpu.memory_space<vmem>>, vector<1x128x4xbf16>
    %88 = vector.shape_cast %87 : vector<1x128x4xbf16> to vector<128x4xbf16>
    %c1_58 = arith.constant 1 : index
    %c0_59 = arith.constant 0 : index
    %c0_60 = arith.constant 0 : index
    %89 = vector.load %arg2[%c1_58, %c0_59, %c0_60] : memref<2x128x1xf32, #tpu.memory_space<vmem>>, vector<1x128x1xf32>
    %90 = vector.shape_cast %89 : vector<1x128x1xf32> to vector<128x1xf32>
    %cst_61 = arith.constant dense<0.000000e+00> : vector<128x4xf32>
    %91 = tpu.matmul %88, %86, %cst_61 {dimension_numbers = #tpu.dot_dimension_numbers<[1], [0], [0], [1], [0, 0, 1, 1], [], []>} : vector<128x4xbf16>, vector<4x4xbf16>, vector<128x4xf32> -> vector<128x4xf32>
    %92 = vector.broadcast %90 : vector<128x1xf32> to vector<128x4xf32>
    %93 = arith.addf %91, %92 : vector<128x4xf32>
    %94 = arith.negf %93 : vector<128x4xf32>
    %95 = math.exp %94 : vector<128x4xf32>
    %cst_62 = arith.constant 1.000000e+00 : f32
    %96 = vector.broadcast %cst_62 : f32 to vector<128x4xf32>
    %97 = arith.addf %96, %95 : vector<128x4xf32>
    %98 = arith.divf %96, %97 : vector<128x4xf32>
    %99 = arith.mulf %93, %98 : vector<128x4xf32>
    %100 = arith.truncf %99 : vector<128x4xf32> to vector<128x4xbf16>
    %c1_63 = arith.constant 1 : index
    %c0_64 = arith.constant 0 : index
    %c0_65 = arith.constant 0 : index
    %101 = vector.load %arg3[%c1_63, %c0_64, %c0_65] : memref<2x128x128xbf16, #tpu.memory_space<vmem>>, vector<1x128x128xbf16>
    %102 = vector.shape_cast %101 : vector<1x128x128xbf16> to vector<128x128xbf16>
    %c1_66 = arith.constant 1 : index
    %c0_67 = arith.constant 0 : index
    %c0_68 = arith.constant 0 : index
    %103 = vector.load %arg4[%c1_66, %c0_67, %c0_68] : memref<2x128x1xf32, #tpu.memory_space<vmem>>, vector<1x128x1xf32>
    %104 = vector.shape_cast %103 : vector<1x128x1xf32> to vector<128x1xf32>
    %cst_69 = arith.constant dense<0.000000e+00> : vector<128x4xf32>
    %105 = tpu.matmul %102, %100, %cst_69 {dimension_numbers = #tpu.dot_dimension_numbers<[1], [0], [0], [1], [0, 0, 1, 1], [], []>} : vector<128x128xbf16>, vector<128x4xbf16>, vector<128x4xf32> -> vector<128x4xf32>
    %106 = vector.broadcast %104 : vector<128x1xf32> to vector<128x4xf32>
    %107 = arith.addf %105, %106 : vector<128x4xf32>
    %108 = arith.negf %107 : vector<128x4xf32>
    %109 = math.exp %108 : vector<128x4xf32>
    %cst_70 = arith.constant 1.000000e+00 : f32
    %110 = vector.broadcast %cst_70 : f32 to vector<128x4xf32>
    %111 = arith.addf %110, %109 : vector<128x4xf32>
    %112 = arith.divf %110, %111 : vector<128x4xf32>
    %113 = arith.mulf %107, %112 : vector<128x4xf32>
    %114 = arith.truncf %113 : vector<128x4xf32> to vector<128x4xbf16>
    %c1_71 = arith.constant 1 : index
    %c0_72 = arith.constant 0 : index
    %c0_73 = arith.constant 0 : index
    %115 = vector.load %arg5[%c1_71, %c0_72, %c0_73] : memref<2x128x128xbf16, #tpu.memory_space<vmem>>, vector<1x128x128xbf16>
    %116 = vector.shape_cast %115 : vector<1x128x128xbf16> to vector<128x128xbf16>
    %c1_74 = arith.constant 1 : index
    %c0_75 = arith.constant 0 : index
    %c0_76 = arith.constant 0 : index
    %117 = vector.load %arg6[%c1_74, %c0_75, %c0_76] : memref<2x128x1xf32, #tpu.memory_space<vmem>>, vector<1x128x1xf32>
    %118 = vector.shape_cast %117 : vector<1x128x1xf32> to vector<128x1xf32>
    %cst_77 = arith.constant dense<0.000000e+00> : vector<128x4xf32>
    %119 = tpu.matmul %116, %114, %cst_77 {dimension_numbers = #tpu.dot_dimension_numbers<[1], [0], [0], [1], [0, 0, 1, 1], [], []>} : vector<128x128xbf16>, vector<128x4xbf16>, vector<128x4xf32> -> vector<128x4xf32>
    %120 = vector.broadcast %118 : vector<128x1xf32> to vector<128x4xf32>
    %121 = arith.addf %119, %120 : vector<128x4xf32>
    %122 = arith.negf %121 : vector<128x4xf32>
    %123 = math.exp %122 : vector<128x4xf32>
    %cst_78 = arith.constant 1.000000e+00 : f32
    %124 = vector.broadcast %cst_78 : f32 to vector<128x4xf32>
    %125 = arith.addf %124, %123 : vector<128x4xf32>
    %126 = arith.divf %124, %125 : vector<128x4xf32>
    %127 = arith.mulf %121, %126 : vector<128x4xf32>
    %128 = arith.truncf %127 : vector<128x4xf32> to vector<128x4xbf16>
    %c1_79 = arith.constant 1 : index
    %c0_80 = arith.constant 0 : index
    %c0_81 = arith.constant 0 : index
    %129 = vector.load %arg7[%c1_79, %c0_80, %c0_81] : memref<2x64x128xbf16, #tpu.memory_space<vmem>>, vector<1x64x128xbf16>
    %130 = vector.shape_cast %129 : vector<1x64x128xbf16> to vector<64x128xbf16>
    %c1_82 = arith.constant 1 : index
    %c0_83 = arith.constant 0 : index
    %c0_84 = arith.constant 0 : index
    %131 = vector.load %arg8[%c1_82, %c0_83, %c0_84] : memref<2x64x1xf32, #tpu.memory_space<vmem>>, vector<1x64x1xf32>
    %132 = vector.shape_cast %131 : vector<1x64x1xf32> to vector<64x1xf32>
    %cst_85 = arith.constant dense<0.000000e+00> : vector<64x4xf32>
    %133 = tpu.matmul %130, %128, %cst_85 {dimension_numbers = #tpu.dot_dimension_numbers<[1], [0], [0], [1], [0, 0, 1, 1], [], []>} : vector<64x128xbf16>, vector<128x4xbf16>, vector<64x4xf32> -> vector<64x4xf32>
    %134 = vector.broadcast %132 : vector<64x1xf32> to vector<64x4xf32>
    %135 = arith.addf %133, %134 : vector<64x4xf32>
    %136 = arith.negf %135 : vector<64x4xf32>
    %137 = math.exp %136 : vector<64x4xf32>
    %cst_86 = arith.constant 1.000000e+00 : f32
    %138 = vector.broadcast %cst_86 : f32 to vector<64x4xf32>
    %139 = arith.addf %138, %137 : vector<64x4xf32>
    %140 = arith.divf %138, %139 : vector<64x4xf32>
    %141 = arith.mulf %135, %140 : vector<64x4xf32>
    %142 = arith.truncf %141 : vector<64x4xf32> to vector<64x4xbf16>
    %c1_87 = arith.constant 1 : index
    %c0_88 = arith.constant 0 : index
    %c0_89 = arith.constant 0 : index
    %143 = vector.load %arg9[%c1_87, %c0_88, %c0_89] : memref<2x32x64xbf16, #tpu.memory_space<vmem>>, vector<1x32x64xbf16>
    %144 = vector.shape_cast %143 : vector<1x32x64xbf16> to vector<32x64xbf16>
    %c1_90 = arith.constant 1 : index
    %c0_91 = arith.constant 0 : index
    %c0_92 = arith.constant 0 : index
    %145 = vector.load %arg10[%c1_90, %c0_91, %c0_92] : memref<2x32x1xf32, #tpu.memory_space<vmem>>, vector<1x32x1xf32>
    %146 = vector.shape_cast %145 : vector<1x32x1xf32> to vector<32x1xf32>
    %cst_93 = arith.constant dense<0.000000e+00> : vector<32x4xf32>
    %147 = tpu.matmul %144, %142, %cst_93 {dimension_numbers = #tpu.dot_dimension_numbers<[1], [0], [0], [1], [0, 0, 1, 1], [], []>} : vector<32x64xbf16>, vector<64x4xbf16>, vector<32x4xf32> -> vector<32x4xf32>
    %148 = vector.broadcast %146 : vector<32x1xf32> to vector<32x4xf32>
    %149 = arith.addf %147, %148 : vector<32x4xf32>
    %150 = arith.negf %149 : vector<32x4xf32>
    %151 = math.exp %150 : vector<32x4xf32>
    %cst_94 = arith.constant 1.000000e+00 : f32
    %152 = vector.broadcast %cst_94 : f32 to vector<32x4xf32>
    %153 = arith.addf %152, %151 : vector<32x4xf32>
    %154 = arith.divf %152, %153 : vector<32x4xf32>
    %155 = arith.mulf %149, %154 : vector<32x4xf32>
    %156 = arith.truncf %155 : vector<32x4xf32> to vector<32x4xbf16>
    %c1_95 = arith.constant 1 : index
    %c0_96 = arith.constant 0 : index
    %c0_97 = arith.constant 0 : index
    %157 = vector.load %arg11[%c1_95, %c0_96, %c0_97] : memref<2x8x32xbf16, #tpu.memory_space<vmem>>, vector<1x8x32xbf16>
    %158 = vector.shape_cast %157 : vector<1x8x32xbf16> to vector<8x32xbf16>
    %c1_98 = arith.constant 1 : index
    %c0_99 = arith.constant 0 : index
    %c0_100 = arith.constant 0 : index
    %159 = vector.load %arg12[%c1_98, %c0_99, %c0_100] : memref<2x8x1xf32, #tpu.memory_space<vmem>>, vector<1x8x1xf32>
    %160 = vector.shape_cast %159 : vector<1x8x1xf32> to vector<8x1xf32>
    %cst_101 = arith.constant dense<0.000000e+00> : vector<8x4xf32>
    %161 = tpu.matmul %158, %156, %cst_101 {dimension_numbers = #tpu.dot_dimension_numbers<[1], [0], [0], [1], [0, 0, 1, 1], [], []>} : vector<8x32xbf16>, vector<32x4xbf16>, vector<8x4xf32> -> vector<8x4xf32>
    %162 = vector.broadcast %160 : vector<8x1xf32> to vector<8x4xf32>
    %163 = arith.addf %161, %162 : vector<8x4xf32>
    %164 = arith.truncf %163 : vector<8x4xf32> to vector<8x4xbf16>
    %c0_102 = arith.constant 0 : index
    %c0_103 = arith.constant 0 : index
    %165 = vector.load %arg13[%c0_102, %c0_103] : memref<32x8xbf16, #tpu.memory_space<vmem>>, vector<32x8xbf16>
    %cst_104 = arith.constant dense<0.000000e+00> : vector<32x4xf32>
    %166 = tpu.matmul %165, %164, %cst_104 {dimension_numbers = #tpu.dot_dimension_numbers<[1], [0], [0], [1], [0, 0, 1, 1], [], []>} : vector<32x8xbf16>, vector<8x4xbf16>, vector<32x4xf32> -> vector<32x4xf32>
    %c0_105 = arith.constant 0 : index
    %c4 = arith.constant 4 : index
    %167 = vector.load %arg14[%c0_105, %c4] : memref<32x8xf32, #tpu.memory_space<vmem>>, vector<32x4xf32>
    tpu.vector_store %arg14[%c0_105, %c4], %166 {strides = array<i32>} : memref<32x8xf32, #tpu.memory_space<vmem>>, vector<32x4xf32>,
    return
  }
}

module attributes {stable_mosaic.version = 11 : i64} {
  func.func @_head_mse_kernel(%arg0: i32, %arg1: i32, %arg2: memref<32x8xbf16, #tpu.memory_space<vmem>>, %arg3: memref<8x128xbf16, #tpu.memory_space<vmem>>, %arg4: memref<1x128xf32, #tpu.memory_space<vmem>>, %arg5: memref<32x1xf32, #tpu.memory_space<vmem>>, %arg6: memref<32x1xf32, #tpu.memory_space<vmem>>, %arg7: memref<1x1xf32, #tpu.memory_space<vmem>>, %arg8: memref<1x128xf32, #tpu.memory_space<vmem>>, %arg9: memref<1x1xf32, #tpu.memory_space<vmem>>) attributes {dimension_semantics = [#tpu.dimension_semantics<parallel>, #tpu.dimension_semantics<arbitrary>], iteration_bounds = array<i64: 2, 1>, scalar_prefetch = 0 : i64, scratch_operands = 1 : i64, tpu.core_type = #tpu.core_type<tc>, window_params = [{pipeline_mode = #tpu.pipeline_mode<synchronous>, transform_indices = @transform_0, window_bounds = array<i64: 32, 8>}, {transform_indices = @transform_1, window_bounds = array<i64: 8, 128>}, {transform_indices = @transform_2, window_bounds = array<i64: 1, 128>}, {pipeline_mode = #tpu.pipeline_mode<synchronous>, transform_indices = @transform_3, window_bounds = array<i64: 32, 1>}, {pipeline_mode = #tpu.pipeline_mode<synchronous>, transform_indices = @transform_4, window_bounds = array<i64: 32, 1>}, {pipeline_mode = #tpu.pipeline_mode<synchronous>, transform_indices = @transform_5, window_bounds = array<i64: 1, 1>}, {transform_indices = @transform_6, window_bounds = array<i64: 1, 128>}]} {
    %c0_i32 = arith.constant 0 : i32
    %0 = arith.cmpi eq, %arg1, %c0_i32 : i32
    %1 = arith.extui %0 : i1 to i32
    %c0_i32_0 = arith.constant 0 : i32
    %2 = arith.cmpi ne, %1, %c0_i32_0 : i32
    scf.if %2 {
      %cst_22 = arith.constant 0.000000e+00 : f32
      %47 = vector.broadcast %cst_22 : f32 to vector<1x1xf32>
      %c0_23 = arith.constant 0 : index
      %c0_24 = arith.constant 0 : index
      %48 = vector.load %arg9[%c0_23, %c0_24] : memref<1x1xf32, #tpu.memory_space<vmem>>, vector<1x1xf32>
      tpu.vector_store %arg9[%c0_23, %c0_24], %47 {strides = array<i32>} : memref<1x1xf32, #tpu.memory_space<vmem>>, vector<1x1xf32>,
    } else {
    }
    %c0 = arith.constant 0 : index
    %c0_1 = arith.constant 0 : index
    %3 = vector.load %arg2[%c0, %c0_1] : memref<32x8xbf16, #tpu.memory_space<vmem>>, vector<32x8xbf16>
    %c0_2 = arith.constant 0 : index
    %c0_3 = arith.constant 0 : index
    %4 = vector.load %arg3[%c0_2, %c0_3] : memref<8x128xbf16, #tpu.memory_space<vmem>>, vector<8x128xbf16>
    %cst = arith.constant dense<0.000000e+00> : vector<32x128xf32>
    %5 = tpu.matmul %3, %4, %cst {dimension_numbers = #tpu.dot_dimension_numbers<[1], [0], [0], [1], [0, 0, 1, 1], [], []>} : vector<32x8xbf16>, vector<8x128xbf16>, vector<32x128xf32> -> vector<32x128xf32>
    %c0_4 = arith.constant 0 : index
    %c0_5 = arith.constant 0 : index
    %6 = vector.load %arg5[%c0_4, %c0_5] : memref<32x1xf32, #tpu.memory_space<vmem>>, vector<32x1xf32>
    %7 = vector.broadcast %6 : vector<32x1xf32> to vector<32x128xf32>
    %8 = arith.addf %5, %7 : vector<32x128xf32>
    %9 = arith.negf %8 : vector<32x128xf32>
    %10 = math.exp %9 : vector<32x128xf32>
    %cst_6 = arith.constant 1.000000e+00 : f32
    %11 = vector.broadcast %cst_6 : f32 to vector<32x128xf32>
    %12 = arith.addf %11, %10 : vector<32x128xf32>
    %13 = arith.divf %11, %12 : vector<32x128xf32>
    %14 = arith.mulf %8, %13 : vector<32x128xf32>
    %c0_7 = arith.constant 0 : index
    %c0_8 = arith.constant 0 : index
    %15 = vector.load %arg6[%c0_7, %c0_8] : memref<32x1xf32, #tpu.memory_space<vmem>>, vector<32x1xf32>
    %16 = vector.broadcast %15 : vector<32x1xf32> to vector<32x128xf32>
    %17 = arith.mulf %16, %14 : vector<32x128xf32>
    %cst_9 = arith.constant dense<0.000000e+00> : vector<128xf32>
    %18 = vector.multi_reduction <add>, %17, %cst_9 [0] : vector<32x128xf32> to vector<128xf32>
    %19 = vector.shape_cast %18 : vector<128xf32> to vector<1x128xf32>
    %c0_10 = arith.constant 0 : index
    %c0_11 = arith.constant 0 : index
    %20 = vector.load %arg7[%c0_10, %c0_11] : memref<1x1xf32, #tpu.memory_space<vmem>>, vector<1x1xf32>
    %21 = vector.broadcast %20 : vector<1x1xf32> to vector<1x128xf32>
    %22 = arith.addf %19, %21 : vector<1x128xf32>
    %c1_i32 = arith.constant 1 : i32
    %23 = arith.muli %arg0, %c1_i32 : i32
    %24 = arith.addi %23, %arg1 : i32
    %c128_i32 = arith.constant 128 : i32
    %25 = arith.muli %24, %c128_i32 : i32
    %26 = tpu.iota {dimensions = array<i32: 1>} : vector<1x128xi32>
    %27 = vector.broadcast %25 : i32 to vector<1x128xi32>
    %28 = arith.addi %27, %26 : vector<1x128xi32>
    %c256_i32 = arith.constant 256 : i32
    %29 = vector.broadcast %c256_i32 : i32 to vector<1x128xi32>
    %30 = arith.cmpi slt, %28, %29 : vector<1x128xi32>
    %c0_12 = arith.constant 0 : index
    %c0_13 = arith.constant 0 : index
    %31 = vector.load %arg4[%c0_12, %c0_13] : memref<1x128xf32, #tpu.memory_space<vmem>>, vector<1x128xf32>
    %32 = arith.subf %31, %22 : vector<1x128xf32>
    %cst_14 = arith.constant 0.000000e+00 : f32
    %33 = vector.broadcast %cst_14 : f32 to vector<1x128xf32>
    %34 = arith.select %30, %32, %33 : vector<1x128xi1>, vector<1x128xf32>
    %c0_15 = arith.constant 0 : index
    %c0_16 = arith.constant 0 : index
    %35 = vector.load %arg9[%c0_15, %c0_16] : memref<1x1xf32, #tpu.memory_space<vmem>>, vector<1x1xf32>
    %36 = arith.mulf %34, %34 : vector<1x128xf32>
    %37 = vector.shape_cast %36 : vector<1x128xf32> to vector<1x1x128xf32>
    %cst_17 = arith.constant dense<0.000000e+00> : vector<1xf32>
    %38 = vector.multi_reduction <add>, %37, %cst_17 [1, 2] : vector<1x1x128xf32> to vector<1xf32>
    %39 = vector.shape_cast %38 : vector<1xf32> to vector<1x1x1xf32>
    %40 = vector.extract %39[0, 0, 0] : f32 from vector<1x1x1xf32>
    %41 = vector.broadcast %40 : f32 to vector<1x1xf32>
    %42 = arith.addf %35, %41 : vector<1x1xf32>
    %c0_18 = arith.constant 0 : index
    %c0_19 = arith.constant 0 : index
    %43 = vector.load %arg9[%c0_18, %c0_19] : memref<1x1xf32, #tpu.memory_space<vmem>>, vector<1x1xf32>
    tpu.vector_store %arg9[%c0_18, %c0_19], %42 {strides = array<i32>} : memref<1x1xf32, #tpu.memory_space<vmem>>, vector<1x1xf32>,
    %c0_i32_20 = arith.constant 0 : i32
    %44 = arith.cmpi eq, %arg1, %c0_i32_20 : i32
    %45 = arith.extui %44 : i1 to i32
    %c0_i32_21 = arith.constant 0 : i32
    %46 = arith.cmpi ne, %45, %c0_i32_21 : i32
    scf.if %46 {
      %c0_22 = arith.constant 0 : index
      %c0_23 = arith.constant 0 : index
      %47 = vector.load %arg9[%c0_22, %c0_23] : memref<1x1xf32, #tpu.memory_space<vmem>>, vector<1x1xf32>
      %48 = vector.shape_cast %47 : vector<1x1xf32> to vector<1x1xf32>
      %49 = vector.broadcast %48 : vector<1x1xf32> to vector<1x128xf32>
      %c0_24 = arith.constant 0 : index
      %c0_25 = arith.constant 0 : index
      %50 = vector.load %arg8[%c0_24, %c0_25] : memref<1x128xf32, #tpu.memory_space<vmem>>, vector<1x128xf32>
      tpu.vector_store %arg8[%c0_24, %c0_25], %49 {strides = array<i32>} : memref<1x128xf32, #tpu.memory_space<vmem>>, vector<1x128xf32>,
    } else {
    }
    return
  }
  func.func @transform_0(%arg0: i32, %arg1: i32) -> (i32, i32) {
    %c0_i32 = arith.constant 0 : i32
    %c0_i32_0 = arith.constant 0 : i32
    %c0_i32_1 = arith.constant 0 : i32
    return %c0_i32, %c0_i32_0 : i32, i32
  }
  func.func @transform_1(%arg0: i32, %arg1: i32) -> (i32, i32) {
    %c1_i32 = arith.constant 1 : i32
    %0 = arith.muli %arg0, %c1_i32 : i32
    %1 = arith.addi %0, %arg1 : i32
    %c0_i32 = arith.constant 0 : i32
    %c0_i32_0 = arith.constant 0 : i32
    return %c0_i32, %1 : i32, i32
  }
  func.func @transform_2(%arg0: i32, %arg1: i32) -> (i32, i32) {
    %c1_i32 = arith.constant 1 : i32
    %0 = arith.muli %arg0, %c1_i32 : i32
    %1 = arith.addi %0, %arg1 : i32
    %c0_i32 = arith.constant 0 : i32
    %c0_i32_0 = arith.constant 0 : i32
    return %c0_i32, %1 : i32, i32
  }
  func.func @transform_3(%arg0: i32, %arg1: i32) -> (i32, i32) {
    %c0_i32 = arith.constant 0 : i32
    %c0_i32_0 = arith.constant 0 : i32
    %c0_i32_1 = arith.constant 0 : i32
    return %c0_i32, %c0_i32_0 : i32, i32
  }
  func.func @transform_4(%arg0: i32, %arg1: i32) -> (i32, i32) {
    %c0_i32 = arith.constant 0 : i32
    %c0_i32_0 = arith.constant 0 : i32
    %c0_i32_1 = arith.constant 0 : i32
    return %c0_i32, %c0_i32_0 : i32, i32
  }
  func.func @transform_5(%arg0: i32, %arg1: i32) -> (i32, i32) {
    %c0_i32 = arith.constant 0 : i32
    %c0_i32_0 = arith.constant 0 : i32
    %c0_i32_1 = arith.constant 0 : i32
    return %c0_i32, %c0_i32_0 : i32, i32
  }
  func.func @transform_6(%arg0: i32, %arg1: i32) -> (i32, i32) {
    %c0_i32 = arith.constant 0 : i32
    %c0_i32_0 = arith.constant 0 : i32
    return %c0_i32, %arg0 : i32, i32
  }
}

</mosaic_0001>

<bundles_post_ra>
// kernel: depth_regularizer_forward.3
= control target key start
LH: loop header
LB: loop body
LE: loop exit
PB: predicated region body
PF: predicated region fallthrough
CT: control target
= control target key end

     0   :  { %s713_s23 = smov 0   ;;  %s715_s24 = smov 0   ;;  %s791_s0 = inlined_call_operand.vmem [shape: bf16[32,8], index: 0, kind: input, shape index: {}]   ;;  %s792_s1 = inlined_call_operand.vmem [shape: bf16[8,256], index: 1, kind: input, shape index: {}]   ;;  %s793_s2 = inlined_call_operand.vmem [shape: f32[1,256], index: 2, kind: input, shape index: {}]   ;;  %s794_s3 = inlined_call_operand.vmem [shape: f32[32,1], index: 3, kind: input, shape index: {}]   ;;  %s795_s4 = inlined_call_operand.vmem [shape: f32[32,1], index: 4, kind: input, shape index: {}]   ;;  %s796_s5 = inlined_call_operand.<no memory space> [shape: f32[1,1], index: 5, kind: input, shape index: {}]   ;;  %s797_s6 = inlined_call_operand.vmem [shape: f32[1,256], index: 6, kind: output, shape index: {}]  }
   0x1   :  { %v11_v0 = vstv %s796_s5  ;;  %s717_s25 = smov 0  }
   0x2   :  { %12 = vst [vmem:[#allocation3] sm:$0x1] %v11_v0 }
   0x3 LB: > { %s30_s5 = sadd.s32 1, %s667_s24  ;;  %p578_p0 = scmp.ge.s32.totalorder %s671_s25, 1  ;;  %s671_s25 = sphi %s717_s25, %s18_s25   ;;  %s667_s24 = sphi %s715_s24, %s799_s24   ;;  %s663_s23 = sphi %s713_s23, %s798_s23  }
   0x4   : > { %p32_p1 = scmp.ge.s32.totalorder %s30_s5, 2  ;;  %p241_p2 = scmp.lt.s32.totalorder %s671_s25, 3 }
   0x6   : > { %s801_s5 = smov (%p32_p1, %s30_s5), 0  ;;  %p242_p3 = pnand %p578_p0, %p241_p2 }
   0x7   : > { %p274_p4 = scmp.lt.s32.totalorder (!%p242_p3), %s663_s23, 1  ;;  %v631_v1 = vld [vmem:[%s791_s0] sm:$0xff] (!%p242_p3)   ;;  %vm333_vm0 = vcmask (!%p242_p3), 64512   ;;  %v673_v3 = vmov (!%p242_p3), 0   ;;  %v301_v4 = vld [vmem:[%s794_s3 + $0x10] sm:$0xff] (!%p242_p3)  ;;  %vm340_vm1 = vcmask (!%p242_p3), 1043456   ;;  %v464_v57 = vlaneseq (!%p242_p3) }
   0x8   : > { %245 = sbr.rel (%p242_p3) target bundleno = 643 (0x283), region = 44  ;;  %v299_v2 = vld [vmem:[%s794_s3] sm:$0xff] (!%p242_p3)  ;;  %596 = vmatprep.mubr.msk.bf16.mxu0 (!%p242_p3), %vm333_vm0, %v631_v1  ;;  %629 = vset.pattern.permute.xlu0 (!%p242_p3), %v673_v3  ;;  %v300_v5 = vld [vmem:[%s794_s3 + $0x8] sm:$0xff] (!%p242_p3)  ;;  %v302_v7 = vld [vmem:[%s794_s3 + $0x18] sm:$0xff] (!%p242_p3)  ;;  %s588_s7 = sshll.u32 (!%p242_p3), %s663_s23, 7  ;;  %vm481_vm3 = vcmask (!%p242_p3), 1040384  }
   0x9   : > { %305 = vperm.xlu0 (!%p242_p3), %629, %v299_v2   ;;  %630 = vset.pattern.permute.xlu1 (!%p242_p3), %v673_v3  ;;  %v632_v9 = vld [vmem:[%s791_s0 + $0x8] sm:$0xff] (!%p242_p3)   ;;  %v421_v10 = vld [vmem:[%s795_s4] sm:$0xff] (!%p242_p3)  ;;  %v423_v12 = vld [vmem:[%s795_s4 + $0x10] sm:$0xff] (!%p242_p3)  ;;  %v465_v60 = vshrl.u32 (!%p242_p3), %v464_v57, 7  ;;  %v472_v63 = vand.u32 (!%p242_p3), 127, %v464_v57  ;;  %v473_v2 = vstv (!%p242_p3), %s588_s7  ;;  %vm292_vm4 = vcmask (!%p242_p3), 0  }
   0xa   : > { %315 = vperm.xlu1 (!%p242_p3), %630, %v301_v4   ;;  %v422_v11 = vld [vmem:[%s795_s4 + $0x8] sm:$0xff] (!%p242_p3)  ;;  %v424_v13 = vld [vmem:[%s795_s4 + $0x18] sm:$0xff] (!%p242_p3)  ;;  %v458_v14 = vld [vmem:[#allocation3] sm:$0x1] (!%p242_p3) }
   0xb   : > { %v466_v0 = vsub.s32 (!%p242_p3), 0, %v465_v60 }
   0xd   : > { %310 = vperm.xlu0 (!%p242_p3), %629, %v300_v5   ;;  %v474_v5 = vadd.s32 (!%p242_p3), %v473_v2, %v472_v63 }
   0xe   : > { %320 = vperm.xlu1 (!%p242_p3), %630, %v302_v7  }
   0xf   : > { %s738_s28 = scalar_select %p274_p4, %s663_s23, 1  ;;  %vm475_vm2 = vcmp.lt.s32.totalorder %v474_v5, 256 }
  0x11   : > { %s579_s9 = sshll.u32 %s738_s28, 2  ;;  %427 = vperm.xlu0 %629, %v421_v10   ;;  %s282_s10 = scalar_lea.vmem %s793_s2, %s738_s28 }
  0x12   : > { %s277_s12 = scalar_lea.vmem %s792_s1, %s579_s9  ;;  %432 = vperm.xlu1 %630, %v422_v11   ;;  %s286_s13 = scalar_lea.vmem %s797_s6, %s738_s28 }
  0x13   : > { %v298_v6 = vld [vmem:[%s277_s12] sm:$0xf] }
  0x14   : > { %600 = vmatprep.subr.msk.bf16.mxu0 %vm340_vm1, %v298_v6  ;;  %v342_v8 = vsel %vm340_vm1, %v298_v6, 0 }
  0x15   : > { %595 = vmatpush3.bf16.msra.mxu0 %v342_v8  ;;  %437 = vperm.xlu0 %629, %v423_v12   ;;  %v476_v8 = vld [vmem:[%s282_s10] sm:$0x1] }
  0x16   : > { %442 = vperm.xlu1 %630, %v424_v13  }
  0x18   : > { %597 = vmatmul.mubr.msk.bf16.vlgmr.msra.gmra.mrb[0].mxu0 %vm333_vm0, %v632_v9 }
  0x19   : > { %461 = vperm.xlu0 %629, %v458_v14   ;;  %v674_v14 = vmov 0.0  }
  0x1a   : > { %293 = vst.msk [vmem:[#allocation2] sm:$0x1] %vm292_vm4, %v674_v14 }
  0x88   : > { %v306_v16 = vpop.permute.xlu0 %305 }
  0x89   : > { %v316_v15 = vpop.permute.xlu1 %315 }
  0x8c   : > { %v311_v23 = vpop.permute.xlu0 %310 }
  0x8d   : > { %v321_v20 = vpop.permute.xlu1 %320 }
  0x90   : > { %v428_v41 = vpop.permute.xlu0 %427 }
  0x91   : > { %v433_v45 = vpop.permute.xlu1 %432 }
  0x94   : > { %v438_v51 = vpop.permute.xlu0 %437 }
  0x95   : > { %v443_v54 = vpop.permute.xlu1 %442 }
  0x98   : > { %v462_v3 = vpop.permute.xlu0 %461 }
  0x99   : > { %v467_v6 = vrot.slane %v462_v3, %v466_v0 }
  0xeb   : > { %v598_v17 = vpop.f32.mrb[0].mxu0 }
  0xec   : > { %v387_v18 = vadd.f32 %v598_v17, %v316_v15  ;;  %v378_v19 = vpop.f32.mrb[1].mxu0 }
  0xed   : > { %v379_v21 = vadd.f32 %v378_v19, %v306_v16  ;;  %v599_v22 = vpop.f32.mrb[2].mxu0 }
  0xee   : > { %v586_v24 = vmul.f32 -1.442695, %v387_v18  ;;  %v390_v25 = vadd.f32 %v599_v22, %v321_v20  ;;  %v381_v26 = vpop.f32.mrb[3].mxu0  ;;  %v479_v22 = vld [vmem:[#allocation2] sm:$0x1] }
  0xef   : > { %v584_v27 = vmul.f32 -1.442695, %v379_v21  ;;  %v382_v28 = vadd.f32 %v381_v26, %v311_v23 }
  0xf0   : > { %633 = vpow2.f32 %v586_v24  ;;  %v587_v29 = vmul.f32 -1.442695, %v390_v25 }
  0xf1   : > { %635 = vpow2.f32 %v584_v27  ;;  %v585_v30 = vmul.f32 -1.442695, %v382_v28 }
  0xf2   : > { %637 = vpow2.f32 %v587_v29 }
  0xf3   : > { %639 = vpow2.f32 %v585_v30 }
  0xfa   : > { %v634_v31 = vpop.eup %633 }
  0xfb   : > { %v636_v32 = vpop.eup %635  ;;  %v407_v33 = vadd.f32 1.0, %v634_v31 }
  0xfc   : > { %v638_v34 = vpop.eup %637  ;;  %v405_v35 = vadd.f32 1.0, %v636_v32 }
  0xfd   : > { %v640_v36 = vpop.eup %639  ;;  %641 = vrcp.f32 %v407_v33  ;;  %v408_v37 = vadd.f32 1.0, %v638_v34 }
  0xfe   : > { %643 = vrcp.f32 %v405_v35  ;;  %v406_v38 = vadd.f32 1.0, %v640_v36 }
  0xff   : > { %645 = vrcp.f32 %v408_v37 }
 0x100   : > { %647 = vrcp.f32 %v406_v38 }
 0x107   : > { %v642_v39 = vpop.eup %641 }
 0x108   : > { %v644_v40 = vpop.eup %643  ;;  %v419_v46 = vmul.f32 %v642_v39, %v387_v18 }
 0x109   : > { %v646_v42 = vpop.eup %645  ;;  %v417_v43 = vmul.f32 %v644_v40, %v379_v21 }
 0x10a   : > { %v648_v44 = vpop.eup %647  ;;  %v420_v49 = vmul.f32 %v646_v42, %v390_v25  ;;  %v447_v52 = vmul.f32 %v438_v51, %v419_v46 }
 0x10b   : > { %v418_v47 = vmul.f32 %v648_v44, %v382_v28  ;;  %v445_v48 = vmul.f32 %v428_v41, %v417_v43 }
 0x10c   : > { %v448_v55 = vmul.f32 %v443_v54, %v420_v49 }
 0x10d   : > { %v446_v50 = vmul.f32 %v433_v45, %v418_v47 }
 0x10f   : > { %v449_v53 = vadd.f32 %v446_v50, %v445_v48 }
 0x111   : > { %v450_v56 = vadd.f32 %v449_v53, %v447_v52 }
 0x113   : > { %v451_v58 = vadd.f32 %v450_v56, %v448_v55 }
 0x115   : > { %v452_v59 = vrot.slane %v451_v58, 4 }
 0x117   : > { %v453_v61 = vadd.f32 %v452_v59, %v451_v58 }
 0x119   : > { %v454_v62 = vrot.slane %v453_v61, 2 }
 0x11b   : > { %v455_v1 = vadd.f32 %v454_v62, %v453_v61 }
 0x11d   : > { %v456_v4 = vrot.slane %v455_v1, 1 }
 0x11f   : > { %v457_v7 = vadd.f32 %v456_v4, %v455_v1 }
 0x121   : > { %v468_v9 = vadd.f32 %v467_v6, %v457_v7 }
 0x123   : > { %v477_v10 = vsub.f32 %v476_v8, %v468_v9 }
 0x125   : > { %v478_v11 = vsel %vm475_vm2, %v477_v10, 0.0 }
 0x126   : > { %v480_v12 = vmul.f32 %v478_v11, %v478_v11 }
 0x128   : > { %v482_v13 = vsel %vm481_vm3, %v480_v12, 0.0 }
 0x129   : > { %483 = vadd.xlane.f32.xlu1 %v482_v13 }
 0x1b6   : > { %v484_v15 = vpop.xlane.xlu1 %483 }
 0x1b7   : > { %v485_v16 = vrot.slane %v484_v15, 4 }
 0x1b9   : > { %v486_v17 = vadd.f32 %v485_v16, %v484_v15 }
 0x1bb   : > { %v487_v18 = vrot.slane %v486_v17, 2 }
 0x1bd   : > { %v488_v19 = vadd.f32 %v487_v18, %v486_v17 }
 0x1bf   : > { %v489_v20 = vrot.slane %v488_v19, 1 }
 0x1c1   : > { %v490_v21 = vadd.f32 %v489_v20, %v488_v19 }
 0x1c3   : > { %601 = vpush %v490_v21 }
 0x1f4   : > { %s602_s23 = spop %601 }
 0x1f5   : > { %v492_v23 = vstv %s602_s23 }
 0x1f6   : > { %v493_v24 = vadd.f32 %v492_v23, %v479_v22 }
 0x1f8   : > { %495 = vst.msk [vmem:[#allocation2] sm:$0x1] %vm292_vm4, %v493_v24 }
 0x1ff   : > { %v499_v25 = vld [vmem:[#allocation2] sm:$0x1] }
 0x200   : > { %502 = vperm.xlu0 %629, %v499_v25  }
 0x27f   : > { %v503_v26 = vpop.permute.xlu0 %502 }
 0x280   : > { %v508_v27 = vrot.slane %v503_v26, %v466_v0 }
 0x282   : > { %509 = vst [vmem:[%s286_s13] sm:$0x1] %v508_v27 }
 0x283 PF: > { %s18_s25 = sadd.s32 1, %s671_s25   ;;  %s798_s23 = smov %s667_s24 }
 0x284   : > { %p15_p5 = scmp.ge.s32.totalorder %s18_s25, 4   ;;  %s799_s24 = smov %s801_s5 }
 0x286   :  { %17 = sbr.rel (!%p15_p5) target bundleno = 3 (0x3), region = 85 }

// kernel: depth_regularizer_forward.2
= control target key start
LH: loop header
LB: loop body
LE: loop exit
PB: predicated region body
PF: predicated region fallthrough
CT: control target
= control target key end

     0   :  { %v4583_v0 = vmov 0   ;;  %vm227_vm0 = vcmask 1041408   ;;  %vm202_vm1 = vcmask 31744   ;;  %vm1445_vm2 = vcmask 523264   ;;  %s5766_s2 = inlined_call_operand.vmem [shape: f32[2,128,1], index: 2, kind: input, shape index: {}]   ;;  %s5767_s0 = inlined_call_operand.vmem [shape: f32[2,4,4], index: 0, kind: input, shape index: {}]   ;;  %s5768_s1 = inlined_call_operand.vmem [shape: bf16[2,128,4], index: 1, kind: input, shape index: {}]   ;;  %s5769_s4 = inlined_call_operand.vmem [shape: f32[2,128,1], index: 4, kind: input, shape index: {}]   ;;  %s5770_s6 = inlined_call_operand.vmem [shape: f32[2,128,1], index: 6, kind: input, shape index: {}]   ;;  %s5771_s8 = inlined_call_operand.vmem [shape: f32[2,64,1], index: 8, kind: input, shape index: {}]   ;;  %s5772_s10 = inlined_call_operand.vmem [shape: f32[2,32,1], index: 10, kind: input, shape index: {}]   ;;  %s5773_s12 = inlined_call_operand.vmem [shape: f32[2,8,1], index: 12, kind: input, shape index: {}]   ;;  %s5774_s3 = inlined_call_operand.vmem [shape: bf16[2,128,128], index: 3, kind: input, shape index: {}]   ;;  %s5775_s5 = inlined_call_operand.vmem [shape: bf16[2,128,128], index: 5, kind: input, shape index: {}]   ;;  %s5776_s7 = inlined_call_operand.vmem [shape: bf16[2,64,128], index: 7, kind: input, shape index: {}]   ;;  %s5777_s9 = inlined_call_operand.vmem [shape: bf16[2,32,64], index: 9, kind: input, shape index: {}]   ;;  %s5778_s11 = inlined_call_operand.vmem [shape: bf16[2,8,32], index: 11, kind: input, shape index: {}]   ;;  %s5779_s13 = inlined_call_operand.vmem [shape: bf16[32,8], index: 13, kind: input, shape index: {}]   ;;  %s5780_s14 = inlined_call_operand.vmem [shape: f32[32,8], index: 14, kind: output, shape index: {}]  }
   0x1   :  { %4038 = vset.pattern.permute.xlu1 %v4583_v0  ;;  %4037 = vset.pattern.permute.xlu0 %v4583_v0  ;;  %v68_v1 = vld [vmem:[%s5766_s2 + $0x10] sm:$0xff]  ;;  %v66_v2 = vld [vmem:[%s5766_s2] sm:$0xff]  ;;  %v69_v5 = vld [vmem:[%s5766_s2 + $0x18] sm:$0xff]  ;;  %vm4585_vm3 = vmmov 0   ;;  %vm1538_vm4 = vcmask 261120   ;;  %vm1597_vm5 = vcmask 64512  }
   0x2   :  { %v48_v3 = vld [vmem:[%s5767_s0] sm:$0xf]  ;;  %94 = vperm.xlu1 %4038, %v68_v1   ;;  %84 = vperm.xlu0 %4037, %v66_v2   ;;  %v67_v6 = vld [vmem:[%s5766_s2 + $0x8] sm:$0xff]  ;;  %v4041_v12 = vld [vmem:[%s5768_s1 + $0x10] sm:$0xff]   ;;  %vm1604_vm6 = vcmask 1043456   ;;  %vm3293_vm7 = vcmask 64544  }
   0x3   :  { %v49_v4 = vpack.c.bf16 %v48_v3, %v48_v3  ;;  %v4039_v7 = vld [vmem:[%s5768_s1] sm:$0xff]   ;;  %v4040_v9 = vld [vmem:[%s5768_s1 + $0x8] sm:$0xff]   ;;  %v73_v13 = vld [vmem:[%s5766_s2 + $0x38] sm:$0xff] }
   0x4   :  { %3767 = vmatprep.mubr.msk.bf16.mxu0 %vm202_vm1, %v4039_v7  ;;  %v71_v10 = vld [vmem:[%s5766_s2 + $0x28] sm:$0xff]  ;;  %v70_v11 = vld [vmem:[%s5766_s2 + $0x20] sm:$0xff]  ;;  %v72_v14 = vld [vmem:[%s5766_s2 + $0x30] sm:$0xff] }
   0x5   :  { %4029 = vmatprep.subr.msk.bf16.mxu0 %vm227_vm0, %v49_v4  ;;  %v229_v8 = vsel %vm227_vm0, %v49_v4, 0  ;;  %v4042_v15 = vld [vmem:[%s5768_s1 + $0x18] sm:$0xff]   ;;  %v4043_v16 = vld [vmem:[%s5768_s1 + $0x20] sm:$0xff]   ;;  %v75_v17 = vld [vmem:[%s5766_s2 + $0x48] sm:$0xff] }
   0x6   :  { %3766 = vmatpush3.bf16.msra.mxu0 %v229_v8  ;;  %99 = vperm.xlu1 %4038, %v69_v5   ;;  %v74_v18 = vld [vmem:[%s5766_s2 + $0x40] sm:$0xff]  ;;  %v77_v19 = vld [vmem:[%s5766_s2 + $0x58] sm:$0xff]  ;;  %v76_v20 = vld [vmem:[%s5766_s2 + $0x50] sm:$0xff] }
   0x7   :  { %89 = vperm.xlu0 %4037, %v67_v6   ;;  %v4044_v21 = vld [vmem:[%s5768_s1 + $0x28] sm:$0xff]   ;;  %v4045_v22 = vld [vmem:[%s5768_s1 + $0x30] sm:$0xff]   ;;  %v78_v24 = vld [vmem:[%s5766_s2 + $0x60] sm:$0xff] }
   0x8   :  { %v79_v23 = vld [vmem:[%s5766_s2 + $0x68] sm:$0xff]  ;;  %v81_v25 = vld [vmem:[%s5766_s2 + $0x78] sm:$0xff]  ;;  %v80_v26 = vld [vmem:[%s5766_s2 + $0x70] sm:$0xff] }
   0x9   :  { %3768 = vmatmul.mubr.msk.bf16.vlgmr.msra.gmra.mrb[0].mxu0 %vm202_vm1, %v4040_v9  ;;  %v4046_v27 = vld [vmem:[%s5768_s1 + $0x38] sm:$0xff]   ;;  %v465_v28 = vld [vmem:[%s5769_s4 + $0x8] sm:$0xff]  ;;  %v464_v29 = vld [vmem:[%s5769_s4] sm:$0xff] }
   0xa   :  { %3771 = vmatprep.mubr.msk.bf16.mxu0 %vm202_vm1, %v4041_v12  ;;  %109 = vperm.xlu1 %4038, %v71_v10   ;;  %v467_v30 = vld [vmem:[%s5769_s4 + $0x18] sm:$0xff]  ;;  %v466_v31 = vld [vmem:[%s5769_s4 + $0x10] sm:$0xff]  ;;  %v469_v32 = vld [vmem:[%s5769_s4 + $0x28] sm:$0xff] }
   0xb   :  { %104 = vperm.xlu0 %4037, %v70_v11   ;;  %v468_v33 = vld [vmem:[%s5769_s4 + $0x20] sm:$0xff]  ;;  %v471_v34 = vld [vmem:[%s5769_s4 + $0x38] sm:$0xff]  ;;  %v470_v35 = vld [vmem:[%s5769_s4 + $0x30] sm:$0xff] }
   0xc   :  { %v473_v36 = vld [vmem:[%s5769_s4 + $0x48] sm:$0xff]  ;;  %v472_v37 = vld [vmem:[%s5769_s4 + $0x40] sm:$0xff]  ;;  %v475_v38 = vld [vmem:[%s5769_s4 + $0x58] sm:$0xff] }
   0xd   :  { %v474_v39 = vld [vmem:[%s5769_s4 + $0x50] sm:$0xff]  ;;  %v477_v40 = vld [vmem:[%s5769_s4 + $0x68] sm:$0xff]  ;;  %v476_v41 = vld [vmem:[%s5769_s4 + $0x60] sm:$0xff] }
   0xe   :  { %119 = vperm.xlu1 %4038, %v73_v13   ;;  %v479_v42 = vld [vmem:[%s5769_s4 + $0x78] sm:$0xff]  ;;  %v478_v43 = vld [vmem:[%s5769_s4 + $0x70] sm:$0xff]  ;;  %v842_v44 = vld [vmem:[%s5770_s6 + $0x8] sm:$0xff] }
   0xf   :  { %114 = vperm.xlu0 %4037, %v72_v14   ;;  %v841_v45 = vld [vmem:[%s5770_s6] sm:$0xff]  ;;  %v844_v46 = vld [vmem:[%s5770_s6 + $0x18] sm:$0xff]  ;;  %v843_v47 = vld [vmem:[%s5770_s6 + $0x10] sm:$0xff] }
  0x10   :  { %v846_v48 = vld [vmem:[%s5770_s6 + $0x28] sm:$0xff]  ;;  %v845_v49 = vld [vmem:[%s5770_s6 + $0x20] sm:$0xff]  ;;  %v848_v50 = vld [vmem:[%s5770_s6 + $0x38] sm:$0xff] }
  0x11   :  { %3772 = vmatmul.mubr.msk.bf16.gmra.mrb[4].mxu0 %vm202_vm1, %v4042_v15  ;;  %v847_v51 = vld [vmem:[%s5770_s6 + $0x30] sm:$0xff]  ;;  %v850_v52 = vld [vmem:[%s5770_s6 + $0x48] sm:$0xff]  ;;  %v849_v53 = vld [vmem:[%s5770_s6 + $0x40] sm:$0xff] }
  0x12   :  { %3775 = vmatprep.mubr.msk.bf16.mxu0 %vm202_vm1, %v4043_v16  ;;  %129 = vperm.xlu1 %4038, %v75_v17   ;;  %v852_v54 = vld [vmem:[%s5770_s6 + $0x58] sm:$0xff]  ;;  %v851_v55 = vld [vmem:[%s5770_s6 + $0x50] sm:$0xff]  ;;  %v854_v56 = vld [vmem:[%s5770_s6 + $0x68] sm:$0xff] }
  0x13   :  { %124 = vperm.xlu0 %4037, %v74_v18   ;;  %v853_v57 = vld [vmem:[%s5770_s6 + $0x60] sm:$0xff]  ;;  %v856_v58 = vld [vmem:[%s5770_s6 + $0x78] sm:$0xff]  ;;  %v855_v59 = vld [vmem:[%s5770_s6 + $0x70] sm:$0xff] }
  0x14   :  { %v1211_v60 = vld [vmem:[%s5771_s8 + $0x8] sm:$0xff]  ;;  %v1210_v61 = vld [vmem:[%s5771_s8] sm:$0xff]  ;;  %v1213_v62 = vld [vmem:[%s5771_s8 + $0x18] sm:$0xff] }
  0x15   :  { %v1212_v63 = vld [vmem:[%s5771_s8 + $0x10] sm:$0xff]  ;;  %v1215_v0 = vld [vmem:[%s5771_s8 + $0x28] sm:$0xff]  ;;  %v1214_v1 = vld [vmem:[%s5771_s8 + $0x20] sm:$0xff] }
  0x16   :  { %139 = vperm.xlu1 %4038, %v77_v19   ;;  %v1217_v2 = vld [vmem:[%s5771_s8 + $0x38] sm:$0xff]  ;;  %v1216_v3 = vld [vmem:[%s5771_s8 + $0x30] sm:$0xff]  ;;  %v1412_v4 = vld [vmem:[%s5772_s10 + $0x8] sm:$0xff] }
  0x17   :  { %134 = vperm.xlu0 %4037, %v76_v20   ;;  %v1411_v5 = vld [vmem:[%s5772_s10] sm:$0xff]  ;;  %v1414_v6 = vld [vmem:[%s5772_s10 + $0x18] sm:$0xff]  ;;  %v1413_v7 = vld [vmem:[%s5772_s10 + $0x10] sm:$0xff] }
  0x18   :  { %v3425_v8 = vld [vmem:[%s5766_s2 + $0x88] sm:$0xff]  ;;  %v3424_v9 = vld [vmem:[%s5766_s2 + $0x80] sm:$0xff]  ;;  %v3427_v10 = vld [vmem:[%s5766_s2 + $0x98] sm:$0xff] }
  0x19   :  { %3776 = vmatmul.mubr.msk.bf16.gmra.mrb[8].mxu0 %vm202_vm1, %v4044_v21  ;;  %v3426_v11 = vld [vmem:[%s5766_s2 + $0x90] sm:$0xff]  ;;  %v3429_v12 = vld [vmem:[%s5766_s2 + $0xa8] sm:$0xff]  ;;  %v3428_v13 = vld [vmem:[%s5766_s2 + $0xa0] sm:$0xff] }
  0x1a   :  { %3779 = vmatprep.mubr.msk.bf16.mxu0 %vm202_vm1, %v4045_v22  ;;  %149 = vperm.xlu1 %4038, %v79_v23   ;;  %v3431_v14 = vld [vmem:[%s5766_s2 + $0xb8] sm:$0xff]  ;;  %v3430_v15 = vld [vmem:[%s5766_s2 + $0xb0] sm:$0xff]  ;;  %v3433_v16 = vld [vmem:[%s5766_s2 + $0xc8] sm:$0xff] }
  0x1b   :  { %144 = vperm.xlu0 %4037, %v78_v24   ;;  %v3432_v17 = vld [vmem:[%s5766_s2 + $0xc0] sm:$0xff]  ;;  %v3435_v18 = vld [vmem:[%s5766_s2 + $0xd8] sm:$0xff]  ;;  %v3434_v19 = vld [vmem:[%s5766_s2 + $0xd0] sm:$0xff] }
  0x1c   :  { %v3436_v20 = vld [vmem:[%s5766_s2 + $0xe0] sm:$0xff]  ;;  %v3438_v22 = vld [vmem:[%s5766_s2 + $0xf0] sm:$0xff]  ;;  %v3437_v23 = vld [vmem:[%s5766_s2 + $0xe8] sm:$0xff] }
  0x1d   :  { %v1532_v21 = vld [vmem:[%s5773_s12] sm:$0xff] }
  0x1e   :  { %159 = vperm.xlu1 %4038, %v81_v25   ;;  %v3488_v24 = vld [vmem:[%s5769_s4 + $0x80] sm:$0xff]  ;;  %v3439_v25 = vld [vmem:[%s5766_s2 + $0xf8] sm:$0xff] }
  0x1f   :  { %154 = vperm.xlu0 %4037, %v80_v26   ;;  %v3490_v26 = vld [vmem:[%s5769_s4 + $0x90] sm:$0xff] }
  0x21   :  { %3780 = vmatmul.mubr.msk.bf16.gmra.mrb[12].mxu0 %vm202_vm1, %v4046_v27  ;;  %v3489_v27 = vld [vmem:[%s5769_s4 + $0x88] sm:$0xff] }
  0x22   :  { %487 = vperm.xlu1 %4038, %v465_v28   ;;  %v3492_v28 = vld [vmem:[%s5769_s4 + $0xa0] sm:$0xff] }
  0x23   :  { %482 = vperm.xlu0 %4037, %v464_v29   ;;  %v3491_v29 = vld [vmem:[%s5769_s4 + $0x98] sm:$0xff] }
  0x26   :  { %497 = vperm.xlu1 %4038, %v467_v30   ;;  %v4047_v30 = vld [vmem:[%s5774_s3] sm:$0xff]  }
  0x27   :  { %492 = vperm.xlu0 %4037, %v466_v31   ;;  %v3494_v31 = vld [vmem:[%s5769_s4 + $0xb0] sm:$0xff]  ;;  %3799 = vmatprep.mubr.bf16.mxu1 %v4047_v30 }
  0x28   :  { %v3598_v30 = vld [vmem:[%s5771_s8 + $0x70] sm:$0xff] }
  0x2a   :  { %507 = vperm.xlu1 %4038, %v469_v32   ;;  %v3493_v32 = vld [vmem:[%s5769_s4 + $0xa8] sm:$0xff] }
  0x2b   :  { %502 = vperm.xlu0 %4037, %v468_v33   ;;  %v3496_v33 = vld [vmem:[%s5769_s4 + $0xc0] sm:$0xff] }
  0x2e   :  { %517 = vperm.xlu1 %4038, %v471_v34   ;;  %v3495_v34 = vld [vmem:[%s5769_s4 + $0xb8] sm:$0xff] }
  0x2f   :  { %512 = vperm.xlu0 %4037, %v470_v35   ;;  %v3498_v35 = vld [vmem:[%s5769_s4 + $0xd0] sm:$0xff] }
  0x32   :  { %527 = vperm.xlu1 %4038, %v473_v36   ;;  %v3497_v36 = vld [vmem:[%s5769_s4 + $0xc8] sm:$0xff] }
  0x33   :  { %522 = vperm.xlu0 %4037, %v472_v37  }
  0x36   :  { %537 = vperm.xlu1 %4038, %v475_v38   ;;  %v3500_v38 = vld [vmem:[%s5769_s4 + $0xe0] sm:$0xff] }
  0x37   :  { %532 = vperm.xlu0 %4037, %v474_v39   ;;  %v3499_v39 = vld [vmem:[%s5769_s4 + $0xd8] sm:$0xff] }
  0x3a   :  { %547 = vperm.xlu1 %4038, %v477_v40  }
  0x3b   :  { %542 = vperm.xlu0 %4037, %v476_v41   ;;  %v3502_v41 = vld [vmem:[%s5769_s4 + $0xf0] sm:$0xff] }
  0x3e   :  { %557 = vperm.xlu1 %4038, %v479_v42   ;;  %v3501_v42 = vld [vmem:[%s5769_s4 + $0xe8] sm:$0xff] }
  0x3f   :  { %552 = vperm.xlu0 %4037, %v478_v43  }
  0x42   :  { %864 = vperm.xlu1 %4038, %v842_v44  }
  0x43   :  { %859 = vperm.xlu0 %4037, %v841_v45   ;;  %v3544_v45 = vld [vmem:[%s5770_s6 + $0x80] sm:$0xff] }
  0x46   :  { %874 = vperm.xlu1 %4038, %v844_v46   ;;  %v3503_v46 = vld [vmem:[%s5769_s4 + $0xf8] sm:$0xff] }
  0x47   :  { %869 = vperm.xlu0 %4037, %v843_v47  }
  0x4a   :  { %884 = vperm.xlu1 %4038, %v846_v48   ;;  %v3546_v48 = vld [vmem:[%s5770_s6 + $0x90] sm:$0xff] }
  0x4b   :  { %879 = vperm.xlu0 %4037, %v845_v49   ;;  %v3545_v49 = vld [vmem:[%s5770_s6 + $0x88] sm:$0xff] }
  0x4e   :  { %894 = vperm.xlu1 %4038, %v848_v50  }
  0x4f   :  { %889 = vperm.xlu0 %4037, %v847_v51   ;;  %v3548_v51 = vld [vmem:[%s5770_s6 + $0xa0] sm:$0xff] }
  0x52   :  { %904 = vperm.xlu1 %4038, %v850_v52   ;;  %v3547_v52 = vld [vmem:[%s5770_s6 + $0x98] sm:$0xff] }
  0x53   :  { %899 = vperm.xlu0 %4037, %v849_v53  }
  0x56   :  { %914 = vperm.xlu1 %4038, %v852_v54  }
  0x57   :  { %909 = vperm.xlu0 %4037, %v851_v55   ;;  %v3550_v55 = vld [vmem:[%s5770_s6 + $0xb0] sm:$0xff] }
  0x5a   :  { %924 = vperm.xlu1 %4038, %v854_v56   ;;  %v3549_v56 = vld [vmem:[%s5770_s6 + $0xa8] sm:$0xff] }
  0x5b   :  { %919 = vperm.xlu0 %4037, %v853_v57  }
  0x5e   :  { %934 = vperm.xlu1 %4038, %v856_v58   ;;  %v3552_v58 = vld [vmem:[%s5770_s6 + $0xc0] sm:$0xff] }
  0x5f   :  { %929 = vperm.xlu0 %4037, %v855_v59   ;;  %v3551_v59 = vld [vmem:[%s5770_s6 + $0xb8] sm:$0xff] }
  0x62   :  { %1225 = vperm.xlu1 %4038, %v1211_v60  }
  0x63   :  { %1220 = vperm.xlu0 %4037, %v1210_v61   ;;  %v3554_v61 = vld [vmem:[%s5770_s6 + $0xd0] sm:$0xff] }
  0x66   :  { %1235 = vperm.xlu1 %4038, %v1213_v62   ;;  %v3553_v62 = vld [vmem:[%s5770_s6 + $0xc8] sm:$0xff] }
  0x67   :  { %1230 = vperm.xlu0 %4037, %v1212_v63  }
  0x6a   :  { %1245 = vperm.xlu1 %4038, %v1215_v0  }
  0x6b   :  { %1240 = vperm.xlu0 %4037, %v1214_v1   ;;  %v3556_v1 = vld [vmem:[%s5770_s6 + $0xe0] sm:$0xff] }
  0x6e   :  { %1255 = vperm.xlu1 %4038, %v1217_v2   ;;  %v3555_v2 = vld [vmem:[%s5770_s6 + $0xd8] sm:$0xff] }
  0x6f   :  { %1250 = vperm.xlu0 %4037, %v1216_v3  }
  0x72   :  { %1422 = vperm.xlu1 %4038, %v1412_v4   ;;  %v3558_v4 = vld [vmem:[%s5770_s6 + $0xf0] sm:$0xff] }
  0x73   :  { %1417 = vperm.xlu0 %4037, %v1411_v5   ;;  %v3557_v5 = vld [vmem:[%s5770_s6 + $0xe8] sm:$0xff] }
  0x76   :  { %1432 = vperm.xlu1 %4038, %v1414_v6  }
  0x77   :  { %1427 = vperm.xlu0 %4037, %v1413_v7   ;;  %v3592_v7 = vld [vmem:[%s5771_s8 + $0x40] sm:$0xff] }
  0x7a   :  { %1705 = vperm.xlu1 %4038, %v3425_v8   ;;  %v3559_v8 = vld [vmem:[%s5770_s6 + $0xf8] sm:$0xff]  ;;  %s4586_s6 = smov 4  }
  0x7b   :  { %1700 = vperm.xlu0 %4037, %v3424_v9  }
  0x7e   :  { %1715 = vperm.xlu1 %4038, %v3427_v10  }
  0x7f   :  { %1710 = vperm.xlu0 %4037, %v3426_v11  }
  0x81   :  { %v4966_v37 = vpop.permute.xlu1 %94  ;;  %v85_v40 = vpop.permute.xlu0 %84 }
  0x82   :  { %1725 = vperm.xlu1 %4038, %v3429_v12   ;;  %v3594_v12 = vld [vmem:[%s5771_s8 + $0x50] sm:$0xff] }
  0x83   :  { %1720 = vperm.xlu0 %4037, %v3428_v13   ;;  %v3593_v13 = vld [vmem:[%s5771_s8 + $0x48] sm:$0xff] }
  0x85   :  { %v4980_v43 = vpop.permute.xlu1 %99 }
  0x86   :  { %1735 = vperm.xlu1 %4038, %v3431_v14   ;;  %v4982_v44 = vpop.permute.xlu0 %89 }
  0x87   :  { %1730 = vperm.xlu0 %4037, %v3430_v15  }
  0x89   :  { %v4990_v47 = vpop.permute.xlu1 %109 }
  0x8a   :  { %1745 = vperm.xlu1 %4038, %v3433_v16   ;;  %v4998_v50 = vpop.permute.xlu0 %104 }
  0x8b   :  { %1740 = vperm.xlu0 %4037, %v3432_v17  }
  0x8d   :  { %v5006_v53 = vpop.permute.xlu1 %119 }
  0x8e   :  { %1755 = vperm.xlu1 %4038, %v3435_v18   ;;  %v5008_v54 = vpop.permute.xlu0 %114 }
  0x8f   :  { %1750 = vperm.xlu0 %4037, %v3434_v19  }
  0x91   :  { %v5016_v57 = vpop.permute.xlu1 %129 }
  0x92   :  { %1760 = vperm.xlu1 %4038, %v3436_v20   ;;  %v5024_v60 = vpop.permute.xlu0 %124 }
  0x93   :  { %1535 = vperm.xlu0 %4037, %v1532_v21  }
  0x95   :  { %v5032_v63 = vpop.permute.xlu1 %139 }
  0x96   :  { %1770 = vperm.xlu1 %4038, %v3438_v22   ;;  %v5034_v0 = vpop.permute.xlu0 %134 }
  0x97   :  { %1765 = vperm.xlu0 %4037, %v3437_v23   ;;  %v3596_v23 = vld [vmem:[%s5771_s8 + $0x60] sm:$0xff] }
  0x99   :  { %v5042_v3 = vpop.permute.xlu1 %149 }
  0x9a   :  { %2098 = vperm.xlu1 %4038, %v3488_v24   ;;  %v5050_v6 = vpop.permute.xlu0 %144  ;;  %v3595_v24 = vld [vmem:[%s5771_s8 + $0x58] sm:$0xff] }
  0x9b   :  { %1775 = vperm.xlu0 %4037, %v3439_v25  }
  0x9d   :  { %v5058_v9 = vpop.permute.xlu1 %159 }
  0x9e   :  { %2108 = vperm.xlu1 %4038, %v3490_v26   ;;  %v5060_v10 = vpop.permute.xlu0 %154 }
  0x9f   :  { %2103 = vperm.xlu0 %4037, %v3489_v27  }
  0xa1   :  { %v5074_v19 = vpop.permute.xlu1 %487 }
  0xa2   :  { %2118 = vperm.xlu1 %4038, %v3492_v28   ;;  %v5086_v25 = vpop.permute.xlu0 %482 }
  0xa3   :  { %2113 = vperm.xlu0 %4037, %v3491_v29  }
  0xa6   :  { %2128 = vperm.xlu1 %4038, %v3494_v31   ;;  %v3597_v31 = vld [vmem:[%s5771_s8 + $0x68] sm:$0xff] }
  0xa7   :  { %2123 = vperm.xlu0 %4037, %v3493_v32  }
  0xaa   :  { %2138 = vperm.xlu1 %4038, %v3496_v33  }
  0xab   :  { %2133 = vperm.xlu0 %4037, %v3495_v34   ;;  %v5102_v34 = vpop.permute.xlu1 %497 }
  0xae   :  { %2148 = vperm.xlu1 %4038, %v3498_v35  }
  0xaf   :  { %2143 = vperm.xlu0 %4037, %v3497_v36   ;;  %v5107_v36 = vpop.permute.xlu0 %492 }
  0xb2   :  { %2158 = vperm.xlu1 %4038, %v3500_v38  }
  0xb3   :  { %2153 = vperm.xlu0 %4037, %v3499_v39  }
  0xb6   :  { %2168 = vperm.xlu1 %4038, %v3502_v41  }
  0xb7   :  { %2163 = vperm.xlu0 %4037, %v3501_v42   ;;  %v3616_v42 = vld [vmem:[%s5772_s10 + $0x20] sm:$0xff] }
  0xba   :  { %2477 = vperm.xlu1 %4038, %v3544_v45  }
  0xbb   :  { %2173 = vperm.xlu0 %4037, %v3503_v46  }
  0xbe   :  { %2487 = vperm.xlu1 %4038, %v3546_v48  }
  0xbf   :  { %2482 = vperm.xlu0 %4037, %v3545_v49  }
  0xc2   :  { %2497 = vperm.xlu1 %4038, %v3548_v51  }
  0xc3   :  { %2492 = vperm.xlu0 %4037, %v3547_v52  }
  0xc6   :  { %2507 = vperm.xlu1 %4038, %v3550_v55  }
  0xc7   :  { %2502 = vperm.xlu0 %4037, %v3549_v56  }
  0xca   :  { %2517 = vperm.xlu1 %4038, %v3552_v58  }
  0xcb   :  { %2512 = vperm.xlu0 %4037, %v3551_v59  }
  0xce   :  { %2527 = vperm.xlu1 %4038, %v3554_v61  }
  0xcf   :  { %2522 = vperm.xlu0 %4037, %v3553_v62  }
  0xd2   :  { %2537 = vperm.xlu1 %4038, %v3556_v1  }
  0xd3   :  { %2532 = vperm.xlu0 %4037, %v3555_v2  }
  0xd6   :  { %2547 = vperm.xlu1 %4038, %v3558_v4  }
  0xd7   :  { %2542 = vperm.xlu0 %4037, %v3557_v5  }
  0xda   :  { %2840 = vperm.xlu1 %4038, %v3592_v7  }
  0xdb   :  { %2552 = vperm.xlu0 %4037, %v3559_v8  }
  0xdc   :  { %v3769_v11 = vpop.f32.mrb[0].mxu0 }
  0xdd   :  { %v5069_v14 = vadd.f32 %v3769_v11, %v4966_v37  ;;  %v265_v15 = vpop.f32.mrb[1].mxu0  ;;  %v3619_v11 = vld [vmem:[%s5772_s10 + $0x38] sm:$0xff] }
  0xde   :  { %v5071_v16 = vadd.f32 %v265_v15, %v85_v40  ;;  %v3770_v18 = vpop.f32.mrb[2].mxu0  ;;  %2850 = vperm.xlu1 %4038, %v3594_v12  }
  0xdf   :  { %v3320_v17 = vmul.f32 -1.442695, %v5069_v14  ;;  %2845 = vperm.xlu0 %4037, %v3593_v13   ;;  %v5078_v21 = vadd.f32 %v3770_v18, %v4980_v43  ;;  %v268_v22 = vpop.f32.mrb[3].mxu0  ;;  %v3599_v43 = vld [vmem:[%s5771_s8 + $0x78] sm:$0xff] }
  0xe0   :  { %v3318_v20 = vmul.f32 -1.442695, %v5071_v16  ;;  %v5089_v26 = vadd.f32 %v268_v22, %v4982_v44 }
  0xe1   :  { %4103 = vpow2.f32 %v3320_v17  ;;  %v3321_v27 = vmul.f32 -1.442695, %v5078_v21 }
  0xe2   :  { %4105 = vpow2.f32 %v3318_v20  ;;  %v3319_v28 = vmul.f32 -1.442695, %v5089_v26  ;;  %2860 = vperm.xlu1 %4038, %v3596_v23  }
  0xe3   :  { %2855 = vperm.xlu0 %4037, %v3595_v24   ;;  %4107 = vpow2.f32 %v3321_v27 }
  0xe4   :  { %v3773_v29 = vpop.f32.mrb[4].mxu0  ;;  %4109 = vpow2.f32 %v3319_v28 }
  0xe5   :  { %v5100_v32 = vadd.f32 %v3773_v29, %v5008_v54  ;;  %v281_v33 = vpop.f32.mrb[5].mxu0  ;;  %v5133_v54 = vpop.permute.xlu0 %502 }
  0xe6   :  { %v5105_v35 = vadd.f32 %v281_v33, %v4998_v50  ;;  %v3774_v38 = vpop.f32.mrb[6].mxu0  ;;  %2870 = vperm.xlu1 %4038, %v3598_v30   ;;  %v5125_v50 = vpop.permute.xlu1 %507 }
  0xe7   :  { %v3324_v37 = vmul.f32 -1.442695, %v5100_v32  ;;  %2865 = vperm.xlu0 %4037, %v3597_v31   ;;  %v5112_v40 = vadd.f32 %v3774_v38, %v5006_v53  ;;  %v284_v41 = vpop.f32.mrb[7].mxu0  ;;  %v3618_v53 = vld [vmem:[%s5772_s10 + $0x30] sm:$0xff] }
  0xe8   :  { %v3322_v39 = vmul.f32 -1.442695, %v5105_v35  ;;  %v5121_v44 = vadd.f32 %v284_v41, %v4990_v47  ;;  %v3617_v47 = vld [vmem:[%s5772_s10 + $0x28] sm:$0xff] }
  0xe9   :  { %4111 = vpow2.f32 %v3324_v37  ;;  %v3325_v45 = vmul.f32 -1.442695, %v5112_v40 }
  0xea   :  { %4113 = vpow2.f32 %v3322_v39  ;;  %v3323_v48 = vmul.f32 -1.442695, %v5121_v44  ;;  %3039 = vperm.xlu1 %4038, %v3616_v42   ;;  %v5156_v17 = vpop.permute.xlu1 %517 }
  0xeb   :  { %v4104_v46 = vpop.eup %4103  ;;  %2875 = vperm.xlu0 %4037, %v3599_v43   ;;  %4115 = vpow2.f32 %v3325_v45 }
  0xec   :  { %v4106_v49 = vpop.eup %4105  ;;  %v378_v51 = vadd.f32 1.0, %v4104_v46  ;;  %v3777_v52 = vpop.f32.mrb[8].mxu0  ;;  %4117 = vpow2.f32 %v3323_v48 }
  0xed   :  { %v376_v55 = vadd.f32 1.0, %v4106_v49  ;;  %v5136_v56 = vadd.f32 %v3777_v52, %v5034_v0  ;;  %v297_v58 = vpop.f32.mrb[9].mxu0  ;;  %v4108_v59 = vpop.eup %4107 }
  0xee   :  { %v5139_v61 = vadd.f32 %v297_v58, %v5024_v60  ;;  %v4110_v62 = vpop.eup %4109  ;;  %4119 = vrcp.f32 %v378_v51  ;;  %v379_v1 = vadd.f32 1.0, %v4108_v59  ;;  %v3778_v4 = vpop.f32.mrb[10].mxu0  ;;  %3049 = vperm.xlu1 %4038, %v3618_v53   ;;  %v3629_v60 = vld [vmem:[%s5773_s12 + $0x8] sm:$0xff] }
  0xef   :  { %v3328_v2 = vmul.f32 -1.442695, %v5136_v56  ;;  %3044 = vperm.xlu0 %4037, %v3617_v47   ;;  %4121 = vrcp.f32 %v376_v55  ;;  %v377_v5 = vadd.f32 1.0, %v4110_v62  ;;  %v5144_v0 = vadd.f32 %v3778_v4, %v5032_v63  ;;  %v300_v8 = vpop.f32.mrb[11].mxu0  ;;  %v5158_v63 = vpop.permute.xlu0 %512 }
  0xf0   :  { %v3326_v7 = vmul.f32 -1.442695, %v5139_v61  ;;  %4123 = vrcp.f32 %v379_v1  ;;  %v5153_v12 = vadd.f32 %v300_v8, %v5016_v57 }
  0xf1   :  { %4125 = vrcp.f32 %v377_v5  ;;  %v3329_v13 = vmul.f32 -1.442695, %v5144_v0 }
  0xf2   :  { %4127 = vpow2.f32 %v3328_v2  ;;  %3158 = vperm.xlu1 %4038, %v3629_v60   ;;  %v3327_v22 = vmul.f32 -1.442695, %v5153_v12 }
  0xf3   :  { %v4112_v15 = vpop.eup %4111  ;;  %3054 = vperm.xlu0 %4037, %v3619_v11   ;;  %4129 = vpow2.f32 %v3326_v7 }
  0xf4   :  { %v4114_v18 = vpop.eup %4113  ;;  %v382_v20 = vadd.f32 1.0, %v4112_v15  ;;  %v3781_v23 = vpop.f32.mrb[12].mxu0  ;;  %4131 = vpow2.f32 %v3329_v13 }
  0xf5   :  { %v380_v24 = vadd.f32 1.0, %v4114_v18  ;;  %v5162_v57 = vadd.f32 %v3781_v23, %v5060_v10  ;;  %v313_v27 = vpop.f32.mrb[13].mxu0  ;;  %v4116_v28 = vpop.eup %4115 }
  0xf6   :  { %4133 = vrcp.f32 %v382_v20  ;;  %v5165_v29 = vadd.f32 %v313_v27, %v5050_v6  ;;  %v4118_v30 = vpop.eup %4117  ;;  %v383_v31 = vadd.f32 1.0, %v4116_v28  ;;  %v3782_v37 = vpop.f32.mrb[14].mxu0 }
  0xf7   :  { %4135 = vrcp.f32 %v380_v24  ;;  %v3332_v33 = vmul.f32 -1.442695, %v5162_v57  ;;  %v381_v38 = vadd.f32 1.0, %v4118_v30  ;;  %v5170_v41 = vadd.f32 %v3782_v37, %v5058_v9  ;;  %v316_v10 = vpop.f32.mrb[15].mxu0 }
  0xf8   :  { %4137 = vpow2.f32 %v3327_v22  ;;  %v3330_v39 = vmul.f32 -1.442695, %v5165_v29  ;;  %v4120_v42 = vpop.eup %4119  ;;  %v5173_v43 = vadd.f32 %v316_v10, %v5042_v3 }
  0xf9   :  { %4139 = vrcp.f32 %v383_v31  ;;  %v4122_v6 = vpop.eup %4121  ;;  %v3333_v45 = vmul.f32 -1.442695, %v5170_v41  ;;  %v426_v51 = vmul.f32 %v4120_v42, %v5069_v14 }
  0xfa   :  { %4141 = vrcp.f32 %v381_v38  ;;  %v4124_v46 = vpop.eup %4123  ;;  %v3331_v48 = vmul.f32 -1.442695, %v5173_v43  ;;  %v424_v53 = vmul.f32 %v4122_v6, %v5071_v16 }
  0xfb   :  { %4143 = vpow2.f32 %v3332_v33  ;;  %v4126_v49 = vpop.eup %4125  ;;  %v427_v9 = vmul.f32 %v4124_v46, %v5078_v21 }
  0xfc   :  { %4145 = vpow2.f32 %v3330_v39  ;;  %v4128_v52 = vpop.eup %4127  ;;  %v425_v3 = vmul.f32 %v4126_v49, %v5089_v26 }
  0xfd   :  { %4147 = vpow2.f32 %v3333_v45  ;;  %v4130_v47 = vpop.eup %4129  ;;  %v386_v55 = vadd.f32 1.0, %v4128_v52  ;;  %v441_v58 = vpack.c.bf16 %v427_v9, %v426_v51  ;;  %v4053_v9 = vld [vmem:[%s5774_s3 + $0x30] sm:$0xff]   ;;  %v4054_v52 = vld [vmem:[%s5774_s3 + $0x38] sm:$0xff]  }
  0xfe   :  { %4149 = vpow2.f32 %v3331_v48  ;;  %v4132_v59 = vpop.eup %4131  ;;  %v384_v62 = vadd.f32 1.0, %v4130_v47  ;;  %v440_v1 = vpack.c.bf16 %v425_v3, %v424_v53  ;;  %v4055_v53 = vld [vmem:[%s5775_s5] sm:$0xff]  }
  0xff   :  { %4151 = vrcp.f32 %v386_v55  ;;  %v387_v4 = vadd.f32 1.0, %v4132_v59  ;;  %3831 = vmatprep.mubr.bf16.mxu0 %v4055_v53 }
 0x100   :  { %v4134_v2 = vpop.eup %4133  ;;  %3783 = vmatprep.subr.bf16.mxu1 %v440_v1 }
 0x101   :  { %v4136_v14 = vpop.eup %4135  ;;  %4153 = vrcp.f32 %v387_v4  ;;  %3784 = vmatpush3.bf16.msra.mxu1 %v440_v1  ;;  %v430_v7 = vmul.f32 %v4134_v2, %v5100_v32 }
 0x102   :  { %v4138_v21 = vpop.eup %4137  ;;  %4155 = vrcp.f32 %v384_v62  ;;  %3785 = vmatprep.subr.bf16.mxu1 %v441_v58  ;;  %v428_v11 = vmul.f32 %v4136_v14, %v5105_v35 }
 0x103   :  { %v4140_v5 = vpop.eup %4139  ;;  %v385_v16 = vadd.f32 1.0, %v4138_v21  ;;  %v523_v21 = vpop.permute.xlu0 %522 }
 0x104   :  { %v4142_v26 = vpop.eup %4141  ;;  %v431_v8 = vmul.f32 %v4140_v5, %v5112_v40  ;;  %v528_v5 = vpop.permute.xlu1 %527 }
 0x105   :  { %v4144_v60 = vpop.eup %4143  ;;  %v429_v13 = vmul.f32 %v4142_v26, %v5121_v44  ;;  %4157 = vrcp.f32 %v385_v16  ;;  %3786 = vmatpush3.bf16.msra.mxu1 %v441_v58 }
 0x106   :  { %v4146_v15 = vpop.eup %4145  ;;  %v390_v18 = vadd.f32 1.0, %v4144_v60  ;;  %v443_v20 = vpack.c.bf16 %v431_v8, %v430_v7 }
 0x107   :  { %v4148_v22 = vpop.eup %4147  ;;  %v388_v23 = vadd.f32 1.0, %v4146_v15  ;;  %v442_v24 = vpack.c.bf16 %v429_v13, %v428_v11  ;;  %v533_v13 = vpop.permute.xlu0 %532 }
 0x108   :  { %v4150_v27 = vpop.eup %4149  ;;  %4159 = vrcp.f32 %v390_v18  ;;  %v391_v28 = vadd.f32 1.0, %v4148_v22 }
 0x109   :  { %4161 = vrcp.f32 %v388_v23  ;;  %v389_v32 = vadd.f32 1.0, %v4150_v27  ;;  %3787 = vmatprep.subr.bf16.mxu1 %v442_v24  ;;  %v4152_v40 = vpop.eup %4151 }
 0x10a   :  { %4163 = vrcp.f32 %v391_v28  ;;  %3788 = vmatpush3.bf16.msra.mxu1 %v442_v24  ;;  %v434_v30 = vmul.f32 %v4152_v40, %v5136_v56 }
 0x10b   :  { %4165 = vrcp.f32 %v389_v32  ;;  %3789 = vmatprep.subr.bf16.mxu1 %v443_v20  ;;  %v4154_v35 = vpop.eup %4153 }
 0x10c   :  { %v4156_v44 = vpop.eup %4155  ;;  %v435_v31 = vmul.f32 %v4154_v35, %v5144_v0  ;;  %v543_v35 = vpop.permute.xlu0 %542 }
 0x10d   :  { %v432_v38 = vmul.f32 %v4156_v44, %v5139_v61 }
 0x10e   :  { %3790 = vmatpush3.bf16.msra.mxu1 %v443_v20  ;;  %v445_v37 = vpack.c.bf16 %v435_v31, %v434_v30  ;;  %v538_v20 = vpop.permute.xlu1 %537 }
 0x10f   :  { %v4158_v33 = vpop.eup %4157 }
 0x110   :  { %v433_v39 = vmul.f32 %v4158_v33, %v5153_v12  ;;  %v4048_v12 = vld [vmem:[%s5774_s3 + $0x8] sm:$0xff]  }
 0x112   :  { %v4160_v10 = vpop.eup %4159  ;;  %v444_v42 = vpack.c.bf16 %v433_v39, %v432_v38 }
 0x113   :  { %v4162_v6 = vpop.eup %4161  ;;  %v438_v48 = vmul.f32 %v4160_v10, %v5162_v57  ;;  %v4049_v57 = vld [vmem:[%s5774_s3 + $0x10] sm:$0xff]   ;;  %v548_v10 = vpop.permute.xlu1 %547 }
 0x114   :  { %v4164_v45 = vpop.eup %4163  ;;  %3791 = vmatprep.subr.bf16.mxu1 %v444_v42  ;;  %v436_v56 = vmul.f32 %v4162_v6, %v5165_v29  ;;  %v4050_v29 = vld [vmem:[%s5774_s3 + $0x18] sm:$0xff]  }
 0x115   :  { %v4166_v46 = vpop.eup %4165  ;;  %v439_v49 = vmul.f32 %v4164_v45, %v5170_v41  ;;  %3792 = vmatpush3.bf16.msra.mxu1 %v444_v42  ;;  %v4051_v41 = vld [vmem:[%s5774_s3 + $0x20] sm:$0xff]  }
 0x116   :  { %v437_v0 = vmul.f32 %v4166_v46, %v5173_v43  ;;  %3793 = vmatprep.subr.bf16.mxu1 %v445_v37  ;;  %v4052_v43 = vld [vmem:[%s5774_s3 + $0x28] sm:$0xff]  }
 0x117   :  { %v447_v51 = vpack.c.bf16 %v439_v49, %v438_v48 }
 0x118   :  { %v446_v61 = vpack.c.bf16 %v437_v0, %v436_v56  ;;  %v553_v56 = vpop.permute.xlu0 %552 }
 0x119   :  { %3794 = vmatpush3.bf16.msra.mxu1 %v445_v37 }
 0x11a   :  { %3795 = vmatprep.subr.bf16.mxu1 %v446_v61 }
 0x11d   :  { %3796 = vmatpush3.bf16.msra.mxu1 %v446_v61 }
 0x11e   :  { %3797 = vmatprep.subr.bf16.mxu1 %v447_v51 }
 0x121   :  { %3798 = vmatpush3.bf16.msra.mxu1 %v447_v51 }
 0x124   :  { %3800 = vmatmul.mubr.bf16.vlgmr.msra.gmra.mrb[0].mxu1 %v4048_v12 }
 0x125   :  { %3803 = vmatprep.mubr.bf16.mxu1 %v4049_v57 }
 0x12c   :  { %3804 = vmatmul.mubr.bf16.gmra.mrb[4].mxu1 %v4050_v29 }
 0x12d   :  { %3807 = vmatprep.mubr.bf16.mxu1 %v4051_v41 }
 0x134   :  { %3808 = vmatmul.mubr.bf16.gmra.mrb[8].mxu1 %v4052_v43  ;;  %v558_v43 = vpop.permute.xlu1 %557 }
 0x135   :  { %3811 = vmatprep.mubr.bf16.mxu1 %v4053_v9 }
 0x13c   :  { %3812 = vmatmul.mubr.bf16.gmra.mrb[12].mxu1 %v4054_v52 }
 0x1f7   :  { %v3801_v3 = vpop.f32.mrb[0].mxu1 }
 0x1f8   :  { %v5218_v47 = vadd.f32 %v3801_v3, %v5107_v36  ;;  %v642_v55 = vpop.f32.mrb[1].mxu1 }
 0x1f9   :  { %v5221_v58 = vadd.f32 %v642_v55, %v5086_v25  ;;  %v3802_v59 = vpop.f32.mrb[2].mxu1 }
 0x1fa   :  { %v3344_v62 = vmul.f32 -1.442695, %v5218_v47  ;;  %v5225_v1 = vadd.f32 %v3802_v59, %v5102_v34  ;;  %v645_v2 = vpop.f32.mrb[3].mxu1 }
 0x1fb   :  { %v3342_v4 = vmul.f32 -1.442695, %v5221_v58  ;;  %v5229_v14 = vadd.f32 %v645_v2, %v5074_v19 }
 0x1fc   :  { %4167 = vpow2.f32 %v3344_v62  ;;  %v3345_v36 = vmul.f32 -1.442695, %v5225_v1 }
 0x1fd   :  { %4169 = vpow2.f32 %v3342_v4  ;;  %v3343_v25 = vmul.f32 -1.442695, %v5229_v14 }
 0x1fe   :  { %4171 = vpow2.f32 %v3345_v36 }
 0x1ff   :  { %4173 = vpow2.f32 %v3343_v25  ;;  %v3805_v16 = vpop.f32.mrb[4].mxu1 }
 0x200   :  { %v5234_v34 = vadd.f32 %v3805_v16, %v5158_v63  ;;  %v658_v26 = vpop.f32.mrb[5].mxu1 }
 0x201   :  { %v5237_v7 = vadd.f32 %v658_v26, %v5133_v54  ;;  %v3806_v19 = vpop.f32.mrb[6].mxu1 }
 0x202   :  { %v3348_v8 = vmul.f32 -1.442695, %v5234_v34  ;;  %v5241_v60 = vadd.f32 %v3806_v19, %v5156_v17  ;;  %v661_v11 = vpop.f32.mrb[7].mxu1 }
 0x203   :  { %v3346_v15 = vmul.f32 -1.442695, %v5237_v7  ;;  %v5245_v18 = vadd.f32 %v661_v11, %v5125_v50 }
 0x204   :  { %4175 = vpow2.f32 %v3348_v8  ;;  %v3349_v63 = vmul.f32 -1.442695, %v5241_v60 }
 0x205   :  { %4177 = vpow2.f32 %v3346_v15  ;;  %v3347_v54 = vmul.f32 -1.442695, %v5245_v18 }
 0x206   :  { %v4168_v22 = vpop.eup %4167  ;;  %4179 = vpow2.f32 %v3349_v63 }
 0x207   :  { %v4170_v23 = vpop.eup %4169  ;;  %v755_v24 = vadd.f32 1.0, %v4168_v22  ;;  %4181 = vpow2.f32 %v3347_v54  ;;  %v3809_v17 = vpop.f32.mrb[8].mxu1 }
 0x208   :  { %v4172_v27 = vpop.eup %4171  ;;  %v753_v28 = vadd.f32 1.0, %v4170_v23  ;;  %v5249_v32 = vadd.f32 %v3809_v17, %v533_v13  ;;  %v674_v40 = vpop.f32.mrb[9].mxu1 }
 0x209   :  { %v4174_v50 = vpop.eup %4173  ;;  %4183 = vrcp.f32 %v755_v24  ;;  %v756_v44 = vadd.f32 1.0, %v4172_v27  ;;  %v5251_v30 = vadd.f32 %v674_v40, %v523_v21  ;;  %v3810_v31 = vpop.f32.mrb[10].mxu1 }
 0x20a   :  { %4185 = vrcp.f32 %v753_v28  ;;  %v754_v33 = vadd.f32 1.0, %v4174_v50  ;;  %v3352_v37 = vmul.f32 -1.442695, %v5249_v32  ;;  %v5254_v38 = vadd.f32 %v3810_v31, %v538_v20  ;;  %v677_v39 = vpop.f32.mrb[11].mxu1 }
 0x20b   :  { %4187 = vrcp.f32 %v756_v44  ;;  %v3350_v42 = vmul.f32 -1.442695, %v5251_v30  ;;  %v5257_v6 = vadd.f32 %v677_v39, %v528_v5 }
 0x20c   :  { %4189 = vrcp.f32 %v754_v33  ;;  %v3353_v45 = vmul.f32 -1.442695, %v5254_v38 }
 0x20d   :  { %4191 = vpow2.f32 %v3352_v37  ;;  %v3351_v46 = vmul.f32 -1.442695, %v5257_v6 }
 0x20e   :  { %v4176_v48 = vpop.eup %4175  ;;  %4193 = vpow2.f32 %v3350_v42 }
 0x20f   :  { %v4178_v49 = vpop.eup %4177  ;;  %v759_v0 = vadd.f32 1.0, %v4176_v48  ;;  %4195 = vpow2.f32 %v3353_v45  ;;  %v3813_v51 = vpop.f32.mrb[12].mxu1 }
 0x210   :  { %v4180_v61 = vpop.eup %4179  ;;  %v757_v12 = vadd.f32 1.0, %v4178_v49  ;;  %4197 = vpow2.f32 %v3351_v46  ;;  %v5261_v57 = vadd.f32 %v3813_v51, %v553_v56  ;;  %v690_v29 = vpop.f32.mrb[13].mxu1 }
 0x211   :  { %v4182_v41 = vpop.eup %4181  ;;  %4199 = vrcp.f32 %v759_v0  ;;  %v760_v9 = vadd.f32 1.0, %v4180_v61  ;;  %v5263_v52 = vadd.f32 %v690_v29, %v543_v35  ;;  %v3814_v53 = vpop.f32.mrb[14].mxu1 }
 0x212   :  { %4201 = vrcp.f32 %v757_v12  ;;  %v758_v3 = vadd.f32 1.0, %v4182_v41  ;;  %v3356_v55 = vmul.f32 -1.442695, %v5261_v57  ;;  %v5266_v59 = vadd.f32 %v3814_v53, %v558_v43  ;;  %v693_v62 = vpop.f32.mrb[15].mxu1 }
 0x213   :  { %v4184_v2 = vpop.eup %4183  ;;  %4203 = vrcp.f32 %v760_v9  ;;  %v3354_v4 = vmul.f32 -1.442695, %v5263_v52  ;;  %v5269_v36 = vadd.f32 %v693_v62, %v548_v10  ;;  %v4056_v62 = vld [vmem:[%s5775_s5 + $0x8] sm:$0xff]  }
 0x214   :  { %v4186_v21 = vpop.eup %4185  ;;  %4205 = vrcp.f32 %v758_v3  ;;  %v3357_v25 = vmul.f32 -1.442695, %v5266_v59  ;;  %v803_v19 = vmul.f32 %v4184_v2, %v5218_v47  ;;  %v4060_v2 = vld [vmem:[%s5775_s5 + $0x28] sm:$0xff]  }
 0x215   :  { %v4188_v5 = vpop.eup %4187  ;;  %4207 = vpow2.f32 %v3356_v55  ;;  %v3355_v16 = vmul.f32 -1.442695, %v5269_v36  ;;  %v801_v13 = vmul.f32 %v4186_v21, %v5221_v58  ;;  %v4063_v21 = vld [vmem:[%s5776_s7] sm:$0xff]  }
 0x216   :  { %v4190_v26 = vpop.eup %4189  ;;  %v804_v8 = vmul.f32 %v4188_v5, %v5225_v1  ;;  %4209 = vpow2.f32 %v3354_v4  ;;  %v4061_v4 = vld [vmem:[%s5775_s5 + $0x30] sm:$0xff]   ;;  %3863 = vmatprep.mubr.bf16.mxu1 %v4063_v21  ;;  %v865_v5 = vpop.permute.xlu1 %864 }
 0x217   :  { %v4192_v11 = vpop.eup %4191  ;;  %v802_v15 = vmul.f32 %v4190_v26, %v5229_v14  ;;  %4211 = vpow2.f32 %v3357_v25  ;;  %v860_v25 = vpop.permute.xlu0 %859 }
 0x218   :  { %v4194_v63 = vpop.eup %4193  ;;  %v763_v20 = vadd.f32 1.0, %v4192_v11  ;;  %4213 = vpow2.f32 %v3355_v16  ;;  %v818_v54 = vpack.c.bf16 %v804_v8, %v803_v19 }
 0x219   :  { %v4196_v22 = vpop.eup %4195  ;;  %v761_v23 = vadd.f32 1.0, %v4194_v63  ;;  %v817_v24 = vpack.c.bf16 %v802_v15, %v801_v13 }
 0x21a   :  { %v4198_v17 = vpop.eup %4197  ;;  %4215 = vrcp.f32 %v763_v20  ;;  %v764_v27 = vadd.f32 1.0, %v4196_v22  ;;  %v875_v26 = vpop.permute.xlu1 %874 }
 0x21b   :  { %v4200_v47 = vpop.eup %4199  ;;  %4217 = vrcp.f32 %v761_v23  ;;  %v762_v1 = vadd.f32 1.0, %v4198_v17  ;;  %3815 = vmatprep.subr.bf16.mxu0 %v817_v24  ;;  %v870_v16 = vpop.permute.xlu0 %869 }
 0x21c   :  { %v4202_v28 = vpop.eup %4201  ;;  %4219 = vrcp.f32 %v764_v27  ;;  %3816 = vmatpush3.bf16.msra.mxu0 %v817_v24  ;;  %v807_v40 = vmul.f32 %v4200_v47, %v5234_v34 }
 0x21d   :  { %v4204_v58 = vpop.eup %4203  ;;  %4221 = vrcp.f32 %v762_v1  ;;  %3817 = vmatprep.subr.bf16.mxu0 %v818_v54  ;;  %v805_v44 = vmul.f32 %v4202_v28, %v5237_v7 }
 0x21e   :  { %v4206_v14 = vpop.eup %4205  ;;  %v808_v50 = vmul.f32 %v4204_v58, %v5241_v60  ;;  %v885_v8 = vpop.permute.xlu1 %884 }
 0x21f   :  { %v4208_v35 = vpop.eup %4207  ;;  %v806_v31 = vmul.f32 %v4206_v14, %v5245_v18  ;;  %v880_v19 = vpop.permute.xlu0 %879 }
 0x220   :  { %v4210_v33 = vpop.eup %4209  ;;  %v767_v37 = vadd.f32 1.0, %v4208_v35  ;;  %3818 = vmatpush3.bf16.msra.mxu0 %v818_v54  ;;  %v820_v39 = vpack.c.bf16 %v808_v50, %v807_v40 }
 0x221   :  { %v4212_v10 = vpop.eup %4211  ;;  %v765_v42 = vadd.f32 1.0, %v4210_v33  ;;  %v819_v45 = vpack.c.bf16 %v806_v31, %v805_v44 }
 0x222   :  { %v4214_v46 = vpop.eup %4213  ;;  %4223 = vrcp.f32 %v767_v37  ;;  %v768_v48 = vadd.f32 1.0, %v4212_v10  ;;  %v895_v20 = vpop.permute.xlu1 %894 }
 0x223   :  { %4225 = vrcp.f32 %v765_v42  ;;  %v766_v49 = vadd.f32 1.0, %v4214_v46  ;;  %3819 = vmatprep.subr.bf16.mxu0 %v819_v45  ;;  %v890_v11 = vpop.permute.xlu0 %889 }
 0x224   :  { %v4216_v34 = vpop.eup %4215  ;;  %4227 = vrcp.f32 %v768_v48  ;;  %3820 = vmatpush3.bf16.msra.mxu0 %v819_v45 }
 0x225   :  { %v4218_v60 = vpop.eup %4217  ;;  %4229 = vrcp.f32 %v766_v49  ;;  %3821 = vmatprep.subr.bf16.mxu0 %v820_v39  ;;  %v811_v56 = vmul.f32 %v4216_v34, %v5249_v32 }
 0x226   :  { %v4220_v7 = vpop.eup %4219  ;;  %v809_v51 = vmul.f32 %v4218_v60, %v5251_v30  ;;  %v905_v14 = vpop.permute.xlu1 %904 }
 0x227   :  { %v4222_v18 = vpop.eup %4221  ;;  %v812_v0 = vmul.f32 %v4220_v7, %v5254_v38  ;;  %v900_v28 = vpop.permute.xlu0 %899 }
 0x228   :  { %v810_v61 = vmul.f32 %v4222_v18, %v5257_v6  ;;  %3822 = vmatpush3.bf16.msra.mxu0 %v820_v39 }
 0x229   :  { %v822_v12 = vpack.c.bf16 %v812_v0, %v811_v56 }
 0x22a   :  { %v821_v29 = vpack.c.bf16 %v810_v61, %v809_v51  ;;  %v915_v48 = vpop.permute.xlu1 %914 }
 0x22b   :  { %v910_v10 = vpop.permute.xlu0 %909 }
 0x22c   :  { %v4224_v41 = vpop.eup %4223  ;;  %3823 = vmatprep.subr.bf16.mxu0 %v821_v29 }
 0x22d   :  { %v4226_v43 = vpop.eup %4225  ;;  %3824 = vmatpush3.bf16.msra.mxu0 %v821_v29  ;;  %v815_v3 = vmul.f32 %v4224_v41, %v5261_v57  ;;  %v4057_v57 = vld [vmem:[%s5775_s5 + $0x10] sm:$0xff]  }
 0x22e   :  { %v4228_v9 = vpop.eup %4227  ;;  %3825 = vmatprep.subr.bf16.mxu0 %v822_v12  ;;  %v813_v38 = vmul.f32 %v4226_v43, %v5263_v52  ;;  %v4058_v52 = vld [vmem:[%s5775_s5 + $0x18] sm:$0xff]  }
 0x22f   :  { %v4230_v53 = vpop.eup %4229  ;;  %v816_v32 = vmul.f32 %v4228_v9, %v5266_v59  ;;  %v4059_v59 = vld [vmem:[%s5775_s5 + $0x20] sm:$0xff]   ;;  %v920_v29 = vpop.permute.xlu0 %919 }
 0x230   :  { %v814_v30 = vmul.f32 %v4230_v53, %v5269_v36  ;;  %v4062_v36 = vld [vmem:[%s5775_s5 + $0x38] sm:$0xff]  }
 0x231   :  { %3826 = vmatpush3.bf16.msra.mxu0 %v822_v12  ;;  %v824_v6 = vpack.c.bf16 %v816_v32, %v815_v3 }
 0x232   :  { %v823_v55 = vpack.c.bf16 %v814_v30, %v813_v38  ;;  %v925_v30 = vpop.permute.xlu1 %924 }
 0x234   :  { %3827 = vmatprep.subr.bf16.mxu0 %v823_v55 }
 0x235   :  { %3828 = vmatpush3.bf16.msra.mxu0 %v823_v55 }
 0x236   :  { %3829 = vmatprep.subr.bf16.mxu0 %v824_v6 }
 0x239   :  { %3830 = vmatpush3.bf16.msra.mxu0 %v824_v6 }
 0x23c   :  { %3832 = vmatmul.mubr.bf16.vlgmr.msra.gmra.mrb[16].mxu0 %v4056_v62 }
 0x23d   :  { %3835 = vmatprep.mubr.bf16.mxu0 %v4057_v57 }
 0x244   :  { %3836 = vmatmul.mubr.bf16.gmra.mrb[20].mxu0 %v4058_v52 }
 0x245   :  { %3839 = vmatprep.mubr.bf16.mxu0 %v4059_v59 }
 0x24c   :  { %3840 = vmatmul.mubr.bf16.gmra.mrb[24].mxu0 %v4060_v2  ;;  %v930_v2 = vpop.permute.xlu0 %929 }
 0x24d   :  { %3843 = vmatprep.mubr.bf16.mxu0 %v4061_v4 }
 0x254   :  { %3844 = vmatmul.mubr.bf16.gmra.mrb[28].mxu0 %v4062_v36 }
 0x30f   :  { %v3833_v13 = vpop.f32.mrb[16].mxu0 }
 0x310   :  { %v5313_v15 = vadd.f32 %v3833_v13, %v870_v16  ;;  %v1019_v63 = vpop.f32.mrb[17].mxu0 }
 0x311   :  { %v5315_v54 = vadd.f32 %v1019_v63, %v860_v25  ;;  %v3834_v22 = vpop.f32.mrb[18].mxu0 }
 0x312   :  { %v3368_v23 = vmul.f32 -1.442695, %v5313_v15  ;;  %v5318_v24 = vadd.f32 %v3834_v22, %v875_v26  ;;  %v1022_v17 = vpop.f32.mrb[19].mxu0 }
 0x313   :  { %v3366_v27 = vmul.f32 -1.442695, %v5315_v54  ;;  %v5321_v47 = vadd.f32 %v1022_v17, %v865_v5 }
 0x314   :  { %4231 = vpow2.f32 %v3368_v23  ;;  %v3369_v1 = vmul.f32 -1.442695, %v5318_v24 }
 0x315   :  { %4233 = vpow2.f32 %v3366_v27  ;;  %v3367_v58 = vmul.f32 -1.442695, %v5321_v47 }
 0x316   :  { %4235 = vpow2.f32 %v3369_v1 }
 0x317   :  { %4237 = vpow2.f32 %v3367_v58  ;;  %v3837_v40 = vpop.f32.mrb[20].mxu0 }
 0x318   :  { %v5325_v50 = vadd.f32 %v3837_v40, %v890_v11  ;;  %v1035_v35 = vpop.f32.mrb[21].mxu0 }
 0x319   :  { %v5327_v44 = vadd.f32 %v1035_v35, %v880_v19  ;;  %v3838_v31 = vpop.f32.mrb[22].mxu0  ;;  %v935_v19 = vpop.permute.xlu1 %934 }
 0x31a   :  { %v3372_v33 = vmul.f32 -1.442695, %v5325_v50  ;;  %v5330_v37 = vadd.f32 %v3838_v31, %v895_v20  ;;  %v1038_v39 = vpop.f32.mrb[23].mxu0 }
 0x31b   :  { %v3370_v42 = vmul.f32 -1.442695, %v5327_v44  ;;  %v5333_v45 = vadd.f32 %v1038_v39, %v885_v8 }
 0x31c   :  { %4239 = vpow2.f32 %v3372_v33  ;;  %v3373_v46 = vmul.f32 -1.442695, %v5330_v37 }
 0x31d   :  { %4241 = vpow2.f32 %v3370_v42  ;;  %v3371_v49 = vmul.f32 -1.442695, %v5333_v45 }
 0x31e   :  { %v4232_v34 = vpop.eup %4231  ;;  %4243 = vpow2.f32 %v3373_v46 }
 0x31f   :  { %v4234_v60 = vpop.eup %4233  ;;  %v1132_v7 = vadd.f32 1.0, %v4232_v34  ;;  %4245 = vpow2.f32 %v3371_v49  ;;  %v3841_v18 = vpop.f32.mrb[24].mxu0 }
 0x320   :  { %v4236_v56 = vpop.eup %4235  ;;  %v1130_v0 = vadd.f32 1.0, %v4234_v60  ;;  %v5337_v51 = vadd.f32 %v3841_v18, %v910_v10  ;;  %v1051_v61 = vpop.f32.mrb[25].mxu0 }
 0x321   :  { %v4238_v12 = vpop.eup %4237  ;;  %4247 = vrcp.f32 %v1132_v7  ;;  %v1133_v41 = vadd.f32 1.0, %v4236_v56  ;;  %v5339_v43 = vadd.f32 %v1051_v61, %v900_v28  ;;  %v3842_v9 = vpop.f32.mrb[26].mxu0 }
 0x322   :  { %4249 = vrcp.f32 %v1130_v0  ;;  %v1131_v53 = vadd.f32 1.0, %v4238_v12  ;;  %v3376_v3 = vmul.f32 -1.442695, %v5337_v51  ;;  %v5342_v32 = vadd.f32 %v3842_v9, %v915_v48  ;;  %v1054_v38 = vpop.f32.mrb[27].mxu0 }
 0x323   :  { %4251 = vrcp.f32 %v1133_v41  ;;  %v3374_v6 = vmul.f32 -1.442695, %v5339_v43  ;;  %v5345_v55 = vadd.f32 %v1054_v38, %v905_v14 }
 0x324   :  { %4253 = vrcp.f32 %v1131_v53  ;;  %v3377_v62 = vmul.f32 -1.442695, %v5342_v32 }
 0x325   :  { %4255 = vpow2.f32 %v3376_v3  ;;  %v3375_v57 = vmul.f32 -1.442695, %v5345_v55 }
 0x326   :  { %v4240_v52 = vpop.eup %4239  ;;  %4257 = vpow2.f32 %v3374_v6 }
 0x327   :  { %v4242_v59 = vpop.eup %4241  ;;  %v1136_v4 = vadd.f32 1.0, %v4240_v52  ;;  %4259 = vpow2.f32 %v3377_v62  ;;  %v3845_v36 = vpop.f32.mrb[28].mxu0 }
 0x328   :  { %v4244_v21 = vpop.eup %4243  ;;  %v1134_v25 = vadd.f32 1.0, %v4242_v59  ;;  %4261 = vpow2.f32 %v3375_v57  ;;  %v5349_v5 = vadd.f32 %v3845_v36, %v930_v2  ;;  %v1067_v16 = vpop.f32.mrb[29].mxu0 }
 0x329   :  { %v4246_v26 = vpop.eup %4245  ;;  %4263 = vrcp.f32 %v1136_v4  ;;  %v1137_v8 = vadd.f32 1.0, %v4244_v21  ;;  %v5351_v11 = vadd.f32 %v1067_v16, %v920_v29  ;;  %v3846_v13 = vpop.f32.mrb[30].mxu0 }
 0x32a   :  { %4265 = vrcp.f32 %v1134_v25  ;;  %v1135_v63 = vadd.f32 1.0, %v4246_v26  ;;  %v3380_v20 = vmul.f32 -1.442695, %v5349_v5  ;;  %v5354_v22 = vadd.f32 %v3846_v13, %v935_v19  ;;  %v1070_v23 = vpop.f32.mrb[31].mxu0 }
 0x32b   :  { %v4248_v17 = vpop.eup %4247  ;;  %4267 = vrcp.f32 %v1137_v8  ;;  %v3378_v27 = vmul.f32 -1.442695, %v5351_v11  ;;  %v5357_v1 = vadd.f32 %v1070_v23, %v925_v30  ;;  %v4064_v23 = vld [vmem:[%s5776_s7 + $0x8] sm:$0xff]  }
 0x32c   :  { %v4250_v28 = vpop.eup %4249  ;;  %4269 = vrcp.f32 %v1135_v63  ;;  %v3381_v58 = vmul.f32 -1.442695, %v5354_v22  ;;  %v1180_v31 = vmul.f32 %v4248_v17, %v5313_v15  ;;  %v1221_v17 = vpop.permute.xlu0 %1220 }
 0x32d   :  { %v4252_v14 = vpop.eup %4251  ;;  %4271 = vpow2.f32 %v3380_v20  ;;  %v3379_v40 = vmul.f32 -1.442695, %v5357_v1  ;;  %v1178_v10 = vmul.f32 %v4250_v28, %v5315_v54 }
 0x32e   :  { %v4254_v35 = vpop.eup %4253  ;;  %v1181_v33 = vmul.f32 %v4252_v14, %v5318_v24  ;;  %4273 = vpow2.f32 %v3378_v27  ;;  %v1226_v27 = vpop.permute.xlu1 %1225 }
 0x32f   :  { %v4256_v39 = vpop.eup %4255  ;;  %v1179_v42 = vmul.f32 %v4254_v35, %v5321_v47  ;;  %4275 = vpow2.f32 %v3381_v58 }
 0x330   :  { %v4258_v46 = vpop.eup %4257  ;;  %v1140_v48 = vadd.f32 1.0, %v4256_v39  ;;  %4277 = vpow2.f32 %v3379_v40  ;;  %v1195_v49 = vpack.c.bf16 %v1181_v33, %v1180_v31 }
 0x331   :  { %v4260_v34 = vpop.eup %4259  ;;  %v1138_v60 = vadd.f32 1.0, %v4258_v46  ;;  %v1194_v7 = vpack.c.bf16 %v1179_v42, %v1178_v10 }
 0x332   :  { %v4262_v18 = vpop.eup %4261  ;;  %4279 = vrcp.f32 %v1140_v48  ;;  %v1141_v56 = vadd.f32 1.0, %v4260_v34  ;;  %v1236_v28 = vpop.permute.xlu1 %1235 }
 0x333   :  { %v4264_v15 = vpop.eup %4263  ;;  %4281 = vrcp.f32 %v1138_v60  ;;  %v1139_v24 = vadd.f32 1.0, %v4262_v18  ;;  %3847 = vmatprep.subr.bf16.mxu1 %v1194_v7 }
 0x334   :  { %v4266_v0 = vpop.eup %4265  ;;  %4283 = vrcp.f32 %v1141_v56  ;;  %3848 = vmatpush3.bf16.msra.mxu1 %v1194_v7  ;;  %v1184_v61 = vmul.f32 %v4264_v15, %v5325_v50 }
 0x335   :  { %v4268_v54 = vpop.eup %4267  ;;  %4285 = vrcp.f32 %v1139_v24  ;;  %3849 = vmatprep.subr.bf16.mxu1 %v1195_v49  ;;  %v1182_v41 = vmul.f32 %v4266_v0, %v5327_v44 }
 0x336   :  { %v4270_v47 = vpop.eup %4269  ;;  %v1185_v12 = vmul.f32 %v4268_v54, %v5330_v37  ;;  %v1246_v46 = vpop.permute.xlu1 %1245 }
 0x337   :  { %v4272_v29 = vpop.eup %4271  ;;  %v1183_v9 = vmul.f32 %v4270_v47, %v5333_v45 }
 0x338   :  { %v4274_v53 = vpop.eup %4273  ;;  %v1144_v3 = vadd.f32 1.0, %v4272_v29  ;;  %3850 = vmatpush3.bf16.msra.mxu1 %v1195_v49  ;;  %v1197_v38 = vpack.c.bf16 %v1185_v12, %v1184_v61 }
 0x339   :  { %v4276_v30 = vpop.eup %4275  ;;  %v1142_v6 = vadd.f32 1.0, %v4274_v53  ;;  %v1196_v62 = vpack.c.bf16 %v1183_v9, %v1182_v41 }
 0x33a   :  { %v4278_v57 = vpop.eup %4277  ;;  %4287 = vrcp.f32 %v1144_v3  ;;  %v1145_v52 = vadd.f32 1.0, %v4276_v30  ;;  %v1256_v24 = vpop.permute.xlu1 %1255 }
 0x33b   :  { %4289 = vrcp.f32 %v1142_v6  ;;  %v1143_v59 = vadd.f32 1.0, %v4278_v57  ;;  %3851 = vmatprep.subr.bf16.mxu1 %v1196_v62 }
 0x33c   :  { %v4280_v50 = vpop.eup %4279  ;;  %4291 = vrcp.f32 %v1145_v52  ;;  %3852 = vmatpush3.bf16.msra.mxu1 %v1196_v62 }
 0x33d   :  { %v4282_v37 = vpop.eup %4281  ;;  %4293 = vrcp.f32 %v1143_v59  ;;  %3853 = vmatprep.subr.bf16.mxu1 %v1197_v38  ;;  %v1188_v2 = vmul.f32 %v4280_v50, %v5337_v51 }
 0x33e   :  { %v4284_v44 = vpop.eup %4283  ;;  %v1186_v36 = vmul.f32 %v4282_v37, %v5339_v43 }
 0x33f   :  { %v4286_v45 = vpop.eup %4285  ;;  %v1189_v4 = vmul.f32 %v4284_v44, %v5342_v32 }
 0x340   :  { %v1187_v21 = vmul.f32 %v4286_v45, %v5345_v55  ;;  %3854 = vmatpush3.bf16.msra.mxu1 %v1197_v38 }
 0x341   :  { %v1199_v25 = vpack.c.bf16 %v1189_v4, %v1188_v2 }
 0x342   :  { %v1198_v16 = vpack.c.bf16 %v1187_v21, %v1186_v36 }
 0x344   :  { %v4288_v26 = vpop.eup %4287  ;;  %3855 = vmatprep.subr.bf16.mxu1 %v1198_v16 }
 0x345   :  { %v4290_v19 = vpop.eup %4289  ;;  %3856 = vmatpush3.bf16.msra.mxu1 %v1198_v16  ;;  %v1192_v63 = vmul.f32 %v4288_v26, %v5349_v5  ;;  %v4065_v5 = vld [vmem:[%s5776_s7 + $0x10] sm:$0xff]  }
 0x346   :  { %v4292_v8 = vpop.eup %4291  ;;  %3857 = vmatprep.subr.bf16.mxu1 %v1199_v25  ;;  %v1190_v32 = vmul.f32 %v4290_v19, %v5351_v11  ;;  %v4066_v11 = vld [vmem:[%s5776_s7 + $0x18] sm:$0xff]  }
 0x347   :  { %v4294_v13 = vpop.eup %4293  ;;  %v1193_v51 = vmul.f32 %v4292_v8, %v5354_v22  ;;  %v4067_v22 = vld [vmem:[%s5777_s9] sm:$0xff]  }
 0x348   :  { %v1191_v43 = vmul.f32 %v4294_v13, %v5357_v1  ;;  %3879 = vmatprep.mubr.msk.bf16.mxu0 %vm1445_vm2, %v4067_v22  ;;  %v1231_v1 = vpop.permute.xlu0 %1230 }
 0x349   :  { %3858 = vmatpush3.bf16.msra.mxu1 %v1199_v25  ;;  %v1201_v55 = vpack.c.bf16 %v1193_v51, %v1192_v63 }
 0x34a   :  { %v1200_v20 = vpack.c.bf16 %v1191_v43, %v1190_v32 }
 0x34c   :  { %3859 = vmatprep.subr.bf16.mxu1 %v1200_v20  ;;  %v1241_v35 = vpop.permute.xlu0 %1240 }
 0x34d   :  { %3860 = vmatpush3.bf16.msra.mxu1 %v1200_v20 }
 0x34e   :  { %3861 = vmatprep.subr.bf16.mxu1 %v1201_v55 }
 0x350   :  { %v1251_v7 = vpop.permute.xlu0 %1250 }
 0x351   :  { %3862 = vmatpush3.bf16.msra.mxu1 %v1201_v55 }
 0x354   :  { %3864 = vmatmul.mubr.bf16.vlgmr.msra.gmra.mrb[16].mxu1 %v4064_v23 }
 0x355   :  { %3867 = vmatprep.mubr.bf16.mxu1 %v4065_v5 }
 0x35c   :  { %3868 = vmatmul.mubr.bf16.gmra.mrb[20].mxu1 %v4066_v11 }
 0x427   :  { %v3865_v58 = vpop.f32.mrb[16].mxu1 }
 0x428   :  { %v5390_v14 = vadd.f32 %v3865_v58, %v1231_v1  ;;  %v1316_v40 = vpop.f32.mrb[17].mxu1  ;;  %v4068_v58 = vld [vmem:[%s5777_s9 + $0x8] sm:$0xff]  }
 0x429   :  { %v1317_v31 = vadd.f32 %v1316_v40, %v1221_v17  ;;  %v3866_v33 = vpop.f32.mrb[18].mxu1  ;;  %v1418_v40 = vpop.permute.xlu0 %1417 }
 0x42a   :  { %v3388_v39 = vmul.f32 -1.442695, %v5390_v14  ;;  %v1328_v10 = vadd.f32 %v3866_v33, %v1236_v28  ;;  %v1319_v42 = vpop.f32.mrb[19].mxu1 }
 0x42b   :  { %v3386_v48 = vmul.f32 -1.442695, %v1317_v31  ;;  %v1320_v49 = vadd.f32 %v1319_v42, %v1226_v27 }
 0x42c   :  { %4295 = vpow2.f32 %v3388_v39  ;;  %v3389_v34 = vmul.f32 -1.442695, %v1328_v10 }
 0x42d   :  { %4297 = vpow2.f32 %v3386_v48  ;;  %v3387_v60 = vmul.f32 -1.442695, %v1320_v49 }
 0x42e   :  { %4299 = vpow2.f32 %v3389_v34 }
 0x42f   :  { %4301 = vpow2.f32 %v3387_v60  ;;  %v3869_v18 = vpop.f32.mrb[20].mxu1 }
 0x430   :  { %v1341_v56 = vadd.f32 %v3869_v18, %v1251_v7  ;;  %v1332_v15 = vpop.f32.mrb[21].mxu1 }
 0x431   :  { %v1333_v0 = vadd.f32 %v1332_v15, %v1241_v35  ;;  %v3870_v54 = vpop.f32.mrb[22].mxu1  ;;  %v1423_v35 = vpop.permute.xlu1 %1422 }
 0x432   :  { %v3392_v47 = vmul.f32 -1.442695, %v1341_v56  ;;  %v1344_v61 = vadd.f32 %v3870_v54, %v1256_v24  ;;  %v1335_v12 = vpop.f32.mrb[23].mxu1 }
 0x433   :  { %v3390_v29 = vmul.f32 -1.442695, %v1333_v0  ;;  %v1336_v41 = vadd.f32 %v1335_v12, %v1246_v46 }
 0x434   :  { %4303 = vpow2.f32 %v3392_v47  ;;  %v3393_v9 = vmul.f32 -1.442695, %v1344_v61 }
 0x435   :  { %4305 = vpow2.f32 %v3390_v29  ;;  %v3391_v53 = vmul.f32 -1.442695, %v1336_v41  ;;  %v1433_v42 = vpop.permute.xlu1 %1432 }
 0x436   :  { %v4296_v3 = vpop.eup %4295  ;;  %4307 = vpow2.f32 %v3393_v9 }
 0x437   :  { %v4298_v38 = vpop.eup %4297  ;;  %v1373_v30 = vadd.f32 1.0, %v4296_v3  ;;  %4309 = vpow2.f32 %v3391_v53 }
 0x438   :  { %v4300_v6 = vpop.eup %4299  ;;  %v1371_v62 = vadd.f32 1.0, %v4298_v38 }
 0x439   :  { %v4302_v57 = vpop.eup %4301  ;;  %4311 = vrcp.f32 %v1373_v30  ;;  %v1374_v52 = vadd.f32 1.0, %v4300_v6 }
 0x43a   :  { %4313 = vrcp.f32 %v1371_v62  ;;  %v1372_v59 = vadd.f32 1.0, %v4302_v57 }
 0x43b   :  { %4315 = vrcp.f32 %v1374_v52 }
 0x43c   :  { %4317 = vrcp.f32 %v1372_v59  ;;  %v3407_v59 = vld [vmem:[%s5767_s0 + $0x4] sm:$0xf] }
 0x43e   :  { %v4304_v50 = vpop.eup %4303 }
 0x43f   :  { %v4306_v37 = vpop.eup %4305  ;;  %v1377_v44 = vadd.f32 1.0, %v4304_v50 }
 0x440   :  { %v4308_v45 = vpop.eup %4307  ;;  %v1375_v2 = vadd.f32 1.0, %v4306_v37  ;;  %v1663_v37 = vpack.c.bf16 %v3407_v59, %v3407_v59 }
 0x441   :  { %v4310_v4 = vpop.eup %4309  ;;  %4319 = vrcp.f32 %v1377_v44  ;;  %v1378_v36 = vadd.f32 1.0, %v4308_v45  ;;  %v1531_v44 = vld [vmem:[%s5778_s11] sm:$0xf] }
 0x442   :  { %4321 = vrcp.f32 %v1375_v2  ;;  %v1376_v21 = vadd.f32 1.0, %v4310_v4  ;;  %v4069_v45 = vld [vmem:[%s5768_s1 + $0x40] sm:$0xff]   ;;  %v1843_v2 = vsel %vm227_vm0, %v1663_v37, 0  ;;  %v4070_v4 = vld [vmem:[%s5768_s1 + $0x48] sm:$0xff]  }
 0x443   :  { %v4312_v25 = vpop.eup %4311  ;;  %4323 = vrcp.f32 %v1378_v36  ;;  %v4071_v36 = vld [vmem:[%s5768_s1 + $0x50] sm:$0xff]  }
 0x444   :  { %v4314_v16 = vpop.eup %4313  ;;  %4325 = vrcp.f32 %v1376_v21  ;;  %v1397_v8 = vmul.f32 %v4312_v25, %v5390_v14  ;;  %v4584_v14 = vmov 0.0   ;;  %v4072_v21 = vld [vmem:[%s5768_s1 + $0x58] sm:$0xff]   ;;  %v4073_v25 = vld [vmem:[%s5768_s1 + $0x60] sm:$0xff]  }
 0x445   :  { %v4316_v26 = vpop.eup %4315  ;;  %v1395_v63 = vmul.f32 %v4314_v16, %v1317_v31  ;;  %v1428_v31 = vpop.permute.xlu0 %1427  ;;  %v4074_v16 = vld [vmem:[%s5768_s1 + $0x68] sm:$0xff]  }
 0x446   :  { %v4318_v19 = vpop.eup %4317  ;;  %v1398_v13 = vmul.f32 %v4316_v26, %v1328_v10  ;;  %v4075_v26 = vld [vmem:[%s5768_s1 + $0x70] sm:$0xff]  }
 0x447   :  { %v1396_v51 = vmul.f32 %v4318_v19, %v1320_v49  ;;  %v4076_v19 = vld [vmem:[%s5768_s1 + $0x78] sm:$0xff]  }
 0x448   :  { %v1404_v32 = vpack.c.bf16 %v1398_v13, %v1397_v8  ;;  %v4077_v8 = vld [vmem:[%s5779_s13] sm:$0xff]  }
 0x449   :  { %v1403_v43 = vpack.c.bf16 %v1396_v51, %v1395_v63  ;;  %3893 = vmatprep.mubr.msk.bf16.mxu1 %vm1597_vm5, %v4077_v8  ;;  %v1701_v13 = vpop.permute.xlu0 %1700 }
 0x44b   :  { %v4320_v55 = vpop.eup %4319  ;;  %3871 = vmatprep.subr.bf16.mxu0 %v1403_v43 }
 0x44c   :  { %v4322_v20 = vpop.eup %4321  ;;  %3872 = vmatpush3.bf16.msra.mxu0 %v1403_v43  ;;  %v1401_v11 = vmul.f32 %v4320_v55, %v1341_v56  ;;  %v1706_v55 = vpop.permute.xlu1 %1705 }
 0x44d   :  { %v4324_v23 = vpop.eup %4323  ;;  %3873 = vmatprep.subr.bf16.mxu0 %v1404_v32  ;;  %v1399_v17 = vmul.f32 %v4322_v20, %v1333_v0  ;;  %v1711_v63 = vpop.permute.xlu0 %1710 }
 0x44e   :  { %v4326_v5 = vpop.eup %4325  ;;  %v1402_v22 = vmul.f32 %v4324_v23, %v1344_v61 }
 0x44f   :  { %v1400_v27 = vmul.f32 %v4326_v5, %v1336_v41 }
 0x450   :  { %3874 = vmatpush3.bf16.msra.mxu0 %v1404_v32  ;;  %v1406_v1 = vpack.c.bf16 %v1402_v22, %v1401_v11  ;;  %v1716_v23 = vpop.permute.xlu1 %1715 }
 0x451   :  { %v1405_v28 = vpack.c.bf16 %v1400_v27, %v1399_v17  ;;  %v1721_v51 = vpop.permute.xlu0 %1720 }
 0x453   :  { %3875 = vmatprep.subr.bf16.mxu0 %v1405_v28 }
 0x454   :  { %3876 = vmatpush3.bf16.msra.mxu0 %v1405_v28  ;;  %v1726_v27 = vpop.permute.xlu1 %1725 }
 0x455   :  { %3877 = vmatprep.subr.bf16.mxu0 %v1406_v1  ;;  %v1731_v32 = vpop.permute.xlu0 %1730 }
 0x458   :  { %3878 = vmatpush3.bf16.msra.mxu0 %v1406_v1 }
 0x459   :  { %3883 = vmatprep.subr.bf16.mxu0 %v4584_v14  ;;  %v5447_v43 = vpop.permute.xlu0 %1740 }
 0x45b   :  { %3880 = vmatmul.mubr.msk.bf16.vlgmr.msra.gmra.mrb[32].mxu0 %vm1445_vm2, %v4068_v58 }
 0x45c   :  { %3887 = vmatprep.mubr.msk.bf16.mxu0 %vm4585_vm3, %v4584_v14 }
 0x45d   :  { %v1751_v20 = vpop.permute.xlu0 %1750 }
 0x461   :  { %v1536_v5 = vpop.permute.xlu0 %1535 }
 0x52e   :  { %v3881_v33 = vpop.f32.mrb[32].mxu0 }
 0x52f   :  { %v1495_v39 = vadd.f32 %v3881_v33, %v1428_v31  ;;  %v1486_v10 = vpop.f32.mrb[33].mxu0  ;;  %v4079_v31 = vld [vmem:[%s5774_s3 + $0x40] sm:$0xff]   ;;  %v1736_v33 = vpop.permute.xlu1 %1735 }
 0x530   :  { %v1487_v46 = vadd.f32 %v1486_v10, %v1418_v40  ;;  %v3882_v48 = vpop.f32.mrb[34].mxu0 }
 0x531   :  { %v3400_v49 = vmul.f32 -1.442695, %v1495_v39  ;;  %v1498_v34 = vadd.f32 %v3882_v48, %v1433_v42  ;;  %v1489_v60 = vpop.f32.mrb[35].mxu0 }
 0x532   :  { %v3398_v7 = vmul.f32 -1.442695, %v1487_v46  ;;  %v1490_v18 = vadd.f32 %v1489_v60, %v1423_v35  ;;  %v4078_v35 = vld [vmem:[%s5779_s13 + $0x8] sm:$0xff]  }
 0x533   :  { %4327 = vpow2.f32 %v3400_v49  ;;  %v3401_v56 = vmul.f32 -1.442695, %v1498_v34 }
 0x534   :  { %4329 = vpow2.f32 %v3398_v7  ;;  %v3399_v15 = vmul.f32 -1.442695, %v1490_v18 }
 0x535   :  { %4331 = vpow2.f32 %v3401_v56 }
 0x536   :  { %4333 = vpow2.f32 %v3399_v15  ;;  %v1746_v15 = vpop.permute.xlu1 %1745 }
 0x53d   :  { %v4328_v24 = vpop.eup %4327 }
 0x53e   :  { %v4330_v0 = vpop.eup %4329  ;;  %v1515_v54 = vadd.f32 1.0, %v4328_v24 }
 0x53f   :  { %v4332_v47 = vpop.eup %4331  ;;  %v1513_v61 = vadd.f32 1.0, %v4330_v0 }
 0x540   :  { %v4334_v12 = vpop.eup %4333  ;;  %4335 = vrcp.f32 %v1515_v54  ;;  %v1516_v29 = vadd.f32 1.0, %v4332_v47 }
 0x541   :  { %4337 = vrcp.f32 %v1513_v61  ;;  %v1514_v41 = vadd.f32 1.0, %v4334_v12 }
 0x542   :  { %4339 = vrcp.f32 %v1516_v29 }
 0x543   :  { %4341 = vrcp.f32 %v1514_v41 }
 0x54a   :  { %v4336_v9 = vpop.eup %4335 }
 0x54b   :  { %v4338_v53 = vpop.eup %4337  ;;  %v1527_v30 = vmul.f32 %v4336_v9, %v1495_v39 }
 0x54c   :  { %v4340_v3 = vpop.eup %4339  ;;  %v1525_v62 = vmul.f32 %v4338_v53, %v1487_v46  ;;  %v1756_v53 = vpop.permute.xlu1 %1755 }
 0x54d   :  { %v4342_v38 = vpop.eup %4341  ;;  %v1528_v6 = vmul.f32 %v4340_v3, %v1498_v34 }
 0x54e   :  { %v1526_v57 = vmul.f32 %v4342_v38, %v1490_v18 }
 0x54f   :  { %v1530_v52 = vpack.c.bf16 %v1528_v6, %v1527_v30 }
 0x550   :  { %v1529_v50 = vpack.c.bf16 %v1526_v57, %v1525_v62 }
 0x552   :  { %3884 = vmatpush3.bf16.msra.mxu0 %v1529_v50 }
 0x553   :  { %3885 = vmatprep.subr.bf16.mxu0 %v4584_v14 }
 0x556   :  { %3886 = vmatpush3.bf16.msra.mxu0 %v1530_v52 }
 0x557   :  { %4031 = vmatprep.subr.msk.bf16.mxu0 %vm227_vm0, %v1663_v37 }
 0x559   :  { %3888 = vmatmul.mubr.msk.bf16.vlgmr.msra.gmra.mrb[36].mxu0 %vm1538_vm4, %v1531_v44 }
 0x55a   :  { %3898 = vmatpush3.bf16.msra.mxu0 %v1843_v2  ;;  %3899 = vmatprep.mubr.msk.bf16.mxu0 %vm202_vm1, %v4069_v45 }
 0x561   :  { %3900 = vmatmul.mubr.msk.bf16.vlgmr.msra.gmra.mrb[40].mxu0 %vm202_vm1, %v4070_v4  ;;  %v1761_v4 = vpop.permute.xlu1 %1760 }
 0x562   :  { %3903 = vmatprep.mubr.msk.bf16.mxu0 %vm202_vm1, %v4071_v36 }
 0x569   :  { %3904 = vmatmul.mubr.msk.bf16.gmra.mrb[44].mxu0 %vm202_vm1, %v4072_v21 }
 0x56a   :  { %3907 = vmatprep.mubr.msk.bf16.mxu0 %vm202_vm1, %v4073_v25 }
 0x571   :  { %3908 = vmatmul.mubr.msk.bf16.gmra.mrb[48].mxu0 %vm202_vm1, %v4074_v16 }
 0x572   :  { %3911 = vmatprep.mubr.msk.bf16.mxu0 %vm202_vm1, %v4075_v26 }
 0x579   :  { %3912 = vmatmul.mubr.msk.bf16.gmra.mrb[52].mxu0 %vm202_vm1, %v4076_v19 }
 0x62c   :  { %v1576_v11 = vpop.f32.mrb[36].mxu0 }
 0x62d   :  { %v1577_v22 = vadd.f32 %v1576_v11, %v1536_v5  ;;  %v3889_v17 = vpop.f32.mrb[37].mxu0 }
 0x62e   :  { %v1579_v1 = vpop.f32.mrb[38].mxu0 }
 0x62f   :  { %v1582_v28 = vpack.c.bf16 %v1577_v22, %v1577_v22  ;;  %v3890_v58 = vpop.f32.mrb[39].mxu0 }
 0x631   :  { %v1606_v40 = vsel %vm1604_vm6, %v1582_v28, 0  ;;  %4030 = vmatprep.subr.msk.bf16.mxu1 %vm1604_vm6, %v1582_v28 }
 0x632   :  { %3892 = vmatpush3.bf16.msra.mxu1 %v1606_v40 }
 0x634   :  { %v3901_v39 = vpop.f32.mrb[40].mxu0 }
 0x635   :  { %v5457_v10 = vadd.f32 %v3901_v39, %v1711_v63  ;;  %v1879_v42 = vpop.f32.mrb[41].mxu0  ;;  %3894 = vmatmul.mubr.msk.bf16.vlgmr.msra.gmra.mrb[24].mxu1 %vm1597_vm5, %v4078_v35 }
 0x636   :  { %v5460_v46 = vadd.f32 %v1879_v42, %v1701_v13  ;;  %v3902_v48 = vpop.f32.mrb[42].mxu0  ;;  %3931 = vmatprep.mubr.bf16.mxu1 %v4079_v31  ;;  %v1766_v13 = vpop.permute.xlu0 %1765 }
 0x637   :  { %v3458_v49 = vmul.f32 -1.442695, %v5457_v10  ;;  %v5463_v34 = vadd.f32 %v3902_v48, %v1716_v23  ;;  %v1882_v60 = vpop.f32.mrb[43].mxu0  ;;  %v1771_v23 = vpop.permute.xlu1 %1770 }
 0x638   :  { %v3456_v7 = vmul.f32 -1.442695, %v5460_v46  ;;  %v5466_v18 = vadd.f32 %v1882_v60, %v1706_v55 }
 0x639   :  { %4343 = vpow2.f32 %v3458_v49  ;;  %v3459_v56 = vmul.f32 -1.442695, %v5463_v34 }
 0x63a   :  { %4345 = vpow2.f32 %v3456_v7  ;;  %v3457_v24 = vmul.f32 -1.442695, %v5466_v18  ;;  %v1776_v58 = vpop.permute.xlu0 %1775 }
 0x63b   :  { %4347 = vpow2.f32 %v3459_v56 }
 0x63c   :  { %4349 = vpow2.f32 %v3457_v24  ;;  %v3905_v0 = vpop.f32.mrb[44].mxu0 }
 0x63d   :  { %v5470_v54 = vadd.f32 %v3905_v0, %v1731_v32  ;;  %v1895_v47 = vpop.f32.mrb[45].mxu0 }
 0x63e   :  { %v5472_v61 = vadd.f32 %v1895_v47, %v1721_v51  ;;  %v3906_v12 = vpop.f32.mrb[46].mxu0 }
 0x63f   :  { %v3462_v29 = vmul.f32 -1.442695, %v5470_v54  ;;  %v5475_v41 = vadd.f32 %v3906_v12, %v1736_v33  ;;  %v1898_v9 = vpop.f32.mrb[47].mxu0 }
 0x640   :  { %v3460_v3 = vmul.f32 -1.442695, %v5472_v61  ;;  %v5478_v38 = vadd.f32 %v1898_v9, %v1726_v27 }
 0x641   :  { %4351 = vpow2.f32 %v3462_v29  ;;  %v3463_v30 = vmul.f32 -1.442695, %v5475_v41 }
 0x642   :  { %4353 = vpow2.f32 %v3460_v3  ;;  %v3461_v6 = vmul.f32 -1.442695, %v5478_v38 }
 0x643   :  { %v4344_v62 = vpop.eup %4343  ;;  %4355 = vpow2.f32 %v3463_v30 }
 0x644   :  { %v4346_v57 = vpop.eup %4345  ;;  %v1992_v52 = vadd.f32 1.0, %v4344_v62  ;;  %4357 = vpow2.f32 %v3461_v6  ;;  %v3909_v59 = vpop.f32.mrb[48].mxu0 }
 0x645   :  { %v4348_v50 = vpop.eup %4347  ;;  %v1990_v37 = vadd.f32 1.0, %v4346_v57  ;;  %v5482_v44 = vadd.f32 %v3909_v59, %v1751_v20  ;;  %v1911_v45 = vpop.f32.mrb[49].mxu0 }
 0x646   :  { %v4350_v2 = vpop.eup %4349  ;;  %4359 = vrcp.f32 %v1992_v52  ;;  %v1993_v36 = vadd.f32 1.0, %v4348_v50  ;;  %v5485_v21 = vadd.f32 %v1911_v45, %v5447_v43  ;;  %v3910_v25 = vpop.f32.mrb[50].mxu0 }
 0x647   :  { %4361 = vrcp.f32 %v1990_v37  ;;  %v1991_v16 = vadd.f32 1.0, %v4350_v2  ;;  %v3466_v26 = vmul.f32 -1.442695, %v5482_v44  ;;  %v5488_v19 = vadd.f32 %v3910_v25, %v1756_v53  ;;  %v1914_v8 = vpop.f32.mrb[51].mxu0 }
 0x648   :  { %4363 = vrcp.f32 %v1993_v36  ;;  %v3464_v63 = vmul.f32 -1.442695, %v5485_v21  ;;  %v5491_v51 = vadd.f32 %v1914_v8, %v1746_v15 }
 0x649   :  { %4365 = vrcp.f32 %v1991_v16  ;;  %v3467_v32 = vmul.f32 -1.442695, %v5488_v19 }
 0x64a   :  { %4367 = vpow2.f32 %v3466_v26  ;;  %v3465_v43 = vmul.f32 -1.442695, %v5491_v51 }
 0x64b   :  { %v4352_v55 = vpop.eup %4351  ;;  %4369 = vpow2.f32 %v3464_v63 }
 0x64c   :  { %v4354_v20 = vpop.eup %4353  ;;  %v1996_v5 = vadd.f32 1.0, %v4352_v55  ;;  %4371 = vpow2.f32 %v3467_v32  ;;  %v3913_v11 = vpop.f32.mrb[52].mxu0 }
 0x64d   :  { %v4356_v22 = vpop.eup %4355  ;;  %v1994_v17 = vadd.f32 1.0, %v4354_v20  ;;  %4373 = vpow2.f32 %v3465_v43  ;;  %v5495_v27 = vadd.f32 %v3913_v11, %v1771_v23  ;;  %v1927_v1 = vpop.f32.mrb[53].mxu0 }
 0x64e   :  { %v4358_v28 = vpop.eup %4357  ;;  %4375 = vrcp.f32 %v1996_v5  ;;  %v1997_v40 = vadd.f32 1.0, %v4356_v22  ;;  %v5497_v35 = vadd.f32 %v1927_v1, %v1761_v4  ;;  %v3914_v31 = vpop.f32.mrb[54].mxu0 }
 0x64f   :  { %4377 = vrcp.f32 %v1994_v17  ;;  %v1995_v33 = vadd.f32 1.0, %v4358_v28  ;;  %v3470_v39 = vmul.f32 -1.442695, %v5495_v27  ;;  %v5500_v42 = vadd.f32 %v3914_v31, %v1776_v58  ;;  %v1930_v48 = vpop.f32.mrb[55].mxu0 }
 0x650   :  { %v4360_v49 = vpop.eup %4359  ;;  %4379 = vrcp.f32 %v1997_v40  ;;  %v3468_v60 = vmul.f32 -1.442695, %v5497_v35  ;;  %v5503_v7 = vadd.f32 %v1930_v48, %v1766_v13 }
 0x651   :  { %v4362_v56 = vpop.eup %4361  ;;  %4381 = vrcp.f32 %v1995_v33  ;;  %v3471_v15 = vmul.f32 -1.442695, %v5500_v42  ;;  %v2040_v12 = vmul.f32 %v4360_v49, %v5457_v10  ;;  %v4080_v49 = vld [vmem:[%s5774_s3 + $0x48] sm:$0xff]  }
 0x652   :  { %v4364_v24 = vpop.eup %4363  ;;  %4383 = vpow2.f32 %v3470_v39  ;;  %v3469_v0 = vmul.f32 -1.442695, %v5503_v7  ;;  %v2038_v53 = vmul.f32 %v4362_v56, %v5460_v46  ;;  %v4086_v56 = vld [vmem:[%s5774_s3 + $0x78] sm:$0xff]  }
 0x653   :  { %v4366_v47 = vpop.eup %4365  ;;  %v2041_v29 = vmul.f32 %v4364_v24, %v5463_v34  ;;  %4385 = vpow2.f32 %v3468_v60  ;;  %v4084_v60 = vld [vmem:[%s5774_s3 + $0x68] sm:$0xff]  }
 0x654   :  { %v4368_v9 = vpop.eup %4367  ;;  %v2039_v3 = vmul.f32 %v4366_v47, %v5466_v18  ;;  %4387 = vpow2.f32 %v3471_v15 }
 0x655   :  { %v4370_v30 = vpop.eup %4369  ;;  %v2000_v6 = vadd.f32 1.0, %v4368_v9  ;;  %4389 = vpow2.f32 %v3469_v0  ;;  %v2055_v62 = vpack.c.bf16 %v2041_v29, %v2040_v12  ;;  %v4087_v12 = vld [vmem:[%s5775_s5 + $0x40] sm:$0xff]   ;;  %v2099_v29 = vpop.permute.xlu1 %2098 }
 0x656   :  { %v4372_v57 = vpop.eup %4371  ;;  %v1998_v52 = vadd.f32 1.0, %v4370_v30  ;;  %v2054_v59 = vpack.c.bf16 %v2039_v3, %v2038_v53  ;;  %3963 = vmatprep.mubr.bf16.mxu0 %v4087_v12  ;;  %v2104_v9 = vpop.permute.xlu0 %2103 }
 0x657   :  { %v4374_v50 = vpop.eup %4373  ;;  %4391 = vrcp.f32 %v2000_v6  ;;  %v2001_v37 = vadd.f32 1.0, %v4372_v57 }
 0x658   :  { %v4376_v10 = vpop.eup %4375  ;;  %4393 = vrcp.f32 %v1998_v52  ;;  %v1999_v34 = vadd.f32 1.0, %v4374_v50  ;;  %3915 = vmatprep.subr.bf16.mxu1 %v2054_v59 }
 0x659   :  { %v4378_v45 = vpop.eup %4377  ;;  %4395 = vrcp.f32 %v2001_v37  ;;  %3916 = vmatpush3.bf16.msra.mxu1 %v2054_v59  ;;  %v2044_v2 = vmul.f32 %v4376_v10, %v5470_v54  ;;  %v2109_v53 = vpop.permute.xlu1 %2108 }
 0x65a   :  { %v4380_v46 = vpop.eup %4379  ;;  %4397 = vrcp.f32 %v1999_v34  ;;  %3917 = vmatprep.subr.bf16.mxu1 %v2055_v62  ;;  %v2042_v25 = vmul.f32 %v4378_v45, %v5472_v61  ;;  %v2114_v3 = vpop.permute.xlu0 %2113 }
 0x65b   :  { %v4382_v18 = vpop.eup %4381  ;;  %v2045_v4 = vmul.f32 %v4380_v46, %v5475_v41 }
 0x65c   :  { %v4384_v36 = vpop.eup %4383  ;;  %v2043_v16 = vmul.f32 %v4382_v18, %v5478_v38 }
 0x65d   :  { %v4386_v26 = vpop.eup %4385  ;;  %v2004_v8 = vadd.f32 1.0, %v4384_v36  ;;  %3918 = vmatpush3.bf16.msra.mxu1 %v2055_v62  ;;  %v2057_v13 = vpack.c.bf16 %v2045_v4, %v2044_v2  ;;  %v2119_v30 = vpop.permute.xlu1 %2118 }
 0x65e   :  { %v4388_v63 = vpop.eup %4387  ;;  %v2002_v32 = vadd.f32 1.0, %v4386_v26  ;;  %v2056_v43 = vpack.c.bf16 %v2043_v16, %v2042_v25  ;;  %v2124_v6 = vpop.permute.xlu0 %2123 }
 0x65f   :  { %v4390_v55 = vpop.eup %4389  ;;  %4399 = vrcp.f32 %v2004_v8  ;;  %v2005_v20 = vadd.f32 1.0, %v4388_v63 }
 0x660   :  { %4401 = vrcp.f32 %v2002_v32  ;;  %v2003_v23 = vadd.f32 1.0, %v4390_v55  ;;  %3919 = vmatprep.subr.bf16.mxu1 %v2056_v43 }
 0x661   :  { %v4392_v54 = vpop.eup %4391  ;;  %4403 = vrcp.f32 %v2005_v20  ;;  %3920 = vmatpush3.bf16.msra.mxu1 %v2056_v43  ;;  %v2129_v62 = vpop.permute.xlu1 %2128 }
 0x662   :  { %v4394_v41 = vpop.eup %4393  ;;  %4405 = vrcp.f32 %v2003_v23  ;;  %3921 = vmatprep.subr.bf16.mxu1 %v2057_v13  ;;  %v2048_v5 = vmul.f32 %v4392_v54, %v5482_v44  ;;  %v2134_v50 = vpop.permute.xlu0 %2133 }
 0x663   :  { %v4396_v61 = vpop.eup %4395  ;;  %v2046_v22 = vmul.f32 %v4394_v41, %v5485_v21 }
 0x664   :  { %v4398_v38 = vpop.eup %4397  ;;  %v2049_v11 = vmul.f32 %v4396_v61, %v5488_v19 }
 0x665   :  { %v2047_v17 = vmul.f32 %v4398_v38, %v5491_v51  ;;  %3922 = vmatpush3.bf16.msra.mxu1 %v2057_v13  ;;  %v2139_v36 = vpop.permute.xlu1 %2138 }
 0x666   :  { %v2059_v1 = vpack.c.bf16 %v2049_v11, %v2048_v5  ;;  %v2144_v16 = vpop.permute.xlu0 %2143 }
 0x667   :  { %v2058_v28 = vpack.c.bf16 %v2047_v17, %v2046_v22 }
 0x669   :  { %v4400_v58 = vpop.eup %4399  ;;  %3923 = vmatprep.subr.bf16.mxu1 %v2058_v28  ;;  %v2149_v23 = vpop.permute.xlu1 %2148 }
 0x66a   :  { %v4402_v40 = vpop.eup %4401  ;;  %3924 = vmatpush3.bf16.msra.mxu1 %v2058_v28  ;;  %v2052_v39 = vmul.f32 %v4400_v58, %v5495_v27  ;;  %v4081_v27 = vld [vmem:[%s5774_s3 + $0x50] sm:$0xff]   ;;  %v2154_v38 = vpop.permute.xlu0 %2153 }
 0x66b   :  { %v4404_v31 = vpop.eup %4403  ;;  %3925 = vmatprep.subr.bf16.mxu1 %v2059_v1  ;;  %v2050_v19 = vmul.f32 %v4402_v40, %v5497_v35  ;;  %v4082_v35 = vld [vmem:[%s5774_s3 + $0x58] sm:$0xff]  }
 0x66c   :  { %v4406_v33 = vpop.eup %4405  ;;  %v2053_v44 = vmul.f32 %v4404_v31, %v5500_v42  ;;  %v4083_v42 = vld [vmem:[%s5774_s3 + $0x60] sm:$0xff]  }
 0x66d   :  { %v2051_v21 = vmul.f32 %v4406_v33, %v5503_v7  ;;  %v4085_v7 = vld [vmem:[%s5774_s3 + $0x70] sm:$0xff]  }
 0x66e   :  { %3926 = vmatpush3.bf16.msra.mxu1 %v2059_v1  ;;  %v2061_v51 = vpack.c.bf16 %v2053_v44, %v2052_v39  ;;  %v2159_v39 = vpop.permute.xlu1 %2158 }
 0x66f   :  { %v2060_v48 = vpack.c.bf16 %v2051_v21, %v2050_v19 }
 0x671   :  { %3927 = vmatprep.subr.bf16.mxu1 %v2060_v48 }
 0x672   :  { %3928 = vmatpush3.bf16.msra.mxu1 %v2060_v48 }
 0x673   :  { %3929 = vmatprep.subr.bf16.mxu1 %v2061_v51 }
 0x676   :  { %3930 = vmatpush3.bf16.msra.mxu1 %v2061_v51 }
 0x679   :  { %3932 = vmatmul.mubr.bf16.vlgmr.msra.gmra.mrb[28].mxu1 %v4080_v49 }
 0x67a   :  { %3935 = vmatprep.mubr.bf16.mxu1 %v4081_v27 }
 0x681   :  { %3936 = vmatmul.mubr.bf16.gmra.mrb[32].mxu1 %v4082_v35  ;;  %v2164_v35 = vpop.permute.xlu0 %2163 }
 0x682   :  { %3939 = vmatprep.mubr.bf16.mxu1 %v4083_v42 }
 0x689   :  { %3940 = vmatmul.mubr.bf16.gmra.mrb[36].mxu1 %v4084_v60 }
 0x68a   :  { %3943 = vmatprep.mubr.bf16.mxu1 %v4085_v7 }
 0x691   :  { %3944 = vmatmul.mubr.bf16.gmra.mrb[40].mxu1 %v4086_v56 }
 0x708   :  { %v3895_v15 = vpop.f32.mrb[24].mxu1 }
 0x709   :  { %1659 = vst.msk [vmem:[%s5780_s14 + $0x10] sm:$0xff] %vm202_vm1, %v3895_v15  ;;  %v1642_v24 = vpop.f32.mrb[25].mxu1 }
 0x70a   :  { %1657 = vst.msk [vmem:[%s5780_s14] sm:$0xff] %vm202_vm1, %v1642_v24  ;;  %v3896_v0 = vpop.f32.mrb[26].mxu1 }
 0x70b   :  { %1660 = vst.msk [vmem:[%s5780_s14 + $0x18] sm:$0xff] %vm202_vm1, %v3896_v0  ;;  %v1645_v47 = vpop.f32.mrb[27].mxu1  ;;  %v2169_v0 = vpop.permute.xlu1 %2168 }
 0x70c   :  { %1658 = vst.msk [vmem:[%s5780_s14 + $0x8] sm:$0xff] %vm202_vm1, %v1645_v47 }
 0x74c   :  { %v3933_v57 = vpop.f32.mrb[28].mxu1 }
 0x74d   :  { %v5563_v52 = vadd.f32 %v3933_v57, %v2109_v53  ;;  %v2258_v59 = vpop.f32.mrb[29].mxu1 }
 0x74e   :  { %v5565_v37 = vadd.f32 %v2258_v59, %v2099_v29  ;;  %v3934_v10 = vpop.f32.mrb[30].mxu1 }
 0x74f   :  { %v3514_v34 = vmul.f32 -1.442695, %v5563_v52  ;;  %v5568_v45 = vadd.f32 %v3934_v10, %v2114_v3  ;;  %v2261_v46 = vpop.f32.mrb[31].mxu1 }
 0x750   :  { %v3512_v18 = vmul.f32 -1.442695, %v5565_v37  ;;  %v5571_v2 = vadd.f32 %v2261_v46, %v2104_v9 }
 0x751   :  { %4407 = vpow2.f32 %v3514_v34  ;;  %v3515_v4 = vmul.f32 -1.442695, %v5568_v45 }
 0x752   :  { %4409 = vpow2.f32 %v3512_v18  ;;  %v3513_v25 = vmul.f32 -1.442695, %v5571_v2 }
 0x753   :  { %4411 = vpow2.f32 %v3515_v4 }
 0x754   :  { %4413 = vpow2.f32 %v3513_v25  ;;  %v3937_v26 = vpop.f32.mrb[32].mxu1 }
 0x755   :  { %v5575_v8 = vadd.f32 %v3937_v26, %v2129_v62  ;;  %v2274_v13 = vpop.f32.mrb[33].mxu1 }
 0x756   :  { %v5577_v63 = vadd.f32 %v2274_v13, %v2119_v30  ;;  %v3938_v32 = vpop.f32.mrb[34].mxu1 }
 0x757   :  { %v3518_v43 = vmul.f32 -1.442695, %v5575_v8  ;;  %v5580_v55 = vadd.f32 %v3938_v32, %v2134_v50  ;;  %v2277_v20 = vpop.f32.mrb[35].mxu1 }
 0x758   :  { %v3516_v54 = vmul.f32 -1.442695, %v5577_v63  ;;  %v5583_v41 = vadd.f32 %v2277_v20, %v2124_v6  ;;  %v2174_v6 = vpop.permute.xlu0 %2173 }
 0x759   :  { %4415 = vpow2.f32 %v3518_v43  ;;  %v3519_v61 = vmul.f32 -1.442695, %v5580_v55 }
 0x75a   :  { %4417 = vpow2.f32 %v3516_v54  ;;  %v3517_v5 = vmul.f32 -1.442695, %v5583_v41 }
 0x75b   :  { %v4408_v11 = vpop.eup %4407  ;;  %4419 = vpow2.f32 %v3519_v61 }
 0x75c   :  { %v4410_v22 = vpop.eup %4409  ;;  %v2371_v17 = vadd.f32 1.0, %v4408_v11  ;;  %4421 = vpow2.f32 %v3517_v5  ;;  %v3941_v1 = vpop.f32.mrb[36].mxu1 }
 0x75d   :  { %v4412_v28 = vpop.eup %4411  ;;  %v2369_v58 = vadd.f32 1.0, %v4410_v22  ;;  %v5587_v40 = vadd.f32 %v3941_v1, %v2149_v23  ;;  %v2290_v31 = vpop.f32.mrb[37].mxu1 }
 0x75e   :  { %v4414_v33 = vpop.eup %4413  ;;  %4423 = vrcp.f32 %v2371_v17  ;;  %v2372_v44 = vadd.f32 1.0, %v4412_v28  ;;  %v5589_v19 = vadd.f32 %v2290_v31, %v2139_v36  ;;  %v3942_v21 = vpop.f32.mrb[38].mxu1 }
 0x75f   :  { %4425 = vrcp.f32 %v2369_v58  ;;  %v2370_v51 = vadd.f32 1.0, %v4414_v33  ;;  %v3522_v48 = vmul.f32 -1.442695, %v5587_v40  ;;  %v5592_v49 = vadd.f32 %v3942_v21, %v2154_v38  ;;  %v2293_v27 = vpop.f32.mrb[39].mxu1 }
 0x760   :  { %4427 = vrcp.f32 %v2372_v44  ;;  %v3520_v42 = vmul.f32 -1.442695, %v5589_v19  ;;  %v5595_v60 = vadd.f32 %v2293_v27, %v2144_v16 }
 0x761   :  { %4429 = vrcp.f32 %v2370_v51  ;;  %v3523_v7 = vmul.f32 -1.442695, %v5592_v49 }
 0x762   :  { %4431 = vpow2.f32 %v3522_v48  ;;  %v3521_v56 = vmul.f32 -1.442695, %v5595_v60 }
 0x763   :  { %v4416_v15 = vpop.eup %4415  ;;  %4433 = vpow2.f32 %v3520_v42 }
 0x764   :  { %v4418_v24 = vpop.eup %4417  ;;  %v2375_v47 = vadd.f32 1.0, %v4416_v15  ;;  %4435 = vpow2.f32 %v3523_v7  ;;  %v3945_v12 = vpop.f32.mrb[40].mxu1 }
 0x765   :  { %v4420_v29 = vpop.eup %4419  ;;  %v2373_v9 = vadd.f32 1.0, %v4418_v24  ;;  %4437 = vpow2.f32 %v3521_v56  ;;  %v5599_v53 = vadd.f32 %v3945_v12, %v2169_v0  ;;  %v2306_v3 = vpop.f32.mrb[41].mxu1 }
 0x766   :  { %v4422_v30 = vpop.eup %4421  ;;  %4439 = vrcp.f32 %v2375_v47  ;;  %v2376_v62 = vadd.f32 1.0, %v4420_v29  ;;  %v5601_v57 = vadd.f32 %v2306_v3, %v2159_v39  ;;  %v3946_v59 = vpop.f32.mrb[42].mxu1 }
 0x767   :  { %4441 = vrcp.f32 %v2373_v9  ;;  %v2374_v50 = vadd.f32 1.0, %v4422_v30  ;;  %v3526_v10 = vmul.f32 -1.442695, %v5599_v53  ;;  %v5604_v34 = vadd.f32 %v3946_v59, %v2174_v6  ;;  %v2309_v46 = vpop.f32.mrb[43].mxu1 }
 0x768   :  { %v4424_v18 = vpop.eup %4423  ;;  %4443 = vrcp.f32 %v2376_v62  ;;  %v3524_v4 = vmul.f32 -1.442695, %v5601_v57  ;;  %v5607_v36 = vadd.f32 %v2309_v46, %v2164_v35 }
 0x769   :  { %v4426_v25 = vpop.eup %4425  ;;  %4445 = vrcp.f32 %v2374_v50  ;;  %v3527_v16 = vmul.f32 -1.442695, %v5604_v34  ;;  %v2419_v43 = vmul.f32 %v4424_v18, %v5563_v52  ;;  %v4088_v18 = vld [vmem:[%s5775_s5 + $0x48] sm:$0xff]  }
 0x76a   :  { %v4428_v26 = vpop.eup %4427  ;;  %4447 = vpow2.f32 %v3526_v10  ;;  %v3525_v13 = vmul.f32 -1.442695, %v5607_v36  ;;  %v2417_v54 = vmul.f32 %v4426_v25, %v5565_v37  ;;  %v4094_v25 = vld [vmem:[%s5775_s5 + $0x78] sm:$0xff]  }
 0x76b   :  { %v4430_v32 = vpop.eup %4429  ;;  %v2420_v20 = vmul.f32 %v4428_v26, %v5568_v45  ;;  %4449 = vpow2.f32 %v3524_v4  ;;  %v4092_v4 = vld [vmem:[%s5775_s5 + $0x68] sm:$0xff]   ;;  %v2478_v26 = vpop.permute.xlu1 %2477 }
 0x76c   :  { %v4432_v23 = vpop.eup %4431  ;;  %v2418_v61 = vmul.f32 %v4430_v32, %v5571_v2  ;;  %4451 = vpow2.f32 %v3527_v16  ;;  %v4095_v16 = vld [vmem:[%s5776_s7 + $0x20] sm:$0xff]  }
 0x76d   :  { %v4434_v38 = vpop.eup %4433  ;;  %v2379_v5 = vadd.f32 1.0, %v4432_v23  ;;  %4453 = vpow2.f32 %v3525_v13  ;;  %v2434_v11 = vpack.c.bf16 %v2420_v20, %v2419_v43  ;;  %3995 = vmatprep.mubr.bf16.mxu1 %v4095_v16  ;;  %v2483_v13 = vpop.permute.xlu0 %2482 }
 0x76e   :  { %v4436_v22 = vpop.eup %4435  ;;  %v2377_v17 = vadd.f32 1.0, %v4434_v38  ;;  %v2433_v1 = vpack.c.bf16 %v2418_v61, %v2417_v54 }
 0x76f   :  { %v4438_v28 = vpop.eup %4437  ;;  %4455 = vrcp.f32 %v2379_v5  ;;  %v2380_v58 = vadd.f32 1.0, %v4436_v22  ;;  %v2488_v32 = vpop.permute.xlu1 %2487 }
 0x770   :  { %v4440_v52 = vpop.eup %4439  ;;  %4457 = vrcp.f32 %v2377_v17  ;;  %v2378_v45 = vadd.f32 1.0, %v4438_v28  ;;  %3947 = vmatprep.subr.bf16.mxu0 %v2433_v1 }
 0x771   :  { %v4442_v31 = vpop.eup %4441  ;;  %4459 = vrcp.f32 %v2380_v58  ;;  %3948 = vmatpush3.bf16.msra.mxu0 %v2433_v1  ;;  %v2423_v33 = vmul.f32 %v4440_v52, %v5575_v8  ;;  %v2493_v43 = vpop.permute.xlu0 %2492 }
 0x772   :  { %v4444_v37 = vpop.eup %4443  ;;  %4461 = vrcp.f32 %v2378_v45  ;;  %3949 = vmatprep.subr.bf16.mxu0 %v2434_v11  ;;  %v2421_v21 = vmul.f32 %v4442_v31, %v5577_v63 }
 0x773   :  { %v4446_v2 = vpop.eup %4445  ;;  %v2424_v39 = vmul.f32 %v4444_v37, %v5580_v55  ;;  %v2498_v20 = vpop.permute.xlu1 %2497 }
 0x774   :  { %v4448_v44 = vpop.eup %4447  ;;  %v2422_v51 = vmul.f32 %v4446_v2, %v5583_v41 }
 0x775   :  { %v4450_v48 = vpop.eup %4449  ;;  %v2383_v27 = vadd.f32 1.0, %v4448_v44  ;;  %3950 = vmatpush3.bf16.msra.mxu0 %v2434_v11  ;;  %v2436_v35 = vpack.c.bf16 %v2424_v39, %v2423_v33  ;;  %v2503_v23 = vpop.permute.xlu0 %2502 }
 0x776   :  { %v4452_v42 = vpop.eup %4451  ;;  %v2381_v7 = vadd.f32 1.0, %v4450_v48  ;;  %v2435_v56 = vpack.c.bf16 %v2422_v51, %v2421_v21 }
 0x777   :  { %v4454_v15 = vpop.eup %4453  ;;  %4463 = vrcp.f32 %v2383_v27  ;;  %v2384_v24 = vadd.f32 1.0, %v4452_v42  ;;  %v2508_v54 = vpop.permute.xlu1 %2507 }
 0x778   :  { %4465 = vrcp.f32 %v2381_v7  ;;  %v2382_v0 = vadd.f32 1.0, %v4454_v15  ;;  %3951 = vmatprep.subr.bf16.mxu0 %v2435_v56 }
 0x779   :  { %v4456_v8 = vpop.eup %4455  ;;  %4467 = vrcp.f32 %v2384_v24  ;;  %3952 = vmatpush3.bf16.msra.mxu0 %v2435_v56  ;;  %v2513_v11 = vpop.permute.xlu0 %2512 }
 0x77a   :  { %v4458_v55 = vpop.eup %4457  ;;  %4469 = vrcp.f32 %v2382_v0  ;;  %3953 = vmatprep.subr.bf16.mxu0 %v2436_v35  ;;  %v2427_v47 = vmul.f32 %v4456_v8, %v5587_v40 }
 0x77b   :  { %v4460_v63 = vpop.eup %4459  ;;  %v2425_v29 = vmul.f32 %v4458_v55, %v5589_v19  ;;  %v2518_v37 = vpop.permute.xlu1 %2517 }
 0x77c   :  { %v4462_v41 = vpop.eup %4461  ;;  %v2428_v12 = vmul.f32 %v4460_v63, %v5592_v49 }
 0x77d   :  { %v2426_v9 = vmul.f32 %v4462_v41, %v5595_v60  ;;  %3954 = vmatpush3.bf16.msra.mxu0 %v2436_v35  ;;  %v2523_v33 = vpop.permute.xlu0 %2522 }
 0x77e   :  { %v2438_v3 = vpack.c.bf16 %v2428_v12, %v2427_v47 }
 0x77f   :  { %v2437_v30 = vpack.c.bf16 %v2426_v9, %v2425_v29  ;;  %v2528_v7 = vpop.permute.xlu1 %2527 }
 0x781   :  { %v4464_v6 = vpop.eup %4463  ;;  %3955 = vmatprep.subr.bf16.mxu0 %v2437_v30  ;;  %v2533_v0 = vpop.permute.xlu0 %2532 }
 0x782   :  { %v4466_v62 = vpop.eup %4465  ;;  %3956 = vmatpush3.bf16.msra.mxu0 %v2437_v30  ;;  %v2431_v10 = vmul.f32 %v4464_v6, %v5599_v53  ;;  %v4089_v53 = vld [vmem:[%s5775_s5 + $0x50] sm:$0xff]  }
 0x783   :  { %v4468_v59 = vpop.eup %4467  ;;  %3957 = vmatprep.subr.bf16.mxu0 %v2438_v3  ;;  %v2429_v49 = vmul.f32 %v4466_v62, %v5601_v57  ;;  %v4090_v57 = vld [vmem:[%s5775_s5 + $0x58] sm:$0xff]   ;;  %v2538_v6 = vpop.permute.xlu1 %2537 }
 0x784   :  { %v4470_v50 = vpop.eup %4469  ;;  %v2432_v40 = vmul.f32 %v4468_v59, %v5604_v34  ;;  %v4091_v34 = vld [vmem:[%s5775_s5 + $0x60] sm:$0xff]  }
 0x785   :  { %v2430_v19 = vmul.f32 %v4470_v50, %v5607_v36  ;;  %v4093_v36 = vld [vmem:[%s5775_s5 + $0x70] sm:$0xff]  }
 0x786   :  { %3958 = vmatpush3.bf16.msra.mxu0 %v2438_v3  ;;  %v2440_v60 = vpack.c.bf16 %v2432_v40, %v2431_v10 }
 0x787   :  { %v2439_v46 = vpack.c.bf16 %v2430_v19, %v2429_v49 }
 0x789   :  { %3959 = vmatprep.subr.bf16.mxu0 %v2439_v46 }
 0x78a   :  { %3960 = vmatpush3.bf16.msra.mxu0 %v2439_v46 }
 0x78b   :  { %3961 = vmatprep.subr.bf16.mxu0 %v2440_v60 }
 0x78e   :  { %3962 = vmatpush3.bf16.msra.mxu0 %v2440_v60  ;;  %v2543_v60 = vpop.permute.xlu0 %2542 }
 0x791   :  { %3964 = vmatmul.mubr.bf16.vlgmr.msra.gmra.mrb[56].mxu0 %v4088_v18 }
 0x792   :  { %3967 = vmatprep.mubr.bf16.mxu0 %v4089_v53 }
 0x799   :  { %3968 = vmatmul.mubr.bf16.gmra.mrb[60].mxu0 %v4090_v57 }
 0x79a   :  { %3971 = vmatprep.mubr.bf16.mxu0 %v4091_v34 }
 0x7a1   :  { %3972 = vmatmul.mubr.bf16.gmra.mrb[64].mxu0 %v4092_v4 }
 0x7a2   :  { %3975 = vmatprep.mubr.bf16.mxu0 %v4093_v36  ;;  %v2548_v36 = vpop.permute.xlu1 %2547 }
 0x7a9   :  { %3976 = vmatmul.mubr.bf16.gmra.mrb[68].mxu0 %v4094_v25 }
 0x864   :  { %v3965_v61 = vpop.f32.mrb[56].mxu0 }
 0x865   :  { %v5651_v38 = vadd.f32 %v3965_v61, %v2488_v32  ;;  %v2637_v5 = vpop.f32.mrb[57].mxu0 }
 0x866   :  { %v5653_v22 = vadd.f32 %v2637_v5, %v2478_v26  ;;  %v3966_v17 = vpop.f32.mrb[58].mxu0 }
 0x867   :  { %v3570_v1 = vmul.f32 -1.442695, %v5651_v38  ;;  %v5656_v28 = vadd.f32 %v3966_v17, %v2493_v43  ;;  %v2640_v58 = vpop.f32.mrb[59].mxu0 }
 0x868   :  { %v3568_v52 = vmul.f32 -1.442695, %v5653_v22  ;;  %v5659_v45 = vadd.f32 %v2640_v58, %v2483_v13 }
 0x869   :  { %4471 = vpow2.f32 %v3570_v1  ;;  %v3571_v31 = vmul.f32 -1.442695, %v5656_v28 }
 0x86a   :  { %4473 = vpow2.f32 %v3568_v52  ;;  %v3569_v2 = vmul.f32 -1.442695, %v5659_v45 }
 0x86b   :  { %4475 = vpow2.f32 %v3571_v31 }
 0x86c   :  { %4477 = vpow2.f32 %v3569_v2  ;;  %v3969_v39 = vpop.f32.mrb[60].mxu0 }
 0x86d   :  { %v5663_v44 = vadd.f32 %v3969_v39, %v2508_v54  ;;  %v2653_v21 = vpop.f32.mrb[61].mxu0 }
 0x86e   :  { %v5665_v51 = vadd.f32 %v2653_v21, %v2498_v20  ;;  %v3970_v48 = vpop.f32.mrb[62].mxu0 }
 0x86f   :  { %v3574_v27 = vmul.f32 -1.442695, %v5663_v44  ;;  %v5668_v35 = vadd.f32 %v3970_v48, %v2513_v11  ;;  %v2656_v42 = vpop.f32.mrb[63].mxu0 }
 0x870   :  { %v3572_v56 = vmul.f32 -1.442695, %v5665_v51  ;;  %v5671_v15 = vadd.f32 %v2656_v42, %v2503_v23  ;;  %v2553_v23 = vpop.permute.xlu0 %2552 }
 0x871   :  { %4479 = vpow2.f32 %v3574_v27  ;;  %v3575_v24 = vmul.f32 -1.442695, %v5668_v35 }
 0x872   :  { %4481 = vpow2.f32 %v3572_v56  ;;  %v3573_v8 = vmul.f32 -1.442695, %v5671_v15 }
 0x873   :  { %v4472_v55 = vpop.eup %4471  ;;  %4483 = vpow2.f32 %v3575_v24 }
 0x874   :  { %v4474_v63 = vpop.eup %4473  ;;  %v2750_v41 = vadd.f32 1.0, %v4472_v55  ;;  %4485 = vpow2.f32 %v3573_v8  ;;  %v3973_v47 = vpop.f32.mrb[64].mxu0 }
 0x875   :  { %v4476_v12 = vpop.eup %4475  ;;  %v2748_v29 = vadd.f32 1.0, %v4474_v63  ;;  %v5675_v9 = vadd.f32 %v3973_v47, %v2528_v7  ;;  %v2669_v3 = vpop.f32.mrb[65].mxu0 }
 0x876   :  { %v4478_v30 = vpop.eup %4477  ;;  %4487 = vrcp.f32 %v2750_v41  ;;  %v2751_v62 = vadd.f32 1.0, %v4476_v12  ;;  %v5677_v59 = vadd.f32 %v2669_v3, %v2518_v37  ;;  %v3974_v50 = vpop.f32.mrb[66].mxu0 }
 0x877   :  { %4489 = vrcp.f32 %v2748_v29  ;;  %v2749_v10 = vadd.f32 1.0, %v4478_v30  ;;  %v3578_v40 = vmul.f32 -1.442695, %v5675_v9  ;;  %v5680_v49 = vadd.f32 %v3974_v50, %v2533_v0  ;;  %v2672_v19 = vpop.f32.mrb[67].mxu0 }
 0x878   :  { %4491 = vrcp.f32 %v2751_v62  ;;  %v3576_v46 = vmul.f32 -1.442695, %v5677_v59  ;;  %v5683_v18 = vadd.f32 %v2672_v19, %v2523_v33 }
 0x879   :  { %4493 = vrcp.f32 %v2749_v10  ;;  %v3579_v53 = vmul.f32 -1.442695, %v5680_v49 }
 0x87a   :  { %4495 = vpow2.f32 %v3578_v40  ;;  %v3577_v57 = vmul.f32 -1.442695, %v5683_v18 }
 0x87b   :  { %v4480_v34 = vpop.eup %4479  ;;  %4497 = vpow2.f32 %v3576_v46 }
 0x87c   :  { %v4482_v4 = vpop.eup %4481  ;;  %v2754_v25 = vadd.f32 1.0, %v4480_v34  ;;  %4499 = vpow2.f32 %v3579_v53  ;;  %v3977_v16 = vpop.f32.mrb[68].mxu0 }
 0x87d   :  { %v4484_v26 = vpop.eup %4483  ;;  %v2752_v13 = vadd.f32 1.0, %v4482_v4  ;;  %4501 = vpow2.f32 %v3577_v57  ;;  %v5687_v32 = vadd.f32 %v3977_v16, %v2548_v36  ;;  %v2685_v43 = vpop.f32.mrb[69].mxu0 }
 0x87e   :  { %v4486_v20 = vpop.eup %4485  ;;  %4503 = vrcp.f32 %v2754_v25  ;;  %v2755_v54 = vadd.f32 1.0, %v4484_v26  ;;  %v5689_v61 = vadd.f32 %v2685_v43, %v2538_v6  ;;  %v3978_v5 = vpop.f32.mrb[70].mxu0 }
 0x87f   :  { %4505 = vrcp.f32 %v2752_v13  ;;  %v2753_v11 = vadd.f32 1.0, %v4486_v20  ;;  %v3582_v17 = vmul.f32 -1.442695, %v5687_v32  ;;  %v5692_v1 = vadd.f32 %v3978_v5, %v2553_v23  ;;  %v2688_v58 = vpop.f32.mrb[71].mxu0 }
 0x880   :  { %v4488_v52 = vpop.eup %4487  ;;  %4507 = vrcp.f32 %v2755_v54  ;;  %v3580_v31 = vmul.f32 -1.442695, %v5689_v61  ;;  %v5695_v37 = vadd.f32 %v2688_v58, %v2543_v60 }
 0x881   :  { %v4490_v2 = vpop.eup %4489  ;;  %4509 = vrcp.f32 %v2753_v11  ;;  %v3583_v33 = vmul.f32 -1.442695, %v5692_v1  ;;  %v2798_v27 = vmul.f32 %v4488_v52, %v5651_v38  ;;  %v4096_v52 = vld [vmem:[%s5776_s7 + $0x28] sm:$0xff]  }
 0x882   :  { %v4492_v39 = vpop.eup %4491  ;;  %4511 = vpow2.f32 %v3582_v17  ;;  %v3581_v21 = vmul.f32 -1.442695, %v5695_v37  ;;  %v2796_v56 = vmul.f32 %v4490_v2, %v5653_v22 }
 0x883   :  { %v4494_v48 = vpop.eup %4493  ;;  %v2799_v42 = vmul.f32 %v4492_v39, %v5656_v28  ;;  %4513 = vpow2.f32 %v3580_v31  ;;  %v2841_v31 = vpop.permute.xlu1 %2840 }
 0x884   :  { %v4496_v7 = vpop.eup %4495  ;;  %v2797_v24 = vmul.f32 %v4494_v48, %v5659_v45  ;;  %4515 = vpow2.f32 %v3583_v33 }
 0x885   :  { %v4498_v0 = vpop.eup %4497  ;;  %v2758_v8 = vadd.f32 1.0, %v4496_v7  ;;  %4517 = vpow2.f32 %v3581_v21  ;;  %v2813_v55 = vpack.c.bf16 %v2799_v42, %v2798_v27 }
 0x886   :  { %v4500_v63 = vpop.eup %4499  ;;  %v2756_v41 = vadd.f32 1.0, %v4498_v0  ;;  %v2812_v47 = vpack.c.bf16 %v2797_v24, %v2796_v56 }
 0x887   :  { %v4502_v12 = vpop.eup %4501  ;;  %4519 = vrcp.f32 %v2758_v8  ;;  %v2759_v29 = vadd.f32 1.0, %v4500_v63  ;;  %v2851_v2 = vpop.permute.xlu1 %2850 }
 0x888   :  { %v4504_v38 = vpop.eup %4503  ;;  %4521 = vrcp.f32 %v2756_v41  ;;  %v2757_v28 = vadd.f32 1.0, %v4502_v12  ;;  %3979 = vmatprep.subr.bf16.mxu1 %v2812_v47 }
 0x889   :  { %v4506_v3 = vpop.eup %4505  ;;  %4523 = vrcp.f32 %v2759_v29  ;;  %3980 = vmatpush3.bf16.msra.mxu1 %v2812_v47  ;;  %v2802_v30 = vmul.f32 %v4504_v38, %v5663_v44 }
 0x88a   :  { %v4508_v22 = vpop.eup %4507  ;;  %4525 = vrcp.f32 %v2757_v28  ;;  %3981 = vmatprep.subr.bf16.mxu1 %v2813_v55  ;;  %v2800_v50 = vmul.f32 %v4506_v3, %v5665_v51 }
 0x88b   :  { %v4510_v45 = vpop.eup %4509  ;;  %v2803_v6 = vmul.f32 %v4508_v22, %v5668_v35  ;;  %v2861_v27 = vpop.permute.xlu1 %2860 }
 0x88c   :  { %v4512_v62 = vpop.eup %4511  ;;  %v2801_v10 = vmul.f32 %v4510_v45, %v5671_v15 }
 0x88d   :  { %v4514_v40 = vpop.eup %4513  ;;  %v2762_v19 = vadd.f32 1.0, %v4512_v62  ;;  %3982 = vmatpush3.bf16.msra.mxu1 %v2813_v55  ;;  %v2815_v60 = vpack.c.bf16 %v2803_v6, %v2802_v30 }
 0x88e   :  { %v4516_v46 = vpop.eup %4515  ;;  %v2760_v53 = vadd.f32 1.0, %v4514_v40  ;;  %v2814_v57 = vpack.c.bf16 %v2801_v10, %v2800_v50 }
 0x88f   :  { %v4518_v34 = vpop.eup %4517  ;;  %4527 = vrcp.f32 %v2762_v19  ;;  %v2763_v4 = vadd.f32 1.0, %v4516_v46  ;;  %v2871_v12 = vpop.permute.xlu1 %2870 }
 0x890   :  { %4529 = vrcp.f32 %v2760_v53  ;;  %v2761_v36 = vadd.f32 1.0, %v4518_v34  ;;  %3983 = vmatprep.subr.bf16.mxu1 %v2814_v57 }
 0x891   :  { %v4520_v44 = vpop.eup %4519  ;;  %4531 = vrcp.f32 %v2763_v4  ;;  %3984 = vmatpush3.bf16.msra.mxu1 %v2814_v57 }
 0x892   :  { %v4522_v35 = vpop.eup %4521  ;;  %4533 = vrcp.f32 %v2761_v36  ;;  %3985 = vmatprep.subr.bf16.mxu1 %v2815_v60  ;;  %v2806_v25 = vmul.f32 %v4520_v44, %v5675_v9 }
 0x893   :  { %v4524_v51 = vpop.eup %4523  ;;  %v2804_v26 = vmul.f32 %v4522_v35, %v5677_v59 }
 0x894   :  { %v4526_v15 = vpop.eup %4525  ;;  %v2807_v16 = vmul.f32 %v4524_v51, %v5680_v49 }
 0x895   :  { %v2805_v13 = vmul.f32 %v4526_v15, %v5683_v18  ;;  %3986 = vmatpush3.bf16.msra.mxu1 %v2815_v60 }
 0x896   :  { %v2817_v43 = vpack.c.bf16 %v2807_v16, %v2806_v25 }
 0x897   :  { %v2816_v20 = vpack.c.bf16 %v2805_v13, %v2804_v26 }
 0x899   :  { %v4528_v23 = vpop.eup %4527  ;;  %3987 = vmatprep.subr.bf16.mxu1 %v2816_v20 }
 0x89a   :  { %v4530_v54 = vpop.eup %4529  ;;  %3988 = vmatpush3.bf16.msra.mxu1 %v2816_v20  ;;  %v2810_v17 = vmul.f32 %v4528_v23, %v5687_v32  ;;  %v4097_v32 = vld [vmem:[%s5776_s7 + $0x30] sm:$0xff]  }
 0x89b   :  { %v4532_v5 = vpop.eup %4531  ;;  %3989 = vmatprep.subr.bf16.mxu1 %v2817_v43  ;;  %v2808_v49 = vmul.f32 %v4530_v54, %v5689_v61  ;;  %v4098_v61 = vld [vmem:[%s5776_s7 + $0x38] sm:$0xff]  }
 0x89c   :  { %v4534_v11 = vpop.eup %4533  ;;  %v2811_v9 = vmul.f32 %v4532_v5, %v5692_v1  ;;  %v4099_v1 = vld [vmem:[%s5777_s9 + $0x10] sm:$0xff]  }
 0x89d   :  { %v2809_v59 = vmul.f32 %v4534_v11, %v5695_v37  ;;  %4011 = vmatprep.mubr.msk.bf16.mxu0 %vm1445_vm2, %v4099_v1  ;;  %v2846_v37 = vpop.permute.xlu0 %2845 }
 0x89e   :  { %3990 = vmatpush3.bf16.msra.mxu1 %v2817_v43  ;;  %v2819_v18 = vpack.c.bf16 %v2811_v9, %v2810_v17 }
 0x89f   :  { %v2818_v58 = vpack.c.bf16 %v2809_v59, %v2808_v49 }
 0x8a1   :  { %3991 = vmatprep.subr.bf16.mxu1 %v2818_v58  ;;  %v2856_v33 = vpop.permute.xlu0 %2855 }
 0x8a2   :  { %3992 = vmatpush3.bf16.msra.mxu1 %v2818_v58 }
 0x8a3   :  { %3993 = vmatprep.subr.bf16.mxu1 %v2819_v18 }
 0x8a5   :  { %v2866_v8 = vpop.permute.xlu0 %2865 }
 0x8a6   :  { %3994 = vmatpush3.bf16.msra.mxu1 %v2819_v18 }
 0x8a9   :  { %3996 = vmatmul.mubr.bf16.vlgmr.msra.gmra.mrb[44].mxu1 %v4096_v52  ;;  %v2876_v3 = vpop.permute.xlu0 %2875 }
 0x8aa   :  { %3999 = vmatprep.mubr.bf16.mxu1 %v4097_v32 }
 0x8b1   :  { %4000 = vmatmul.mubr.bf16.gmra.mrb[48].mxu1 %v4098_v61 }
 0x97c   :  { %v3997_v39 = vpop.f32.mrb[44].mxu1 }
 0x97d   :  { %v5728_v21 = vadd.f32 %v3997_v39, %v2851_v2  ;;  %v2936_v48 = vpop.f32.mrb[45].mxu1 }
 0x97e   :  { %v2937_v42 = vadd.f32 %v2936_v48, %v2841_v31  ;;  %v3998_v7 = vpop.f32.mrb[46].mxu1  ;;  %v3040_v48 = vpop.permute.xlu1 %3039 }
 0x97f   :  { %v3606_v56 = vmul.f32 -1.442695, %v5728_v21  ;;  %v2948_v24 = vadd.f32 %v3998_v7, %v2856_v33  ;;  %v2939_v0 = vpop.f32.mrb[47].mxu1 }
 0x980   :  { %v3604_v55 = vmul.f32 -1.442695, %v2937_v42  ;;  %v2940_v63 = vadd.f32 %v2939_v0, %v2846_v37 }
 0x981   :  { %4535 = vpow2.f32 %v3606_v56  ;;  %v3607_v41 = vmul.f32 -1.442695, %v2948_v24 }
 0x982   :  { %4537 = vpow2.f32 %v3604_v55  ;;  %v3605_v47 = vmul.f32 -1.442695, %v2940_v63 }
 0x983   :  { %4539 = vpow2.f32 %v3607_v41 }
 0x984   :  { %4541 = vpow2.f32 %v3605_v47  ;;  %v4001_v29 = vpop.f32.mrb[48].mxu1 }
 0x985   :  { %v2961_v38 = vadd.f32 %v4001_v29, %v2871_v12  ;;  %v2952_v28 = vpop.f32.mrb[49].mxu1 }
 0x986   :  { %v2953_v22 = vadd.f32 %v2952_v28, %v2861_v27  ;;  %v4002_v45 = vpop.f32.mrb[50].mxu1  ;;  %v3045_v27 = vpop.permute.xlu0 %3044 }
 0x987   :  { %v3610_v30 = vmul.f32 -1.442695, %v2961_v38  ;;  %v2964_v6 = vadd.f32 %v4002_v45, %v2876_v3  ;;  %v2955_v62 = vpop.f32.mrb[51].mxu1 }
 0x988   :  { %v3608_v50 = vmul.f32 -1.442695, %v2953_v22  ;;  %v2956_v10 = vadd.f32 %v2955_v62, %v2866_v8 }
 0x989   :  { %4543 = vpow2.f32 %v3610_v30  ;;  %v3611_v40 = vmul.f32 -1.442695, %v2964_v6 }
 0x98a   :  { %4545 = vpow2.f32 %v3608_v50  ;;  %v3609_v19 = vmul.f32 -1.442695, %v2956_v10  ;;  %v3055_v0 = vpop.permute.xlu0 %3054 }
 0x98b   :  { %v4536_v60 = vpop.eup %4535  ;;  %4547 = vpow2.f32 %v3611_v40 }
 0x98c   :  { %v4538_v46 = vpop.eup %4537  ;;  %v2993_v53 = vadd.f32 1.0, %v4536_v60  ;;  %4549 = vpow2.f32 %v3609_v19 }
 0x98d   :  { %v4540_v57 = vpop.eup %4539  ;;  %v2991_v34 = vadd.f32 1.0, %v4538_v46 }
 0x98e   :  { %v4542_v4 = vpop.eup %4541  ;;  %4551 = vrcp.f32 %v2993_v53  ;;  %v2994_v36 = vadd.f32 1.0, %v4540_v57 }
 0x98f   :  { %4553 = vrcp.f32 %v2991_v34  ;;  %v2992_v44 = vadd.f32 1.0, %v4542_v4 }
 0x990   :  { %4555 = vrcp.f32 %v2994_v36 }
 0x991   :  { %4557 = vrcp.f32 %v2992_v44 }
 0x993   :  { %v4544_v35 = vpop.eup %4543 }
 0x994   :  { %v4546_v51 = vpop.eup %4545  ;;  %v2997_v15 = vadd.f32 1.0, %v4544_v35  ;;  %v3628_v35 = vld [vmem:[%s5778_s11 + $0x4] sm:$0xf] }
 0x995   :  { %v4548_v25 = vpop.eup %4547  ;;  %v2995_v16 = vadd.f32 1.0, %v4546_v51  ;;  %v4101_v51 = vld [vmem:[%s5779_s13] sm:$0xff]  }
 0x996   :  { %v4550_v26 = vpop.eup %4549  ;;  %4559 = vrcp.f32 %v2997_v15  ;;  %v2998_v13 = vadd.f32 1.0, %v4548_v25  ;;  %4025 = vmatprep.mubr.msk.bf16.mxu1 %vm1597_vm5, %v4101_v51 }
 0x997   :  { %4561 = vrcp.f32 %v2995_v16  ;;  %v2996_v43 = vadd.f32 1.0, %v4550_v26 }
 0x998   :  { %v4552_v20 = vpop.eup %4551  ;;  %4563 = vrcp.f32 %v2998_v13 }
 0x999   :  { %v4554_v23 = vpop.eup %4553  ;;  %4565 = vrcp.f32 %v2996_v43  ;;  %v3017_v11 = vmul.f32 %v4552_v20, %v5728_v21  ;;  %v4100_v21 = vld [vmem:[%s5777_s9 + $0x18] sm:$0xff]  }
 0x99a   :  { %v4556_v54 = vpop.eup %4555  ;;  %v3015_v9 = vmul.f32 %v4554_v23, %v2937_v42  ;;  %v3050_v42 = vpop.permute.xlu1 %3049  ;;  %v4102_v23 = vld [vmem:[%s5779_s13 + $0x8] sm:$0xff]  }
 0x99b   :  { %v4558_v5 = vpop.eup %4557  ;;  %v3018_v17 = vmul.f32 %v4556_v54, %v2948_v24 }
 0x99c   :  { %v3016_v49 = vmul.f32 %v4558_v5, %v2940_v63 }
 0x99d   :  { %v3024_v59 = vpack.c.bf16 %v3018_v17, %v3017_v11 }
 0x99e   :  { %v3023_v18 = vpack.c.bf16 %v3016_v49, %v3015_v9  ;;  %v3159_v15 = vpop.permute.xlu1 %3158 }
 0x9a0   :  { %v4560_v58 = vpop.eup %4559  ;;  %4003 = vmatprep.subr.bf16.mxu0 %v3023_v18 }
 0x9a1   :  { %v4562_v52 = vpop.eup %4561  ;;  %4004 = vmatpush3.bf16.msra.mxu0 %v3023_v18  ;;  %v3021_v1 = vmul.f32 %v4560_v58, %v2961_v38 }
 0x9a2   :  { %v4564_v32 = vpop.eup %4563  ;;  %4005 = vmatprep.subr.bf16.mxu0 %v3024_v59  ;;  %v3019_v37 = vmul.f32 %v4562_v52, %v2953_v22 }
 0x9a3   :  { %v4566_v61 = vpop.eup %4565  ;;  %v3022_v31 = vmul.f32 %v4564_v32, %v2964_v6 }
 0x9a4   :  { %v3020_v2 = vmul.f32 %v4566_v61, %v2956_v10 }
 0x9a5   :  { %4006 = vmatpush3.bf16.msra.mxu0 %v3024_v59  ;;  %v3026_v33 = vpack.c.bf16 %v3022_v31, %v3021_v1 }
 0x9a6   :  { %v3025_v39 = vpack.c.bf16 %v3020_v2, %v3019_v37 }
 0x9a8   :  { %4007 = vmatprep.subr.bf16.mxu0 %v3025_v39 }
 0x9a9   :  { %4008 = vmatpush3.bf16.msra.mxu0 %v3025_v39 }
 0x9aa   :  { %4009 = vmatprep.subr.bf16.mxu0 %v3026_v33 }
 0x9ad   :  { %4010 = vmatpush3.bf16.msra.mxu0 %v3026_v33 }
 0x9ae   :  { %4015 = vmatprep.subr.bf16.mxu0 %v4584_v14 }
 0x9b0   :  { %4012 = vmatmul.mubr.msk.bf16.vlgmr.msra.gmra.mrb[72].mxu0 %vm1445_vm2, %v4100_v21 }
 0x9b1   :  { %4019 = vmatprep.mubr.msk.bf16.mxu0 %vm4585_vm3, %v4584_v14 }
 0xa83   :  { %v4013_v7 = vpop.f32.mrb[72].mxu0 }
 0xa84   :  { %v3116_v56 = vadd.f32 %v4013_v7, %v3050_v42  ;;  %v3107_v24 = vpop.f32.mrb[73].mxu0 }
 0xa85   :  { %v3108_v8 = vadd.f32 %v3107_v24, %v3040_v48  ;;  %v4014_v55 = vpop.f32.mrb[74].mxu0 }
 0xa86   :  { %v3626_v63 = vmul.f32 -1.442695, %v3116_v56  ;;  %v3119_v41 = vadd.f32 %v4014_v55, %v3055_v0  ;;  %v3110_v47 = vpop.f32.mrb[75].mxu0 }
 0xa87   :  { %v3624_v12 = vmul.f32 -1.442695, %v3108_v8  ;;  %v3111_v29 = vadd.f32 %v3110_v47, %v3045_v27 }
 0xa88   :  { %4567 = vpow2.f32 %v3626_v63  ;;  %v3627_v38 = vmul.f32 -1.442695, %v3119_v41 }
 0xa89   :  { %4569 = vpow2.f32 %v3624_v12  ;;  %v3625_v28 = vmul.f32 -1.442695, %v3111_v29 }
 0xa8a   :  { %4571 = vpow2.f32 %v3627_v38 }
 0xa8b   :  { %4573 = vpow2.f32 %v3625_v28 }
 0xa92   :  { %v4568_v3 = vpop.eup %4567 }
 0xa93   :  { %v4570_v22 = vpop.eup %4569  ;;  %v3136_v45 = vadd.f32 1.0, %v4568_v3 }
 0xa94   :  { %v4572_v30 = vpop.eup %4571  ;;  %v3134_v6 = vadd.f32 1.0, %v4570_v22 }
 0xa95   :  { %v4574_v62 = vpop.eup %4573  ;;  %4575 = vrcp.f32 %v3136_v45  ;;  %v3137_v50 = vadd.f32 1.0, %v4572_v30 }
 0xa96   :  { %4577 = vrcp.f32 %v3134_v6  ;;  %v3135_v10 = vadd.f32 1.0, %v4574_v62 }
 0xa97   :  { %4579 = vrcp.f32 %v3137_v50 }
 0xa98   :  { %4581 = vrcp.f32 %v3135_v10 }
 0xa9f   :  { %v4576_v40 = vpop.eup %4575 }
 0xaa0   :  { %v4578_v19 = vpop.eup %4577  ;;  %v3148_v53 = vmul.f32 %v4576_v40, %v3116_v56 }
 0xaa1   :  { %v4580_v60 = vpop.eup %4579  ;;  %v3146_v34 = vmul.f32 %v4578_v19, %v3108_v8 }
 0xaa2   :  { %v4582_v46 = vpop.eup %4581  ;;  %v3149_v57 = vmul.f32 %v4580_v60, %v3119_v41 }
 0xaa3   :  { %v3147_v4 = vmul.f32 %v4582_v46, %v3111_v29 }
 0xaa4   :  { %v3151_v36 = vpack.c.bf16 %v3149_v57, %v3148_v53 }
 0xaa5   :  { %v3150_v44 = vpack.c.bf16 %v3147_v4, %v3146_v34 }
 0xaa7   :  { %4016 = vmatpush3.bf16.msra.mxu0 %v3150_v44 }
 0xaa8   :  { %4017 = vmatprep.subr.bf16.mxu0 %v4584_v14 }
 0xaab   :  { %4018 = vmatpush3.bf16.msra.mxu0 %v3151_v36 }
 0xaae   :  { %4020 = vmatmul.mubr.msk.bf16.vlgmr.msra.gmra.mrb[76].mxu0 %vm1538_vm4, %v3628_v35 }
 0xb81   :  { %v3198_v25 = vpop.f32.mrb[76].mxu0 }
 0xb82   :  { %v3199_v16 = vadd.f32 %v3198_v25, %v3159_v15  ;;  %v4021_v26 = vpop.f32.mrb[77].mxu0 }
 0xb83   :  { %v3201_v13 = vpop.f32.mrb[78].mxu0 }
 0xb84   :  { %v3204_v43 = vpack.c.bf16 %v3199_v16, %v3199_v16  ;;  %v4022_v14 = vpop.f32.mrb[79].mxu0 }
 0xb86   :  { %v3226_v20 = vsel %vm1604_vm6, %v3204_v43, 0  ;;  %4032 = vmatprep.subr.msk.bf16.mxu1 %vm1604_vm6, %v3204_v43 }
 0xb87   :  { %4024 = vmatpush3.bf16.msra.mxu1 %v3226_v20 }
 0xb8a   :  { %4026 = vmatmul.mubr.msk.bf16.vlgmr.msra.gmra.mrb[52].mxu1 %vm1597_vm5, %v4102_v23 }
 0xc5d   :  { %v4027_v54 = vpop.f32.mrb[52].mxu1 }
 0xc5e   :  { %v3262_v5 = vpop.f32.mrb[53].mxu1 }
 0xc5f   :  { %v4028_v11 = vpop.f32.mrb[54].mxu1  ;;  %3281 = vrot.lane.b32.xlu0 %v3262_v5, %s4586_s6 }
 0xc60   :  { %v3265_v17 = vpop.f32.mrb[55].mxu1 }
 0xc61   :  { %3283 = vrot.lane.b32.xlu1 %v3265_v17, %s4586_s6 }
 0xc63   :  { %3285 = vrot.lane.b32.xlu0 %v4027_v54, %s4586_s6 }
 0xc65   :  { %3287 = vrot.lane.b32.xlu1 %v4028_v11, %s4586_s6 }
 0xcd1   :  { %v3282_v9 = vpop.permute.xlu0 %3281 }
 0xcd2   :  { %3294 = vst.msk [vmem:[%s5780_s14] sm:$0xff] %vm3293_vm7, %v3282_v9 }
 0xcd3   :  { %v3284_v49 = vpop.permute.xlu1 %3283 }
 0xcd4   :  { %3295 = vst.msk [vmem:[%s5780_s14 + $0x8] sm:$0xff] %vm3293_vm7, %v3284_v49 }
 0xcd5   :  { %v3286_v59 = vpop.permute.xlu0 %3285 }
 0xcd6   :  { %3296 = vst.msk [vmem:[%s5780_s14 + $0x10] sm:$0xff] %vm3293_vm7, %v3286_v59 }
 0xcd7   :  { %v3288_v18 = vpop.permute.xlu1 %3287 }
 0xcd8   :  { %3297 = vst.msk [vmem:[%s5780_s14 + $0x18] sm:$0xff] %vm3293_vm7, %v3288_v18 }

</bundles_post_ra>
